<compile_context>
chip_gen: v7x
topology: tpu7x:2x2x1
jax: 0.10.0
libtpu: 0.0.40
codegen_flags: <defaults>
</compile_context>

<pallas_src>
import functools

import jax
import jax.numpy as jnp
from jax.experimental import pallas as pl
from jax.experimental.pallas import tpu as pltpu

LN_EPS = 1e-5          # GPT2Config.layer_norm_epsilon default
NEG_BIG = -1e30        # additive mask value; exp() underflows to exactly 0


def _layernorm(v, g, b):
    mu = jnp.mean(v, axis=-1, keepdims=True)
    var = jnp.mean(jnp.square(v - mu), axis=-1, keepdims=True)
    return (v - mu) * jax.lax.rsqrt(var + LN_EPS) * g + b


def _gelu_new(x):
    # HF "gelu_new": 0.5*x*(1+tanh(sqrt(2/pi)*(x+0.044715*x^3)))
    c = 0.7978845608028654
    return 0.5 * x * (1.0 + jnp.tanh(c * (x + 0.044715 * x * x * x)))


def _gpt_kernel(n_layer, n_head,
                x_ref, bias_ref, w_in_ref, b_in_ref, wpe_ref,
                ln1_g_ref, ln1_b_ref,
                wq_ref, wk_ref, wv_ref, bq_ref, bk_ref, bv_ref,
                wproj_ref, bproj_ref,
                ln2_g_ref, ln2_b_ref,
                fc_w_ref, fc_b_ref, mlp_pw_ref, mlp_pb_ref,
                lnf_g_ref, lnf_b_ref, w_out_ref, b_out_ref,
                o_ref, h_ref):
    l = pl.program_id(1)
    hd = wq_ref.shape[-1]
    scale = 1.0 / (hd ** 0.5)
    bf16 = jnp.bfloat16
    f32 = jnp.float32

    # ---- first layer step: read_in linear + positional embedding (embd_pdrop = 0) ----
    @pl.when(l == 0)
    def _():
        x = x_ref[...].astype(bf16)                                        # [M, D_obs]
        h0 = jnp.dot(x, w_in_ref[...], preferred_element_type=f32)
        h_ref[...] = h0 + b_in_ref[...] + wpe_ref[...]                     # [M, E] f32

    h = h_ref[...]                                                         # [M, E] f32 (carried)
    bias = bias_ref[...]                                                   # [M, M] block-diag causal

    # ---- attention block (attn_pdrop = resid_pdrop = 0) ----
    a_in = _layernorm(h, ln1_g_ref[0], ln1_b_ref[0]).astype(bf16)
    attn_acc = jnp.zeros(h.shape, f32)
    # TODO(synk): for long n_positions, tile the KV axis flash-style (online softmax) instead of a
    # full [M, M] score block per head.
    for hh in range(n_head):
        q = (jnp.dot(a_in, wq_ref[0, hh], preferred_element_type=f32)
             + bq_ref[0, hh]) * scale                                      # [M, hd], scale folded into q
        k = jnp.dot(a_in, wk_ref[0, hh], preferred_element_type=f32) + bk_ref[0, hh]
        v = jnp.dot(a_in, wv_ref[0, hh], preferred_element_type=f32) + bv_ref[0, hh]
        s = jax.lax.dot_general(q.astype(bf16), k.astype(bf16),
                                (((1,), (1,)), ((), ())),
                                preferred_element_type=f32) + bias         # [M, M]
        m = jnp.max(s, axis=-1, keepdims=True)
        p = jnp.exp(s - m)
        p = p * pl.reciprocal(jnp.sum(p, axis=-1, keepdims=True), approx=True)
        ctx = jnp.dot(p.astype(bf16), v.astype(bf16),
                      preferred_element_type=f32)                          # [M, hd]
        attn_acc = attn_acc + jnp.dot(ctx.astype(bf16), wproj_ref[0, hh],
                                      preferred_element_type=f32)          # [M, E]
    h = h + attn_acc + bproj_ref[0]

    # ---- MLP block ----
    m_in = _layernorm(h, ln2_g_ref[0], ln2_b_ref[0]).astype(bf16)
    ff = jnp.dot(m_in, fc_w_ref[0], preferred_element_type=f32) + fc_b_ref[0]
    ff = _gelu_new(ff)
    ff = jnp.dot(ff.astype(bf16), mlp_pw_ref[0], preferred_element_type=f32) + mlp_pb_ref[0]
    h = h + ff
    h_ref[...] = h

    # ---- last layer step: final LayerNorm + read_out linear (lane-padded output) ----
    @pl.when(l == n_layer - 1)
    def _():
        hf = _layernorm(h, lnf_g_ref[...], lnf_b_ref[...]).astype(bf16)
        o_ref[...] = jnp.dot(hf, w_out_ref[...], preferred_element_type=f32) + b_out_ref[...]


def _round_up(x, m):
    return ((x + m - 1) // m) * m


def _pick_bt(B, T):
    """Largest divisor of B so that bt*T targets ~128 rows (MXU/sublane friendly) and stays
    BlockSpec-legal (bt*T % 8 == 0 unless the block covers the whole batch)."""
    target = max(1, 128 // max(T, 1))
    bt = 1
    for c in range(1, B + 1):
        if B % c == 0 and c <= target and (c == B or (c * T) % 8 == 0):
            bt = c
    return bt


def _vmem_limit_bytes():
    # Raise the scoped-VMEM ceiling (defaults 16/32 MiB are too small once real layer weights are
    # double-buffered).  Generation-aware when the query is available, safe fallback otherwise.
    try:
        return int(pltpu.get_tpu_info().vmem_capacity_bytes) * 3 // 4
    except Exception:
        return 64 * 1024 * 1024


def gpt_forward(x, params, *, n_layer, n_head):
    f32, bf16 = jnp.float32, jnp.bfloat16
    B, T, D_obs = x.shape
    E = params["w_in"].shape[1]
    H, L = n_head, n_layer
    hd = E // H

    bt = _pick_bt(B, T)
    nb = B // bt
    M = bt * T
    d_pad = _round_up(D_obs, 128)                  # lane-dense output, sliced back below

    # ---- weight preparation (plain XLA, outside the kernel) ----
    w_in = params["w_in"].astype(bf16)                                     # (D_obs, E)
    b_in = params["b_in"].astype(f32).reshape(1, E)
    wpe = jnp.tile(params["wpe"][:T].astype(f32), (bt, 1))                 # (M, E)

    aw = params["attn_w"].astype(f32)                                      # (L, E, 3E)
    ab = params["attn_b"].astype(f32).reshape(L, 3 * E)

    def _heads_w(w2):                                                      # (L, E, E) -> (L, H, E, hd)
        return w2.reshape(L, E, H, hd).transpose(0, 2, 1, 3).astype(bf16)

    wq = _heads_w(aw[:, :, 0 * E:1 * E])
    wk = _heads_w(aw[:, :, 1 * E:2 * E])
    wv = _heads_w(aw[:, :, 2 * E:3 * E])
    bq = ab[:, 0 * E:1 * E].reshape(L, H, 1, hd)
    bk = ab[:, 1 * E:2 * E].reshape(L, H, 1, hd)
    bv = ab[:, 2 * E:3 * E].reshape(L, H, 1, hd)
    wproj = params["attn_pw"].astype(bf16).reshape(L, H, hd, E)            # per-head row slabs
    bproj = params["attn_pb"].astype(f32).reshape(L, 1, E)

    ln1_g = params["ln1_g"].astype(f32).reshape(L, 1, E)
    ln1_b = params["ln1_b"].astype(f32).reshape(L, 1, E)
    ln2_g = params["ln2_g"].astype(f32).reshape(L, 1, E)
    ln2_b = params["ln2_b"].astype(f32).reshape(L, 1, E)
    fc_w = params["fc_w"].astype(bf16)                                     # (L, E, 4E)
    fc_b = params["fc_b"].astype(f32).reshape(L, 1, 4 * E)
    mlp_pw = params["mlp_pw"].astype(bf16)                                 # (L, 4E, E)
    mlp_pb = params["mlp_pb"].astype(f32).reshape(L, 1, E)
    lnf_g = params["lnf_g"].astype(f32).reshape(1, E)
    lnf_b = params["lnf_b"].astype(f32).reshape(1, E)
    w_out = jnp.zeros((E, d_pad), bf16).at[:, :D_obs].set(params["w_out"].astype(bf16))
    b_out = jnp.zeros((1, d_pad), f32).at[:, :D_obs].set(params["b_out"].astype(f32).reshape(1, D_obs))

    # Block-diagonal causal additive bias over the bt sequences folded into M.
    pos = jnp.arange(M)
    same_seq = (pos[:, None] // T) == (pos[None, :] // T)
    causal = (pos[None, :] % T) <= (pos[:, None] % T)
    attn_bias = jnp.where(same_seq & causal, 0.0, NEG_BIG).astype(f32)     # (M, M)

    x2d = x.reshape(B * T, D_obs).astype(f32)

    def const_spec(arr):
        nd = arr.ndim
        return pl.BlockSpec(arr.shape, lambda b, l, _nd=nd: (0,) * _nd)

    def layer_spec(arr):
        nd = arr.ndim
        return pl.BlockSpec((1,) + arr.shape[1:],
                            lambda b, l, _nd=nd: (l,) + (0,) * (_nd - 1))

    in_specs = [pl.BlockSpec((M, D_obs), lambda b, l: (b, 0)),
                const_spec(attn_bias), const_spec(w_in), const_spec(b_in), const_spec(wpe),
                layer_spec(ln1_g), layer_spec(ln1_b),
                layer_spec(wq), layer_spec(wk), layer_spec(wv),
                layer_spec(bq), layer_spec(bk), layer_spec(bv),
                layer_spec(wproj), layer_spec(bproj),
                layer_spec(ln2_g), layer_spec(ln2_b),
                layer_spec(fc_w), layer_spec(fc_b),
                layer_spec(mlp_pw), layer_spec(mlp_pb),
                const_spec(lnf_g), const_spec(lnf_b),
                const_spec(w_out), const_spec(b_out)]
    out_specs = pl.BlockSpec((M, d_pad), lambda b, l: (b, 0))

    kernel = functools.partial(_gpt_kernel, n_layer, n_head)
    out = pl.pallas_call(
        kernel,
        out_shape=jax.ShapeDtypeStruct((B * T, d_pad), f32),
        grid=(nb, L),
        in_specs=in_specs,
        out_specs=out_specs,
        scratch_shapes=[pltpu.VMEM((M, E), f32)],      # hidden state carried across layer steps
        compiler_params=pltpu.CompilerParams(
            dimension_semantics=("parallel", "arbitrary"),
            vmem_limit_bytes=_vmem_limit_bytes()),
    )(x2d, attn_bias, w_in, b_in, wpe,
      ln1_g, ln1_b, wq, wk, wv, bq, bk, bv, wproj, bproj,
      ln2_g, ln2_b, fc_w, fc_b, mlp_pw, mlp_pb,
      lnf_g, lnf_b, w_out, b_out)

    return out.reshape(B, T, d_pad)[:, :, :D_obs]


def init_params(key, n_dims_obs, n_positions, n_embd, n_layer):
    std = 0.02
    ks = jax.random.split(key, 16)

    def nrm(k, shape):
        return jax.random.normal(k, shape, jnp.float32) * std

    return {
        "w_in":    nrm(ks[0], (n_dims_obs, n_embd)),
        "b_in":    nrm(ks[1], (1, n_embd)),
        "wpe":     nrm(ks[2], (n_positions, n_embd)),
        "ln1_g":   jnp.ones((n_layer, 1, n_embd), jnp.float32),
        "ln1_b":   jnp.zeros((n_layer, 1, n_embd), jnp.float32),
        "attn_w":  nrm(ks[3], (n_layer, n_embd, 3 * n_embd)),
        "attn_b":  nrm(ks[4], (n_layer, 1, 3 * n_embd)),
        "attn_pw": nrm(ks[5], (n_layer, n_embd, n_embd)),
        "attn_pb": nrm(ks[6], (n_layer, 1, n_embd)),
        "ln2_g":   jnp.ones((n_layer, 1, n_embd), jnp.float32),
        "ln2_b":   jnp.zeros((n_layer, 1, n_embd), jnp.float32),
        "fc_w":    nrm(ks[7], (n_layer, n_embd, 4 * n_embd)),
        "fc_b":    nrm(ks[8], (n_layer, 1, 4 * n_embd)),
        "mlp_pw":  nrm(ks[9], (n_layer, 4 * n_embd, n_embd)),
        "mlp_pb":  nrm(ks[10], (n_layer, 1, n_embd)),
        "lnf_g":   jnp.ones((1, n_embd), jnp.float32),
        "lnf_b":   jnp.zeros((1, n_embd), jnp.float32),
        "w_out":   nrm(ks[11], (n_embd, n_dims_obs)),
        "b_out":   nrm(ks[12], (1, n_dims_obs)),
    }


def _mm(a, w):
    # Matches the kernel's bf16-operand / f32-accumulation matmuls.
    return jnp.dot(a.astype(jnp.bfloat16), w.astype(jnp.bfloat16),
                   preferred_element_type=jnp.float32)


def gpt_reference(x, p, *, n_layer, n_head):
    """Pure-JAX reference (different code path: fused qkv proj + per-head lane slicing)."""
    B, T, _ = x.shape
    E = p["w_in"].shape[1]
    hd = E // n_head
    scale = 1.0 / (hd ** 0.5)
    bf16 = jnp.bfloat16
    h = _mm(x, p["w_in"]) + p["b_in"]
    h = h + p["wpe"][:T][None]
    mask = jnp.tril(jnp.ones((T, T), bool))
    for l in range(n_layer):
        a = _layernorm(h, p["ln1_g"][l], p["ln1_b"][l])
        qkv = _mm(a, p["attn_w"][l]) + p["attn_b"][l]
        q, k, v = jnp.split(qkv, 3, axis=-1)
        q = q.reshape(B, T, n_head, hd).transpose(0, 2, 1, 3) * scale
        k = k.reshape(B, T, n_head, hd).transpose(0, 2, 1, 3)
        v = v.reshape(B, T, n_head, hd).transpose(0, 2, 1, 3)
        s = jnp.einsum('bhqd,bhkd->bhqk', q.astype(bf16), k.astype(bf16),
                       preferred_element_type=jnp.float32)
        s = jnp.where(mask, s, NEG_BIG)
        pa = jax.nn.softmax(s, axis=-1)
        ctx = jnp.einsum('bhqk,bhkd->bhqd', pa.astype(bf16), v.astype(bf16),
                         preferred_element_type=jnp.float32)
        ctx = ctx.transpose(0, 2, 1, 3).reshape(B, T, E)
        h = h + _mm(ctx, p["attn_pw"][l]) + p["attn_pb"][l]
        m = _layernorm(h, p["ln2_g"][l], p["ln2_b"][l])
        ff = _gelu_new(_mm(m, p["fc_w"][l]) + p["fc_b"][l])
        h = h + _mm(ff, p["mlp_pw"][l]) + p["mlp_pb"][l]
    h = _layernorm(h, p["lnf_g"], p["lnf_b"])
    return _mm(h, p["w_out"]) + p["b_out"]


if __name__ == "__main__":
    # Small config consistent with GPTModel(n_dims_obs, n_positions, n_embd, n_layer, n_head)
    n_dims_obs, n_positions, n_embd, n_layer, n_head = 4, 8, 32, 2, 4
    B, T = 2, n_positions

    key = jax.random.PRNGKey(0)
    k_x, k_p = jax.random.split(key)
    ys = jax.random.normal(k_x, (B, T, n_dims_obs), jnp.float32)
    params = init_params(k_p, n_dims_obs, n_positions, n_embd, n_layer)

    out = gpt_forward(ys, params, n_layer=n_layer, n_head=n_head)
    out = jax.block_until_ready(out)

    ref = jax.block_until_ready(gpt_reference(ys, params, n_layer=n_layer, n_head=n_head))
    assert out.shape == (B, T, n_dims_obs)
    assert bool(jnp.all(jnp.isfinite(out)))
    assert jnp.allclose(out, ref, rtol=1e-2, atol=1e-2), "mismatch vs. pure-JAX reference"

    print("KERNEL_OK")
</pallas_src>

<mosaic_0001>
module attributes {stable_mosaic.version = 11 : i64} {
  func.func @_gpt_kernel(%arg0: i32, %arg1: i32, %arg2: memref<16x4xf32, #tpu.memory_space<vmem>>, %arg3: memref<16x16xf32, #tpu.memory_space<vmem>>, %arg4: memref<4x32xbf16, #tpu.memory_space<vmem>>, %arg5: memref<1x32xf32, #tpu.memory_space<vmem>>, %arg6: memref<16x32xf32, #tpu.memory_space<vmem>>, %arg7: memref<1x1x32xf32, #tpu.memory_space<vmem>>, %arg8: memref<1x1x32xf32, #tpu.memory_space<vmem>>, %arg9: memref<1x4x32x8xbf16, #tpu.memory_space<vmem>>, %arg10: memref<1x4x32x8xbf16, #tpu.memory_space<vmem>>, %arg11: memref<1x4x32x8xbf16, #tpu.memory_space<vmem>>, %arg12: memref<1x4x1x8xf32, #tpu.memory_space<vmem>>, %arg13: memref<1x4x1x8xf32, #tpu.memory_space<vmem>>, %arg14: memref<1x4x1x8xf32, #tpu.memory_space<vmem>>, %arg15: memref<1x4x8x32xbf16, #tpu.memory_space<vmem>>, %arg16: memref<1x1x32xf32, #tpu.memory_space<vmem>>, %arg17: memref<1x1x32xf32, #tpu.memory_space<vmem>>, %arg18: memref<1x1x32xf32, #tpu.memory_space<vmem>>, %arg19: memref<1x32x128xbf16, #tpu.memory_space<vmem>>, %arg20: memref<1x1x128xf32, #tpu.memory_space<vmem>>, %arg21: memref<1x128x32xbf16, #tpu.memory_space<vmem>>, %arg22: memref<1x1x32xf32, #tpu.memory_space<vmem>>, %arg23: memref<1x32xf32, #tpu.memory_space<vmem>>, %arg24: memref<1x32xf32, #tpu.memory_space<vmem>>, %arg25: memref<32x128xbf16, #tpu.memory_space<vmem>>, %arg26: memref<1x128xf32, #tpu.memory_space<vmem>>, %arg27: memref<16x128xf32, #tpu.memory_space<vmem>>, %arg28: memref<16x32xf32, #tpu.memory_space<vmem>>) attributes {dimension_semantics = [#tpu.dimension_semantics<parallel>, #tpu.dimension_semantics<arbitrary>], iteration_bounds = array<i64: 1, 2>, scalar_prefetch = 0 : i64, scratch_operands = 1 : i64, tpu.core_type = #tpu.core_type<tc>, window_params = [{transform_indices = @transform_0, window_bounds = array<i64: 16, 4>}, {pipeline_mode = #tpu.pipeline_mode<synchronous>, transform_indices = @transform_1, window_bounds = array<i64: 16, 16>}, {pipeline_mode = #tpu.pipeline_mode<synchronous>, transform_indices = @transform_2, window_bounds = array<i64: 4, 32>}, {pipeline_mode = #tpu.pipeline_mode<synchronous>, transform_indices = @transform_3, window_bounds = array<i64: 1, 32>}, {pipeline_mode = #tpu.pipeline_mode<synchronous>, transform_indices = @transform_4, window_bounds = array<i64: 16, 32>}, {transform_indices = @transform_5, window_bounds = array<i64: 1, 1, 32>}, {transform_indices = @transform_6, window_bounds = array<i64: 1, 1, 32>}, {transform_indices = @transform_7, window_bounds = array<i64: 1, 4, 32, 8>}, {transform_indices = @transform_8, window_bounds = array<i64: 1, 4, 32, 8>}, {transform_indices = @transform_9, window_bounds = array<i64: 1, 4, 32, 8>}, {transform_indices = @transform_10, window_bounds = array<i64: 1, 4, 1, 8>}, {transform_indices = @transform_11, window_bounds = array<i64: 1, 4, 1, 8>}, {transform_indices = @transform_12, window_bounds = array<i64: 1, 4, 1, 8>}, {transform_indices = @transform_13, window_bounds = array<i64: 1, 4, 8, 32>}, {transform_indices = @transform_14, window_bounds = array<i64: 1, 1, 32>}, {transform_indices = @transform_15, window_bounds = array<i64: 1, 1, 32>}, {transform_indices = @transform_16, window_bounds = array<i64: 1, 1, 32>}, {transform_indices = @transform_17, window_bounds = array<i64: 1, 32, 128>}, {transform_indices = @transform_18, window_bounds = array<i64: 1, 1, 128>}, {transform_indices = @transform_19, window_bounds = array<i64: 1, 128, 32>}, {transform_indices = @transform_20, window_bounds = array<i64: 1, 1, 32>}, {pipeline_mode = #tpu.pipeline_mode<synchronous>, transform_indices = @transform_21, window_bounds = array<i64: 1, 32>}, {pipeline_mode = #tpu.pipeline_mode<synchronous>, transform_indices = @transform_22, window_bounds = array<i64: 1, 32>}, {pipeline_mode = #tpu.pipeline_mode<synchronous>, transform_indices = @transform_23, window_bounds = array<i64: 32, 128>}, {pipeline_mode = #tpu.pipeline_mode<synchronous>, transform_indices = @transform_24, window_bounds = array<i64: 1, 128>}, {transform_indices = @transform_25, window_bounds = array<i64: 16, 128>}]} {
    %c0_i32 = arith.constant 0 : i32
    %0 = arith.cmpi eq, %arg1, %c0_i32 : i32
    %1 = arith.extui %0 : i1 to i32
    %c0_i32_0 = arith.constant 0 : i32
    %2 = arith.cmpi ne, %1, %c0_i32_0 : i32
    scf.if %2 {
      %c0_195 = arith.constant 0 : index
      %c0_196 = arith.constant 0 : index
      %278 = vector.load %arg2[%c0_195, %c0_196] : memref<16x4xf32, #tpu.memory_space<vmem>>, vector<16x4xf32>
      %279 = arith.truncf %278 : vector<16x4xf32> to vector<16x4xbf16>
      %c0_197 = arith.constant 0 : index
      %c0_198 = arith.constant 0 : index
      %280 = vector.load %arg4[%c0_197, %c0_198] : memref<4x32xbf16, #tpu.memory_space<vmem>>, vector<4x32xbf16>
      %cst_199 = arith.constant dense<0.000000e+00> : vector<16x32xf32>
      %281 = tpu.matmul %279, %280, %cst_199 {dimension_numbers = #tpu.dot_dimension_numbers<[1], [0], [0], [1], [0, 0, 1, 1], [], []>} : vector<16x4xbf16>, vector<4x32xbf16>, vector<16x32xf32> -> vector<16x32xf32>
      %c0_200 = arith.constant 0 : index
      %c0_201 = arith.constant 0 : index
      %282 = vector.load %arg5[%c0_200, %c0_201] : memref<1x32xf32, #tpu.memory_space<vmem>>, vector<1x32xf32>
      %283 = vector.broadcast %282 : vector<1x32xf32> to vector<16x32xf32>
      %284 = arith.addf %281, %283 : vector<16x32xf32>
      %c0_202 = arith.constant 0 : index
      %c0_203 = arith.constant 0 : index
      %285 = vector.load %arg6[%c0_202, %c0_203] : memref<16x32xf32, #tpu.memory_space<vmem>>, vector<16x32xf32>
      %286 = arith.addf %284, %285 : vector<16x32xf32>
      %c0_204 = arith.constant 0 : index
      %c0_205 = arith.constant 0 : index
      %287 = vector.load %arg28[%c0_204, %c0_205] : memref<16x32xf32, #tpu.memory_space<vmem>>, vector<16x32xf32>
      tpu.vector_store %arg28[%c0_204, %c0_205], %286 {strides = array<i32>} : memref<16x32xf32, #tpu.memory_space<vmem>>, vector<16x32xf32>,
    } else {
    }
    %c0 = arith.constant 0 : index
    %c0_1 = arith.constant 0 : index
    %3 = vector.load %arg28[%c0, %c0_1] : memref<16x32xf32, #tpu.memory_space<vmem>>, vector<16x32xf32>
    %c0_2 = arith.constant 0 : index
    %c0_3 = arith.constant 0 : index
    %4 = vector.load %arg3[%c0_2, %c0_3] : memref<16x16xf32, #tpu.memory_space<vmem>>, vector<16x16xf32>
    %c0_4 = arith.constant 0 : index
    %c0_5 = arith.constant 0 : index
    %c0_6 = arith.constant 0 : index
    %5 = vector.load %arg7[%c0_4, %c0_5, %c0_6] : memref<1x1x32xf32, #tpu.memory_space<vmem>>, vector<1x1x32xf32>
    %6 = vector.shape_cast %5 : vector<1x1x32xf32> to vector<1x32xf32>
    %c0_7 = arith.constant 0 : index
    %c0_8 = arith.constant 0 : index
    %c0_9 = arith.constant 0 : index
    %7 = vector.load %arg8[%c0_7, %c0_8, %c0_9] : memref<1x1x32xf32, #tpu.memory_space<vmem>>, vector<1x1x32xf32>
    %8 = vector.shape_cast %7 : vector<1x1x32xf32> to vector<1x32xf32>
    %cst = arith.constant dense<0.000000e+00> : vector<16xf32>
    %9 = vector.multi_reduction <add>, %3, %cst [1] : vector<16x32xf32> to vector<16xf32>
    %10 = vector.shape_cast %9 : vector<16xf32> to vector<16x1xf32>
    %cst_10 = arith.constant 3.200000e+01 : f32
    %11 = vector.broadcast %cst_10 : f32 to vector<16x1xf32>
    %12 = arith.divf %10, %11 : vector<16x1xf32>
    %13 = vector.broadcast %12 : vector<16x1xf32> to vector<16x32xf32>
    %14 = arith.subf %3, %13 : vector<16x32xf32>
    %15 = arith.mulf %14, %14 : vector<16x32xf32>
    %cst_11 = arith.constant dense<0.000000e+00> : vector<16xf32>
    %16 = vector.multi_reduction <add>, %15, %cst_11 [1] : vector<16x32xf32> to vector<16xf32>
    %17 = vector.shape_cast %16 : vector<16xf32> to vector<16x1xf32>
    %cst_12 = arith.constant 3.200000e+01 : f32
    %18 = vector.broadcast %cst_12 : f32 to vector<16x1xf32>
    %19 = arith.divf %17, %18 : vector<16x1xf32>
    %20 = vector.broadcast %12 : vector<16x1xf32> to vector<16x32xf32>
    %21 = arith.subf %3, %20 : vector<16x32xf32>
    %cst_13 = arith.constant 9.99999974E-6 : f32
    %22 = vector.broadcast %cst_13 : f32 to vector<16x1xf32>
    %23 = arith.addf %19, %22 : vector<16x1xf32>
    %24 = math.rsqrt %23 : vector<16x1xf32>
    %25 = vector.broadcast %24 : vector<16x1xf32> to vector<16x32xf32>
    %26 = arith.mulf %21, %25 : vector<16x32xf32>
    %27 = vector.broadcast %6 : vector<1x32xf32> to vector<16x32xf32>
    %28 = arith.mulf %26, %27 : vector<16x32xf32>
    %29 = vector.broadcast %8 : vector<1x32xf32> to vector<16x32xf32>
    %30 = arith.addf %28, %29 : vector<16x32xf32>
    %31 = arith.truncf %30 : vector<16x32xf32> to vector<16x32xbf16>
    %cst_14 = arith.constant 0.000000e+00 : f32
    %32 = vector.broadcast %cst_14 : f32 to vector<16x32xf32>
    %c0_15 = arith.constant 0 : index
    %c0_16 = arith.constant 0 : index
    %c0_17 = arith.constant 0 : index
    %c0_18 = arith.constant 0 : index
    %33 = vector.load %arg9[%c0_15, %c0_16, %c0_17, %c0_18] : memref<1x4x32x8xbf16, #tpu.memory_space<vmem>>, vector<1x1x32x8xbf16>
    %34 = vector.shape_cast %33 : vector<1x1x32x8xbf16> to vector<32x8xbf16>
    %cst_19 = arith.constant dense<0.000000e+00> : vector<16x8xf32>
    %35 = tpu.matmul %31, %34, %cst_19 {dimension_numbers = #tpu.dot_dimension_numbers<[1], [0], [0], [1], [0, 0, 1, 1], [], []>} : vector<16x32xbf16>, vector<32x8xbf16>, vector<16x8xf32> -> vector<16x8xf32>
    %c0_20 = arith.constant 0 : index
    %c0_21 = arith.constant 0 : index
    %c0_22 = arith.constant 0 : index
    %c0_23 = arith.constant 0 : index
    %36 = vector.load %arg12[%c0_20, %c0_21, %c0_22, %c0_23] : memref<1x4x1x8xf32, #tpu.memory_space<vmem>>, vector<1x1x1x8xf32>
    %37 = vector.shape_cast %36 : vector<1x1x1x8xf32> to vector<1x8xf32>
    %38 = vector.broadcast %37 : vector<1x8xf32> to vector<16x8xf32>
    %39 = arith.addf %35, %38 : vector<16x8xf32>
    %cst_24 = arith.constant 0.353553385 : f32
    %40 = vector.broadcast %cst_24 : f32 to vector<16x8xf32>
    %41 = arith.mulf %39, %40 : vector<16x8xf32>
    %c0_25 = arith.constant 0 : index
    %c0_26 = arith.constant 0 : index
    %c0_27 = arith.constant 0 : index
    %c0_28 = arith.constant 0 : index
    %42 = vector.load %arg10[%c0_25, %c0_26, %c0_27, %c0_28] : memref<1x4x32x8xbf16, #tpu.memory_space<vmem>>, vector<1x1x32x8xbf16>
    %43 = vector.shape_cast %42 : vector<1x1x32x8xbf16> to vector<32x8xbf16>
    %cst_29 = arith.constant dense<0.000000e+00> : vector<16x8xf32>
    %44 = tpu.matmul %31, %43, %cst_29 {dimension_numbers = #tpu.dot_dimension_numbers<[1], [0], [0], [1], [0, 0, 1, 1], [], []>} : vector<16x32xbf16>, vector<32x8xbf16>, vector<16x8xf32> -> vector<16x8xf32>
    %c0_30 = arith.constant 0 : index
    %c0_31 = arith.constant 0 : index
    %c0_32 = arith.constant 0 : index
    %c0_33 = arith.constant 0 : index
    %45 = vector.load %arg13[%c0_30, %c0_31, %c0_32, %c0_33] : memref<1x4x1x8xf32, #tpu.memory_space<vmem>>, vector<1x1x1x8xf32>
    %46 = vector.shape_cast %45 : vector<1x1x1x8xf32> to vector<1x8xf32>
    %47 = vector.broadcast %46 : vector<1x8xf32> to vector<16x8xf32>
    %48 = arith.addf %44, %47 : vector<16x8xf32>
    %c0_34 = arith.constant 0 : index
    %c0_35 = arith.constant 0 : index
    %c0_36 = arith.constant 0 : index
    %c0_37 = arith.constant 0 : index
    %49 = vector.load %arg11[%c0_34, %c0_35, %c0_36, %c0_37] : memref<1x4x32x8xbf16, #tpu.memory_space<vmem>>, vector<1x1x32x8xbf16>
    %50 = vector.shape_cast %49 : vector<1x1x32x8xbf16> to vector<32x8xbf16>
    %cst_38 = arith.constant dense<0.000000e+00> : vector<16x8xf32>
    %51 = tpu.matmul %31, %50, %cst_38 {dimension_numbers = #tpu.dot_dimension_numbers<[1], [0], [0], [1], [0, 0, 1, 1], [], []>} : vector<16x32xbf16>, vector<32x8xbf16>, vector<16x8xf32> -> vector<16x8xf32>
    %c0_39 = arith.constant 0 : index
    %c0_40 = arith.constant 0 : index
    %c0_41 = arith.constant 0 : index
    %c0_42 = arith.constant 0 : index
    %52 = vector.load %arg14[%c0_39, %c0_40, %c0_41, %c0_42] : memref<1x4x1x8xf32, #tpu.memory_space<vmem>>, vector<1x1x1x8xf32>
    %53 = vector.shape_cast %52 : vector<1x1x1x8xf32> to vector<1x8xf32>
    %54 = vector.broadcast %53 : vector<1x8xf32> to vector<16x8xf32>
    %55 = arith.addf %51, %54 : vector<16x8xf32>
    %56 = arith.truncf %41 : vector<16x8xf32> to vector<16x8xbf16>
    %57 = arith.truncf %48 : vector<16x8xf32> to vector<16x8xbf16>
    %cst_43 = arith.constant dense<0.000000e+00> : vector<16x16xf32>
    %58 = tpu.matmul %56, %57, %cst_43 {dimension_numbers = #tpu.dot_dimension_numbers<[1], [1], [0], [0], [0, 0, 1, 0], [], []>} : vector<16x8xbf16>, vector<16x8xbf16>, vector<16x16xf32> -> vector<16x16xf32>
    %59 = arith.addf %58, %4 : vector<16x16xf32>
    %cst_44 = arith.constant dense<0xFF800000> : vector<16xf32>
    %60 = vector.multi_reduction <maximumf>, %59, %cst_44 [1] : vector<16x16xf32> to vector<16xf32>
    %61 = vector.shape_cast %60 : vector<16xf32> to vector<16x1xf32>
    %62 = vector.broadcast %61 : vector<16x1xf32> to vector<16x16xf32>
    %63 = arith.subf %59, %62 : vector<16x16xf32>
    %64 = math.exp %63 : vector<16x16xf32>
    %cst_45 = arith.constant dense<0.000000e+00> : vector<16xf32>
    %65 = vector.multi_reduction <add>, %64, %cst_45 [1] : vector<16x16xf32> to vector<16xf32>
    %66 = vector.shape_cast %65 : vector<16xf32> to vector<16x1xf32>
    %67 = tpu.reciprocal %66 {approx = true} : vector<16x1xf32> -> vector<16x1xf32>
    %68 = vector.broadcast %67 : vector<16x1xf32> to vector<16x16xf32>
    %69 = arith.mulf %64, %68 : vector<16x16xf32>
    %70 = arith.truncf %69 : vector<16x16xf32> to vector<16x16xbf16>
    %71 = arith.truncf %55 : vector<16x8xf32> to vector<16x8xbf16>
    %cst_46 = arith.constant dense<0.000000e+00> : vector<16x8xf32>
    %72 = tpu.matmul %70, %71, %cst_46 {dimension_numbers = #tpu.dot_dimension_numbers<[1], [0], [0], [1], [0, 0, 1, 1], [], []>} : vector<16x16xbf16>, vector<16x8xbf16>, vector<16x8xf32> -> vector<16x8xf32>
    %73 = arith.truncf %72 : vector<16x8xf32> to vector<16x8xbf16>
    %c0_47 = arith.constant 0 : index
    %c0_48 = arith.constant 0 : index
    %c0_49 = arith.constant 0 : index
    %c0_50 = arith.constant 0 : index
    %74 = vector.load %arg15[%c0_47, %c0_48, %c0_49, %c0_50] : memref<1x4x8x32xbf16, #tpu.memory_space<vmem>>, vector<1x1x8x32xbf16>
    %75 = vector.shape_cast %74 : vector<1x1x8x32xbf16> to vector<8x32xbf16>
    %cst_51 = arith.constant dense<0.000000e+00> : vector<16x32xf32>
    %76 = tpu.matmul %73, %75, %cst_51 {dimension_numbers = #tpu.dot_dimension_numbers<[1], [0], [0], [1], [0, 0, 1, 1], [], []>} : vector<16x8xbf16>, vector<8x32xbf16>, vector<16x32xf32> -> vector<16x32xf32>
    %77 = arith.addf %32, %76 : vector<16x32xf32>
    %c0_52 = arith.constant 0 : index
    %c1 = arith.constant 1 : index
    %c0_53 = arith.constant 0 : index
    %c0_54 = arith.constant 0 : index
    %78 = vector.load %arg9[%c0_52, %c1, %c0_53, %c0_54] : memref<1x4x32x8xbf16, #tpu.memory_space<vmem>>, vector<1x1x32x8xbf16>
    %79 = vector.shape_cast %78 : vector<1x1x32x8xbf16> to vector<32x8xbf16>
    %cst_55 = arith.constant dense<0.000000e+00> : vector<16x8xf32>
    %80 = tpu.matmul %31, %79, %cst_55 {dimension_numbers = #tpu.dot_dimension_numbers<[1], [0], [0], [1], [0, 0, 1, 1], [], []>} : vector<16x32xbf16>, vector<32x8xbf16>, vector<16x8xf32> -> vector<16x8xf32>
    %c0_56 = arith.constant 0 : index
    %c1_57 = arith.constant 1 : index
    %c0_58 = arith.constant 0 : index
    %c0_59 = arith.constant 0 : index
    %81 = vector.load %arg12[%c0_56, %c1_57, %c0_58, %c0_59] : memref<1x4x1x8xf32, #tpu.memory_space<vmem>>, vector<1x1x1x8xf32>
    %82 = vector.shape_cast %81 : vector<1x1x1x8xf32> to vector<1x8xf32>
    %83 = vector.broadcast %82 : vector<1x8xf32> to vector<16x8xf32>
    %84 = arith.addf %80, %83 : vector<16x8xf32>
    %cst_60 = arith.constant 0.353553385 : f32
    %85 = vector.broadcast %cst_60 : f32 to vector<16x8xf32>
    %86 = arith.mulf %84, %85 : vector<16x8xf32>
    %c0_61 = arith.constant 0 : index
    %c1_62 = arith.constant 1 : index
    %c0_63 = arith.constant 0 : index
    %c0_64 = arith.constant 0 : index
    %87 = vector.load %arg10[%c0_61, %c1_62, %c0_63, %c0_64] : memref<1x4x32x8xbf16, #tpu.memory_space<vmem>>, vector<1x1x32x8xbf16>
    %88 = vector.shape_cast %87 : vector<1x1x32x8xbf16> to vector<32x8xbf16>
    %cst_65 = arith.constant dense<0.000000e+00> : vector<16x8xf32>
    %89 = tpu.matmul %31, %88, %cst_65 {dimension_numbers = #tpu.dot_dimension_numbers<[1], [0], [0], [1], [0, 0, 1, 1], [], []>} : vector<16x32xbf16>, vector<32x8xbf16>, vector<16x8xf32> -> vector<16x8xf32>
    %c0_66 = arith.constant 0 : index
    %c1_67 = arith.constant 1 : index
    %c0_68 = arith.constant 0 : index
    %c0_69 = arith.constant 0 : index
    %90 = vector.load %arg13[%c0_66, %c1_67, %c0_68, %c0_69] : memref<1x4x1x8xf32, #tpu.memory_space<vmem>>, vector<1x1x1x8xf32>
    %91 = vector.shape_cast %90 : vector<1x1x1x8xf32> to vector<1x8xf32>
    %92 = vector.broadcast %91 : vector<1x8xf32> to vector<16x8xf32>
    %93 = arith.addf %89, %92 : vector<16x8xf32>
    %c0_70 = arith.constant 0 : index
    %c1_71 = arith.constant 1 : index
    %c0_72 = arith.constant 0 : index
    %c0_73 = arith.constant 0 : index
    %94 = vector.load %arg11[%c0_70, %c1_71, %c0_72, %c0_73] : memref<1x4x32x8xbf16, #tpu.memory_space<vmem>>, vector<1x1x32x8xbf16>
    %95 = vector.shape_cast %94 : vector<1x1x32x8xbf16> to vector<32x8xbf16>
    %cst_74 = arith.constant dense<0.000000e+00> : vector<16x8xf32>
    %96 = tpu.matmul %31, %95, %cst_74 {dimension_numbers = #tpu.dot_dimension_numbers<[1], [0], [0], [1], [0, 0, 1, 1], [], []>} : vector<16x32xbf16>, vector<32x8xbf16>, vector<16x8xf32> -> vector<16x8xf32>
    %c0_75 = arith.constant 0 : index
    %c1_76 = arith.constant 1 : index
    %c0_77 = arith.constant 0 : index
    %c0_78 = arith.constant 0 : index
    %97 = vector.load %arg14[%c0_75, %c1_76, %c0_77, %c0_78] : memref<1x4x1x8xf32, #tpu.memory_space<vmem>>, vector<1x1x1x8xf32>
    %98 = vector.shape_cast %97 : vector<1x1x1x8xf32> to vector<1x8xf32>
    %99 = vector.broadcast %98 : vector<1x8xf32> to vector<16x8xf32>
    %100 = arith.addf %96, %99 : vector<16x8xf32>
    %101 = arith.truncf %86 : vector<16x8xf32> to vector<16x8xbf16>
    %102 = arith.truncf %93 : vector<16x8xf32> to vector<16x8xbf16>
    %cst_79 = arith.constant dense<0.000000e+00> : vector<16x16xf32>
    %103 = tpu.matmul %101, %102, %cst_79 {dimension_numbers = #tpu.dot_dimension_numbers<[1], [1], [0], [0], [0, 0, 1, 0], [], []>} : vector<16x8xbf16>, vector<16x8xbf16>, vector<16x16xf32> -> vector<16x16xf32>
    %104 = arith.addf %103, %4 : vector<16x16xf32>
    %cst_80 = arith.constant dense<0xFF800000> : vector<16xf32>
    %105 = vector.multi_reduction <maximumf>, %104, %cst_80 [1] : vector<16x16xf32> to vector<16xf32>
    %106 = vector.shape_cast %105 : vector<16xf32> to vector<16x1xf32>
    %107 = vector.broadcast %106 : vector<16x1xf32> to vector<16x16xf32>
    %108 = arith.subf %104, %107 : vector<16x16xf32>
    %109 = math.exp %108 : vector<16x16xf32>
    %cst_81 = arith.constant dense<0.000000e+00> : vector<16xf32>
    %110 = vector.multi_reduction <add>, %109, %cst_81 [1] : vector<16x16xf32> to vector<16xf32>
    %111 = vector.shape_cast %110 : vector<16xf32> to vector<16x1xf32>
    %112 = tpu.reciprocal %111 {approx = true} : vector<16x1xf32> -> vector<16x1xf32>
    %113 = vector.broadcast %112 : vector<16x1xf32> to vector<16x16xf32>
    %114 = arith.mulf %109, %113 : vector<16x16xf32>
    %115 = arith.truncf %114 : vector<16x16xf32> to vector<16x16xbf16>
    %116 = arith.truncf %100 : vector<16x8xf32> to vector<16x8xbf16>
    %cst_82 = arith.constant dense<0.000000e+00> : vector<16x8xf32>
    %117 = tpu.matmul %115, %116, %cst_82 {dimension_numbers = #tpu.dot_dimension_numbers<[1], [0], [0], [1], [0, 0, 1, 1], [], []>} : vector<16x16xbf16>, vector<16x8xbf16>, vector<16x8xf32> -> vector<16x8xf32>
    %118 = arith.truncf %117 : vector<16x8xf32> to vector<16x8xbf16>
    %c0_83 = arith.constant 0 : index
    %c1_84 = arith.constant 1 : index
    %c0_85 = arith.constant 0 : index
    %c0_86 = arith.constant 0 : index
    %119 = vector.load %arg15[%c0_83, %c1_84, %c0_85, %c0_86] : memref<1x4x8x32xbf16, #tpu.memory_space<vmem>>, vector<1x1x8x32xbf16>
    %120 = vector.shape_cast %119 : vector<1x1x8x32xbf16> to vector<8x32xbf16>
    %cst_87 = arith.constant dense<0.000000e+00> : vector<16x32xf32>
    %121 = tpu.matmul %118, %120, %cst_87 {dimension_numbers = #tpu.dot_dimension_numbers<[1], [0], [0], [1], [0, 0, 1, 1], [], []>} : vector<16x8xbf16>, vector<8x32xbf16>, vector<16x32xf32> -> vector<16x32xf32>
    %122 = arith.addf %77, %121 : vector<16x32xf32>
    %c0_88 = arith.constant 0 : index
    %c2 = arith.constant 2 : index
    %c0_89 = arith.constant 0 : index
    %c0_90 = arith.constant 0 : index
    %123 = vector.load %arg9[%c0_88, %c2, %c0_89, %c0_90] : memref<1x4x32x8xbf16, #tpu.memory_space<vmem>>, vector<1x1x32x8xbf16>
    %124 = vector.shape_cast %123 : vector<1x1x32x8xbf16> to vector<32x8xbf16>
    %cst_91 = arith.constant dense<0.000000e+00> : vector<16x8xf32>
    %125 = tpu.matmul %31, %124, %cst_91 {dimension_numbers = #tpu.dot_dimension_numbers<[1], [0], [0], [1], [0, 0, 1, 1], [], []>} : vector<16x32xbf16>, vector<32x8xbf16>, vector<16x8xf32> -> vector<16x8xf32>
    %c0_92 = arith.constant 0 : index
    %c2_93 = arith.constant 2 : index
    %c0_94 = arith.constant 0 : index
    %c0_95 = arith.constant 0 : index
    %126 = vector.load %arg12[%c0_92, %c2_93, %c0_94, %c0_95] : memref<1x4x1x8xf32, #tpu.memory_space<vmem>>, vector<1x1x1x8xf32>
    %127 = vector.shape_cast %126 : vector<1x1x1x8xf32> to vector<1x8xf32>
    %128 = vector.broadcast %127 : vector<1x8xf32> to vector<16x8xf32>
    %129 = arith.addf %125, %128 : vector<16x8xf32>
    %cst_96 = arith.constant 0.353553385 : f32
    %130 = vector.broadcast %cst_96 : f32 to vector<16x8xf32>
    %131 = arith.mulf %129, %130 : vector<16x8xf32>
    %c0_97 = arith.constant 0 : index
    %c2_98 = arith.constant 2 : index
    %c0_99 = arith.constant 0 : index
    %c0_100 = arith.constant 0 : index
    %132 = vector.load %arg10[%c0_97, %c2_98, %c0_99, %c0_100] : memref<1x4x32x8xbf16, #tpu.memory_space<vmem>>, vector<1x1x32x8xbf16>
    %133 = vector.shape_cast %132 : vector<1x1x32x8xbf16> to vector<32x8xbf16>
    %cst_101 = arith.constant dense<0.000000e+00> : vector<16x8xf32>
    %134 = tpu.matmul %31, %133, %cst_101 {dimension_numbers = #tpu.dot_dimension_numbers<[1], [0], [0], [1], [0, 0, 1, 1], [], []>} : vector<16x32xbf16>, vector<32x8xbf16>, vector<16x8xf32> -> vector<16x8xf32>
    %c0_102 = arith.constant 0 : index
    %c2_103 = arith.constant 2 : index
    %c0_104 = arith.constant 0 : index
    %c0_105 = arith.constant 0 : index
    %135 = vector.load %arg13[%c0_102, %c2_103, %c0_104, %c0_105] : memref<1x4x1x8xf32, #tpu.memory_space<vmem>>, vector<1x1x1x8xf32>
    %136 = vector.shape_cast %135 : vector<1x1x1x8xf32> to vector<1x8xf32>
    %137 = vector.broadcast %136 : vector<1x8xf32> to vector<16x8xf32>
    %138 = arith.addf %134, %137 : vector<16x8xf32>
    %c0_106 = arith.constant 0 : index
    %c2_107 = arith.constant 2 : index
    %c0_108 = arith.constant 0 : index
    %c0_109 = arith.constant 0 : index
    %139 = vector.load %arg11[%c0_106, %c2_107, %c0_108, %c0_109] : memref<1x4x32x8xbf16, #tpu.memory_space<vmem>>, vector<1x1x32x8xbf16>
    %140 = vector.shape_cast %139 : vector<1x1x32x8xbf16> to vector<32x8xbf16>
    %cst_110 = arith.constant dense<0.000000e+00> : vector<16x8xf32>
    %141 = tpu.matmul %31, %140, %cst_110 {dimension_numbers = #tpu.dot_dimension_numbers<[1], [0], [0], [1], [0, 0, 1, 1], [], []>} : vector<16x32xbf16>, vector<32x8xbf16>, vector<16x8xf32> -> vector<16x8xf32>
    %c0_111 = arith.constant 0 : index
    %c2_112 = arith.constant 2 : index
    %c0_113 = arith.constant 0 : index
    %c0_114 = arith.constant 0 : index
    %142 = vector.load %arg14[%c0_111, %c2_112, %c0_113, %c0_114] : memref<1x4x1x8xf32, #tpu.memory_space<vmem>>, vector<1x1x1x8xf32>
    %143 = vector.shape_cast %142 : vector<1x1x1x8xf32> to vector<1x8xf32>
    %144 = vector.broadcast %143 : vector<1x8xf32> to vector<16x8xf32>
    %145 = arith.addf %141, %144 : vector<16x8xf32>
    %146 = arith.truncf %131 : vector<16x8xf32> to vector<16x8xbf16>
    %147 = arith.truncf %138 : vector<16x8xf32> to vector<16x8xbf16>
    %cst_115 = arith.constant dense<0.000000e+00> : vector<16x16xf32>
    %148 = tpu.matmul %146, %147, %cst_115 {dimension_numbers = #tpu.dot_dimension_numbers<[1], [1], [0], [0], [0, 0, 1, 0], [], []>} : vector<16x8xbf16>, vector<16x8xbf16>, vector<16x16xf32> -> vector<16x16xf32>
    %149 = arith.addf %148, %4 : vector<16x16xf32>
    %cst_116 = arith.constant dense<0xFF800000> : vector<16xf32>
    %150 = vector.multi_reduction <maximumf>, %149, %cst_116 [1] : vector<16x16xf32> to vector<16xf32>
    %151 = vector.shape_cast %150 : vector<16xf32> to vector<16x1xf32>
    %152 = vector.broadcast %151 : vector<16x1xf32> to vector<16x16xf32>
    %153 = arith.subf %149, %152 : vector<16x16xf32>
    %154 = math.exp %153 : vector<16x16xf32>
    %cst_117 = arith.constant dense<0.000000e+00> : vector<16xf32>
    %155 = vector.multi_reduction <add>, %154, %cst_117 [1] : vector<16x16xf32> to vector<16xf32>
    %156 = vector.shape_cast %155 : vector<16xf32> to vector<16x1xf32>
    %157 = tpu.reciprocal %156 {approx = true} : vector<16x1xf32> -> vector<16x1xf32>
    %158 = vector.broadcast %157 : vector<16x1xf32> to vector<16x16xf32>
    %159 = arith.mulf %154, %158 : vector<16x16xf32>
    %160 = arith.truncf %159 : vector<16x16xf32> to vector<16x16xbf16>
    %161 = arith.truncf %145 : vector<16x8xf32> to vector<16x8xbf16>
    %cst_118 = arith.constant dense<0.000000e+00> : vector<16x8xf32>
    %162 = tpu.matmul %160, %161, %cst_118 {dimension_numbers = #tpu.dot_dimension_numbers<[1], [0], [0], [1], [0, 0, 1, 1], [], []>} : vector<16x16xbf16>, vector<16x8xbf16>, vector<16x8xf32> -> vector<16x8xf32>
    %163 = arith.truncf %162 : vector<16x8xf32> to vector<16x8xbf16>
    %c0_119 = arith.constant 0 : index
    %c2_120 = arith.constant 2 : index
    %c0_121 = arith.constant 0 : index
    %c0_122 = arith.constant 0 : index
    %164 = vector.load %arg15[%c0_119, %c2_120, %c0_121, %c0_122] : memref<1x4x8x32xbf16, #tpu.memory_space<vmem>>, vector<1x1x8x32xbf16>
    %165 = vector.shape_cast %164 : vector<1x1x8x32xbf16> to vector<8x32xbf16>
    %cst_123 = arith.constant dense<0.000000e+00> : vector<16x32xf32>
    %166 = tpu.matmul %163, %165, %cst_123 {dimension_numbers = #tpu.dot_dimension_numbers<[1], [0], [0], [1], [0, 0, 1, 1], [], []>} : vector<16x8xbf16>, vector<8x32xbf16>, vector<16x32xf32> -> vector<16x32xf32>
    %167 = arith.addf %122, %166 : vector<16x32xf32>
    %c0_124 = arith.constant 0 : index
    %c3 = arith.constant 3 : index
    %c0_125 = arith.constant 0 : index
    %c0_126 = arith.constant 0 : index
    %168 = vector.load %arg9[%c0_124, %c3, %c0_125, %c0_126] : memref<1x4x32x8xbf16, #tpu.memory_space<vmem>>, vector<1x1x32x8xbf16>
    %169 = vector.shape_cast %168 : vector<1x1x32x8xbf16> to vector<32x8xbf16>
    %cst_127 = arith.constant dense<0.000000e+00> : vector<16x8xf32>
    %170 = tpu.matmul %31, %169, %cst_127 {dimension_numbers = #tpu.dot_dimension_numbers<[1], [0], [0], [1], [0, 0, 1, 1], [], []>} : vector<16x32xbf16>, vector<32x8xbf16>, vector<16x8xf32> -> vector<16x8xf32>
    %c0_128 = arith.constant 0 : index
    %c3_129 = arith.constant 3 : index
    %c0_130 = arith.constant 0 : index
    %c0_131 = arith.constant 0 : index
    %171 = vector.load %arg12[%c0_128, %c3_129, %c0_130, %c0_131] : memref<1x4x1x8xf32, #tpu.memory_space<vmem>>, vector<1x1x1x8xf32>
    %172 = vector.shape_cast %171 : vector<1x1x1x8xf32> to vector<1x8xf32>
    %173 = vector.broadcast %172 : vector<1x8xf32> to vector<16x8xf32>
    %174 = arith.addf %170, %173 : vector<16x8xf32>
    %cst_132 = arith.constant 0.353553385 : f32
    %175 = vector.broadcast %cst_132 : f32 to vector<16x8xf32>
    %176 = arith.mulf %174, %175 : vector<16x8xf32>
    %c0_133 = arith.constant 0 : index
    %c3_134 = arith.constant 3 : index
    %c0_135 = arith.constant 0 : index
    %c0_136 = arith.constant 0 : index
    %177 = vector.load %arg10[%c0_133, %c3_134, %c0_135, %c0_136] : memref<1x4x32x8xbf16, #tpu.memory_space<vmem>>, vector<1x1x32x8xbf16>
    %178 = vector.shape_cast %177 : vector<1x1x32x8xbf16> to vector<32x8xbf16>
    %cst_137 = arith.constant dense<0.000000e+00> : vector<16x8xf32>
    %179 = tpu.matmul %31, %178, %cst_137 {dimension_numbers = #tpu.dot_dimension_numbers<[1], [0], [0], [1], [0, 0, 1, 1], [], []>} : vector<16x32xbf16>, vector<32x8xbf16>, vector<16x8xf32> -> vector<16x8xf32>
    %c0_138 = arith.constant 0 : index
    %c3_139 = arith.constant 3 : index
    %c0_140 = arith.constant 0 : index
    %c0_141 = arith.constant 0 : index
    %180 = vector.load %arg13[%c0_138, %c3_139, %c0_140, %c0_141] : memref<1x4x1x8xf32, #tpu.memory_space<vmem>>, vector<1x1x1x8xf32>
    %181 = vector.shape_cast %180 : vector<1x1x1x8xf32> to vector<1x8xf32>
    %182 = vector.broadcast %181 : vector<1x8xf32> to vector<16x8xf32>
    %183 = arith.addf %179, %182 : vector<16x8xf32>
    %c0_142 = arith.constant 0 : index
    %c3_143 = arith.constant 3 : index
    %c0_144 = arith.constant 0 : index
    %c0_145 = arith.constant 0 : index
    %184 = vector.load %arg11[%c0_142, %c3_143, %c0_144, %c0_145] : memref<1x4x32x8xbf16, #tpu.memory_space<vmem>>, vector<1x1x32x8xbf16>
    %185 = vector.shape_cast %184 : vector<1x1x32x8xbf16> to vector<32x8xbf16>
    %cst_146 = arith.constant dense<0.000000e+00> : vector<16x8xf32>
    %186 = tpu.matmul %31, %185, %cst_146 {dimension_numbers = #tpu.dot_dimension_numbers<[1], [0], [0], [1], [0, 0, 1, 1], [], []>} : vector<16x32xbf16>, vector<32x8xbf16>, vector<16x8xf32> -> vector<16x8xf32>
    %c0_147 = arith.constant 0 : index
    %c3_148 = arith.constant 3 : index
    %c0_149 = arith.constant 0 : index
    %c0_150 = arith.constant 0 : index
    %187 = vector.load %arg14[%c0_147, %c3_148, %c0_149, %c0_150] : memref<1x4x1x8xf32, #tpu.memory_space<vmem>>, vector<1x1x1x8xf32>
    %188 = vector.shape_cast %187 : vector<1x1x1x8xf32> to vector<1x8xf32>
    %189 = vector.broadcast %188 : vector<1x8xf32> to vector<16x8xf32>
    %190 = arith.addf %186, %189 : vector<16x8xf32>
    %191 = arith.truncf %176 : vector<16x8xf32> to vector<16x8xbf16>
    %192 = arith.truncf %183 : vector<16x8xf32> to vector<16x8xbf16>
    %cst_151 = arith.constant dense<0.000000e+00> : vector<16x16xf32>
    %193 = tpu.matmul %191, %192, %cst_151 {dimension_numbers = #tpu.dot_dimension_numbers<[1], [1], [0], [0], [0, 0, 1, 0], [], []>} : vector<16x8xbf16>, vector<16x8xbf16>, vector<16x16xf32> -> vector<16x16xf32>
    %194 = arith.addf %193, %4 : vector<16x16xf32>
    %cst_152 = arith.constant dense<0xFF800000> : vector<16xf32>
    %195 = vector.multi_reduction <maximumf>, %194, %cst_152 [1] : vector<16x16xf32> to vector<16xf32>
    %196 = vector.shape_cast %195 : vector<16xf32> to vector<16x1xf32>
    %197 = vector.broadcast %196 : vector<16x1xf32> to vector<16x16xf32>
    %198 = arith.subf %194, %197 : vector<16x16xf32>
    %199 = math.exp %198 : vector<16x16xf32>
    %cst_153 = arith.constant dense<0.000000e+00> : vector<16xf32>
    %200 = vector.multi_reduction <add>, %199, %cst_153 [1] : vector<16x16xf32> to vector<16xf32>
    %201 = vector.shape_cast %200 : vector<16xf32> to vector<16x1xf32>
    %202 = tpu.reciprocal %201 {approx = true} : vector<16x1xf32> -> vector<16x1xf32>
    %203 = vector.broadcast %202 : vector<16x1xf32> to vector<16x16xf32>
    %204 = arith.mulf %199, %203 : vector<16x16xf32>
    %205 = arith.truncf %204 : vector<16x16xf32> to vector<16x16xbf16>
    %206 = arith.truncf %190 : vector<16x8xf32> to vector<16x8xbf16>
    %cst_154 = arith.constant dense<0.000000e+00> : vector<16x8xf32>
    %207 = tpu.matmul %205, %206, %cst_154 {dimension_numbers = #tpu.dot_dimension_numbers<[1], [0], [0], [1], [0, 0, 1, 1], [], []>} : vector<16x16xbf16>, vector<16x8xbf16>, vector<16x8xf32> -> vector<16x8xf32>
    %208 = arith.truncf %207 : vector<16x8xf32> to vector<16x8xbf16>
    %c0_155 = arith.constant 0 : index
    %c3_156 = arith.constant 3 : index
    %c0_157 = arith.constant 0 : index
    %c0_158 = arith.constant 0 : index
    %209 = vector.load %arg15[%c0_155, %c3_156, %c0_157, %c0_158] : memref<1x4x8x32xbf16, #tpu.memory_space<vmem>>, vector<1x1x8x32xbf16>
    %210 = vector.shape_cast %209 : vector<1x1x8x32xbf16> to vector<8x32xbf16>
    %cst_159 = arith.constant dense<0.000000e+00> : vector<16x32xf32>
    %211 = tpu.matmul %208, %210, %cst_159 {dimension_numbers = #tpu.dot_dimension_numbers<[1], [0], [0], [1], [0, 0, 1, 1], [], []>} : vector<16x8xbf16>, vector<8x32xbf16>, vector<16x32xf32> -> vector<16x32xf32>
    %212 = arith.addf %167, %211 : vector<16x32xf32>
    %213 = arith.addf %3, %212 : vector<16x32xf32>
    %c0_160 = arith.constant 0 : index
    %c0_161 = arith.constant 0 : index
    %c0_162 = arith.constant 0 : index
    %214 = vector.load %arg16[%c0_160, %c0_161, %c0_162] : memref<1x1x32xf32, #tpu.memory_space<vmem>>, vector<1x1x32xf32>
    %215 = vector.shape_cast %214 : vector<1x1x32xf32> to vector<1x32xf32>
    %216 = vector.broadcast %215 : vector<1x32xf32> to vector<16x32xf32>
    %217 = arith.addf %213, %216 : vector<16x32xf32>
    %c0_163 = arith.constant 0 : index
    %c0_164 = arith.constant 0 : index
    %c0_165 = arith.constant 0 : index
    %218 = vector.load %arg17[%c0_163, %c0_164, %c0_165] : memref<1x1x32xf32, #tpu.memory_space<vmem>>, vector<1x1x32xf32>
    %219 = vector.shape_cast %218 : vector<1x1x32xf32> to vector<1x32xf32>
    %c0_166 = arith.constant 0 : index
    %c0_167 = arith.constant 0 : index
    %c0_168 = arith.constant 0 : index
    %220 = vector.load %arg18[%c0_166, %c0_167, %c0_168] : memref<1x1x32xf32, #tpu.memory_space<vmem>>, vector<1x1x32xf32>
    %221 = vector.shape_cast %220 : vector<1x1x32xf32> to vector<1x32xf32>
    %cst_169 = arith.constant dense<0.000000e+00> : vector<16xf32>
    %222 = vector.multi_reduction <add>, %217, %cst_169 [1] : vector<16x32xf32> to vector<16xf32>
    %223 = vector.shape_cast %222 : vector<16xf32> to vector<16x1xf32>
    %cst_170 = arith.constant 3.200000e+01 : f32
    %224 = vector.broadcast %cst_170 : f32 to vector<16x1xf32>
    %225 = arith.divf %223, %224 : vector<16x1xf32>
    %226 = vector.broadcast %225 : vector<16x1xf32> to vector<16x32xf32>
    %227 = arith.subf %217, %226 : vector<16x32xf32>
    %228 = arith.mulf %227, %227 : vector<16x32xf32>
    %cst_171 = arith.constant dense<0.000000e+00> : vector<16xf32>
    %229 = vector.multi_reduction <add>, %228, %cst_171 [1] : vector<16x32xf32> to vector<16xf32>
    %230 = vector.shape_cast %229 : vector<16xf32> to vector<16x1xf32>
    %cst_172 = arith.constant 3.200000e+01 : f32
    %231 = vector.broadcast %cst_172 : f32 to vector<16x1xf32>
    %232 = arith.divf %230, %231 : vector<16x1xf32>
    %233 = vector.broadcast %225 : vector<16x1xf32> to vector<16x32xf32>
    %234 = arith.subf %217, %233 : vector<16x32xf32>
    %cst_173 = arith.constant 9.99999974E-6 : f32
    %235 = vector.broadcast %cst_173 : f32 to vector<16x1xf32>
    %236 = arith.addf %232, %235 : vector<16x1xf32>
    %237 = math.rsqrt %236 : vector<16x1xf32>
    %238 = vector.broadcast %237 : vector<16x1xf32> to vector<16x32xf32>
    %239 = arith.mulf %234, %238 : vector<16x32xf32>
    %240 = vector.broadcast %219 : vector<1x32xf32> to vector<16x32xf32>
    %241 = arith.mulf %239, %240 : vector<16x32xf32>
    %242 = vector.broadcast %221 : vector<1x32xf32> to vector<16x32xf32>
    %243 = arith.addf %241, %242 : vector<16x32xf32>
    %244 = arith.truncf %243 : vector<16x32xf32> to vector<16x32xbf16>
    %c0_174 = arith.constant 0 : index
    %c0_175 = arith.constant 0 : index
    %c0_176 = arith.constant 0 : index
    %245 = vector.load %arg19[%c0_174, %c0_175, %c0_176] : memref<1x32x128xbf16, #tpu.memory_space<vmem>>, vector<1x32x128xbf16>
    %246 = vector.shape_cast %245 : vector<1x32x128xbf16> to vector<32x128xbf16>
    %cst_177 = arith.constant dense<0.000000e+00> : vector<16x128xf32>
    %247 = tpu.matmul %244, %246, %cst_177 {dimension_numbers = #tpu.dot_dimension_numbers<[1], [0], [0], [1], [0, 0, 1, 1], [], []>} : vector<16x32xbf16>, vector<32x128xbf16>, vector<16x128xf32> -> vector<16x128xf32>
    %c0_178 = arith.constant 0 : index
    %c0_179 = arith.constant 0 : index
    %c0_180 = arith.constant 0 : index
    %248 = vector.load %arg20[%c0_178, %c0_179, %c0_180] : memref<1x1x128xf32, #tpu.memory_space<vmem>>, vector<1x1x128xf32>
    %249 = vector.shape_cast %248 : vector<1x1x128xf32> to vector<1x128xf32>
    %250 = vector.broadcast %249 : vector<1x128xf32> to vector<16x128xf32>
    %251 = arith.addf %247, %250 : vector<16x128xf32>
    %cst_181 = arith.constant 5.000000e-01 : f32
    %252 = vector.broadcast %cst_181 : f32 to vector<16x128xf32>
    %253 = arith.mulf %252, %251 : vector<16x128xf32>
    %cst_182 = arith.constant 4.471500e-02 : f32
    %254 = vector.broadcast %cst_182 : f32 to vector<16x128xf32>
    %255 = arith.mulf %254, %251 : vector<16x128xf32>
    %256 = arith.mulf %255, %251 : vector<16x128xf32>
    %257 = arith.mulf %256, %251 : vector<16x128xf32>
    %258 = arith.addf %251, %257 : vector<16x128xf32>
    %cst_183 = arith.constant 0.797884583 : f32
    %259 = vector.broadcast %cst_183 : f32 to vector<16x128xf32>
    %260 = arith.mulf %259, %258 : vector<16x128xf32>
    %261 = math.tanh %260 : vector<16x128xf32>
    %cst_184 = arith.constant 1.000000e+00 : f32
    %262 = vector.broadcast %cst_184 : f32 to vector<16x128xf32>
    %263 = arith.addf %262, %261 : vector<16x128xf32>
    %264 = arith.mulf %253, %263 : vector<16x128xf32>
    %265 = arith.truncf %264 : vector<16x128xf32> to vector<16x128xbf16>
    %c0_185 = arith.constant 0 : index
    %c0_186 = arith.constant 0 : index
    %c0_187 = arith.constant 0 : index
    %266 = vector.load %arg21[%c0_185, %c0_186, %c0_187] : memref<1x128x32xbf16, #tpu.memory_space<vmem>>, vector<1x128x32xbf16>
    %267 = vector.shape_cast %266 : vector<1x128x32xbf16> to vector<128x32xbf16>
    %cst_188 = arith.constant dense<0.000000e+00> : vector<16x32xf32>
    %268 = tpu.matmul %265, %267, %cst_188 {dimension_numbers = #tpu.dot_dimension_numbers<[1], [0], [0], [1], [0, 0, 1, 1], [], []>} : vector<16x128xbf16>, vector<128x32xbf16>, vector<16x32xf32> -> vector<16x32xf32>
    %c0_189 = arith.constant 0 : index
    %c0_190 = arith.constant 0 : index
    %c0_191 = arith.constant 0 : index
    %269 = vector.load %arg22[%c0_189, %c0_190, %c0_191] : memref<1x1x32xf32, #tpu.memory_space<vmem>>, vector<1x1x32xf32>
    %270 = vector.shape_cast %269 : vector<1x1x32xf32> to vector<1x32xf32>
    %271 = vector.broadcast %270 : vector<1x32xf32> to vector<16x32xf32>
    %272 = arith.addf %268, %271 : vector<16x32xf32>
    %273 = arith.addf %217, %272 : vector<16x32xf32>
    %c0_192 = arith.constant 0 : index
    %c0_193 = arith.constant 0 : index
    %274 = vector.load %arg28[%c0_192, %c0_193] : memref<16x32xf32, #tpu.memory_space<vmem>>, vector<16x32xf32>
    tpu.vector_store %arg28[%c0_192, %c0_193], %273 {strides = array<i32>} : memref<16x32xf32, #tpu.memory_space<vmem>>, vector<16x32xf32>,
    %c1_i32 = arith.constant 1 : i32
    %275 = arith.cmpi eq, %arg1, %c1_i32 : i32
    %276 = arith.extui %275 : i1 to i32
    %c0_i32_194 = arith.constant 0 : i32
    %277 = arith.cmpi ne, %276, %c0_i32_194 : i32
    scf.if %277 {
      %c0_195 = arith.constant 0 : index
      %c0_196 = arith.constant 0 : index
      %278 = vector.load %arg23[%c0_195, %c0_196] : memref<1x32xf32, #tpu.memory_space<vmem>>, vector<1x32xf32>
      %c0_197 = arith.constant 0 : index
      %c0_198 = arith.constant 0 : index
      %279 = vector.load %arg24[%c0_197, %c0_198] : memref<1x32xf32, #tpu.memory_space<vmem>>, vector<1x32xf32>
      %cst_199 = arith.constant dense<0.000000e+00> : vector<16xf32>
      %280 = vector.multi_reduction <add>, %273, %cst_199 [1] : vector<16x32xf32> to vector<16xf32>
      %281 = vector.shape_cast %280 : vector<16xf32> to vector<16x1xf32>
      %cst_200 = arith.constant 3.200000e+01 : f32
      %282 = vector.broadcast %cst_200 : f32 to vector<16x1xf32>
      %283 = arith.divf %281, %282 : vector<16x1xf32>
      %284 = vector.broadcast %283 : vector<16x1xf32> to vector<16x32xf32>
      %285 = arith.subf %273, %284 : vector<16x32xf32>
      %286 = arith.mulf %285, %285 : vector<16x32xf32>
      %cst_201 = arith.constant dense<0.000000e+00> : vector<16xf32>
      %287 = vector.multi_reduction <add>, %286, %cst_201 [1] : vector<16x32xf32> to vector<16xf32>
      %288 = vector.shape_cast %287 : vector<16xf32> to vector<16x1xf32>
      %cst_202 = arith.constant 3.200000e+01 : f32
      %289 = vector.broadcast %cst_202 : f32 to vector<16x1xf32>
      %290 = arith.divf %288, %289 : vector<16x1xf32>
      %291 = vector.broadcast %283 : vector<16x1xf32> to vector<16x32xf32>
      %292 = arith.subf %273, %291 : vector<16x32xf32>
      %cst_203 = arith.constant 9.99999974E-6 : f32
      %293 = vector.broadcast %cst_203 : f32 to vector<16x1xf32>
      %294 = arith.addf %290, %293 : vector<16x1xf32>
      %295 = math.rsqrt %294 : vector<16x1xf32>
      %296 = vector.broadcast %295 : vector<16x1xf32> to vector<16x32xf32>
      %297 = arith.mulf %292, %296 : vector<16x32xf32>
      %298 = vector.broadcast %278 : vector<1x32xf32> to vector<16x32xf32>
      %299 = arith.mulf %297, %298 : vector<16x32xf32>
      %300 = vector.broadcast %279 : vector<1x32xf32> to vector<16x32xf32>
      %301 = arith.addf %299, %300 : vector<16x32xf32>
      %302 = arith.truncf %301 : vector<16x32xf32> to vector<16x32xbf16>
      %c0_204 = arith.constant 0 : index
      %c0_205 = arith.constant 0 : index
      %303 = vector.load %arg25[%c0_204, %c0_205] : memref<32x128xbf16, #tpu.memory_space<vmem>>, vector<32x128xbf16>
      %cst_206 = arith.constant dense<0.000000e+00> : vector<16x128xf32>
      %304 = tpu.matmul %302, %303, %cst_206 {dimension_numbers = #tpu.dot_dimension_numbers<[1], [0], [0], [1], [0, 0, 1, 1], [], []>} : vector<16x32xbf16>, vector<32x128xbf16>, vector<16x128xf32> -> vector<16x128xf32>
      %c0_207 = arith.constant 0 : index
      %c0_208 = arith.constant 0 : index
      %305 = vector.load %arg26[%c0_207, %c0_208] : memref<1x128xf32, #tpu.memory_space<vmem>>, vector<1x128xf32>
      %306 = vector.broadcast %305 : vector<1x128xf32> to vector<16x128xf32>
      %307 = arith.addf %304, %306 : vector<16x128xf32>
      %c0_209 = arith.constant 0 : index
      %c0_210 = arith.constant 0 : index
      %308 = vector.load %arg27[%c0_209, %c0_210] : memref<16x128xf32, #tpu.memory_space<vmem>>, vector<16x128xf32>
      tpu.vector_store %arg27[%c0_209, %c0_210], %307 {strides = array<i32>} : memref<16x128xf32, #tpu.memory_space<vmem>>, vector<16x128xf32>,
    } else {
    }
    return
  }
  func.func @transform_0(%arg0: i32, %arg1: i32) -> (i32, i32) {
    %c0_i32 = arith.constant 0 : i32
    %c0_i32_0 = arith.constant 0 : i32
    return %arg0, %c0_i32 : i32, i32
  }
  func.func @transform_1(%arg0: i32, %arg1: i32) -> (i32, i32) {
    %c0_i32 = arith.constant 0 : i32
    %c0_i32_0 = arith.constant 0 : i32
    %c0_i32_1 = arith.constant 0 : i32
    return %c0_i32, %c0_i32_0 : i32, i32
  }
  func.func @transform_2(%arg0: i32, %arg1: i32) -> (i32, i32) {
    %c0_i32 = arith.constant 0 : i32
    %c0_i32_0 = arith.constant 0 : i32
    %c0_i32_1 = arith.constant 0 : i32
    return %c0_i32, %c0_i32_0 : i32, i32
  }
  func.func @transform_3(%arg0: i32, %arg1: i32) -> (i32, i32) {
    %c0_i32 = arith.constant 0 : i32
    %c0_i32_0 = arith.constant 0 : i32
    %c0_i32_1 = arith.constant 0 : i32
    return %c0_i32, %c0_i32_0 : i32, i32
  }
  func.func @transform_4(%arg0: i32, %arg1: i32) -> (i32, i32) {
    %c0_i32 = arith.constant 0 : i32
    %c0_i32_0 = arith.constant 0 : i32
    %c0_i32_1 = arith.constant 0 : i32
    return %c0_i32, %c0_i32_0 : i32, i32
  }
  func.func @transform_5(%arg0: i32, %arg1: i32) -> (i32, i32, i32) {
    %c0_i32 = arith.constant 0 : i32
    %c0_i32_0 = arith.constant 0 : i32
    %c0_i32_1 = arith.constant 0 : i32
    return %arg1, %c0_i32, %c0_i32_0 : i32, i32, i32
  }
  func.func @transform_6(%arg0: i32, %arg1: i32) -> (i32, i32, i32) {
    %c0_i32 = arith.constant 0 : i32
    %c0_i32_0 = arith.constant 0 : i32
    %c0_i32_1 = arith.constant 0 : i32
    return %arg1, %c0_i32, %c0_i32_0 : i32, i32, i32
  }
  func.func @transform_7(%arg0: i32, %arg1: i32) -> (i32, i32, i32, i32) {
    %c0_i32 = arith.constant 0 : i32
    %c0_i32_0 = arith.constant 0 : i32
    %c0_i32_1 = arith.constant 0 : i32
    %c0_i32_2 = arith.constant 0 : i32
    return %arg1, %c0_i32, %c0_i32_0, %c0_i32_1 : i32, i32, i32, i32
  }
  func.func @transform_8(%arg0: i32, %arg1: i32) -> (i32, i32, i32, i32) {
    %c0_i32 = arith.constant 0 : i32
    %c0_i32_0 = arith.constant 0 : i32
    %c0_i32_1 = arith.constant 0 : i32
    %c0_i32_2 = arith.constant 0 : i32
    return %arg1, %c0_i32, %c0_i32_0, %c0_i32_1 : i32, i32, i32, i32
  }
  func.func @transform_9(%arg0: i32, %arg1: i32) -> (i32, i32, i32, i32) {
    %c0_i32 = arith.constant 0 : i32
    %c0_i32_0 = arith.constant 0 : i32
    %c0_i32_1 = arith.constant 0 : i32
    %c0_i32_2 = arith.constant 0 : i32
    return %arg1, %c0_i32, %c0_i32_0, %c0_i32_1 : i32, i32, i32, i32
  }
  func.func @transform_10(%arg0: i32, %arg1: i32) -> (i32, i32, i32, i32) {
    %c0_i32 = arith.constant 0 : i32
    %c0_i32_0 = arith.constant 0 : i32
    %c0_i32_1 = arith.constant 0 : i32
    %c0_i32_2 = arith.constant 0 : i32
    return %arg1, %c0_i32, %c0_i32_0, %c0_i32_1 : i32, i32, i32, i32
  }
  func.func @transform_11(%arg0: i32, %arg1: i32) -> (i32, i32, i32, i32) {
    %c0_i32 = arith.constant 0 : i32
    %c0_i32_0 = arith.constant 0 : i32
    %c0_i32_1 = arith.constant 0 : i32
    %c0_i32_2 = arith.constant 0 : i32
    return %arg1, %c0_i32, %c0_i32_0, %c0_i32_1 : i32, i32, i32, i32
  }
  func.func @transform_12(%arg0: i32, %arg1: i32) -> (i32, i32, i32, i32) {
    %c0_i32 = arith.constant 0 : i32
    %c0_i32_0 = arith.constant 0 : i32
    %c0_i32_1 = arith.constant 0 : i32
    %c0_i32_2 = arith.constant 0 : i32
    return %arg1, %c0_i32, %c0_i32_0, %c0_i32_1 : i32, i32, i32, i32
  }
  func.func @transform_13(%arg0: i32, %arg1: i32) -> (i32, i32, i32, i32) {
    %c0_i32 = arith.constant 0 : i32
    %c0_i32_0 = arith.constant 0 : i32
    %c0_i32_1 = arith.constant 0 : i32
    %c0_i32_2 = arith.constant 0 : i32
    return %arg1, %c0_i32, %c0_i32_0, %c0_i32_1 : i32, i32, i32, i32
  }
  func.func @transform_14(%arg0: i32, %arg1: i32) -> (i32, i32, i32) {
    %c0_i32 = arith.constant 0 : i32
    %c0_i32_0 = arith.constant 0 : i32
    %c0_i32_1 = arith.constant 0 : i32
    return %arg1, %c0_i32, %c0_i32_0 : i32, i32, i32
  }
  func.func @transform_15(%arg0: i32, %arg1: i32) -> (i32, i32, i32) {
    %c0_i32 = arith.constant 0 : i32
    %c0_i32_0 = arith.constant 0 : i32
    %c0_i32_1 = arith.constant 0 : i32
    return %arg1, %c0_i32, %c0_i32_0 : i32, i32, i32
  }
  func.func @transform_16(%arg0: i32, %arg1: i32) -> (i32, i32, i32) {
    %c0_i32 = arith.constant 0 : i32
    %c0_i32_0 = arith.constant 0 : i32
    %c0_i32_1 = arith.constant 0 : i32
    return %arg1, %c0_i32, %c0_i32_0 : i32, i32, i32
  }
  func.func @transform_17(%arg0: i32, %arg1: i32) -> (i32, i32, i32) {
    %c0_i32 = arith.constant 0 : i32
    %c0_i32_0 = arith.constant 0 : i32
    %c0_i32_1 = arith.constant 0 : i32
    return %arg1, %c0_i32, %c0_i32_0 : i32, i32, i32
  }
  func.func @transform_18(%arg0: i32, %arg1: i32) -> (i32, i32, i32) {
    %c0_i32 = arith.constant 0 : i32
    %c0_i32_0 = arith.constant 0 : i32
    %c0_i32_1 = arith.constant 0 : i32
    return %arg1, %c0_i32, %c0_i32_0 : i32, i32, i32
  }
  func.func @transform_19(%arg0: i32, %arg1: i32) -> (i32, i32, i32) {
    %c0_i32 = arith.constant 0 : i32
    %c0_i32_0 = arith.constant 0 : i32
    %c0_i32_1 = arith.constant 0 : i32
    return %arg1, %c0_i32, %c0_i32_0 : i32, i32, i32
  }
  func.func @transform_20(%arg0: i32, %arg1: i32) -> (i32, i32, i32) {
    %c0_i32 = arith.constant 0 : i32
    %c0_i32_0 = arith.constant 0 : i32
    %c0_i32_1 = arith.constant 0 : i32
    return %arg1, %c0_i32, %c0_i32_0 : i32, i32, i32
  }
  func.func @transform_21(%arg0: i32, %arg1: i32) -> (i32, i32) {
    %c0_i32 = arith.constant 0 : i32
    %c0_i32_0 = arith.constant 0 : i32
    %c0_i32_1 = arith.constant 0 : i32
    return %c0_i32, %c0_i32_0 : i32, i32
  }
  func.func @transform_22(%arg0: i32, %arg1: i32) -> (i32, i32) {
    %c0_i32 = arith.constant 0 : i32
    %c0_i32_0 = arith.constant 0 : i32
    %c0_i32_1 = arith.constant 0 : i32
    return %c0_i32, %c0_i32_0 : i32, i32
  }
  func.func @transform_23(%arg0: i32, %arg1: i32) -> (i32, i32) {
    %c0_i32 = arith.constant 0 : i32
    %c0_i32_0 = arith.constant 0 : i32
    %c0_i32_1 = arith.constant 0 : i32
    return %c0_i32, %c0_i32_0 : i32, i32
  }
  func.func @transform_24(%arg0: i32, %arg1: i32) -> (i32, i32) {
    %c0_i32 = arith.constant 0 : i32
    %c0_i32_0 = arith.constant 0 : i32
    %c0_i32_1 = arith.constant 0 : i32
    return %c0_i32, %c0_i32_0 : i32, i32
  }
  func.func @transform_25(%arg0: i32, %arg1: i32) -> (i32, i32) {
    %c0_i32 = arith.constant 0 : i32
    %c0_i32_0 = arith.constant 0 : i32
    return %arg0, %c0_i32 : i32, i32
  }
}

</mosaic_0001>

<bundles_post_ra>
// kernel: tpu_custom_call.1
= control target key start
LH: loop header
LB: loop body
LE: loop exit
PB: predicated region body
PF: predicated region fallthrough
CT: control target
= control target key end

     0   :  { %s6881_s0 = inlined_call_operand.hbm [shape: f32[16,4], index: 0, kind: input, shape index: {}]   ;;  %s6882_s1 = inlined_call_operand.hbm [shape: f32[16,16], index: 1, kind: input, shape index: {}]   ;;  %s6883_s2 = inlined_call_operand.hbm [shape: bf16[4,32], index: 2, kind: input, shape index: {}]   ;;  %s6884_s3 = inlined_call_operand.hbm [shape: f32[1,32], index: 3, kind: input, shape index: {}]   ;;  %s6885_s4 = inlined_call_operand.hbm [shape: f32[16,32], index: 4, kind: input, shape index: {}]   ;;  %s6886_s5 = inlined_call_operand.hbm [shape: f32[2,1,32], index: 5, kind: input, shape index: {}]   ;;  %s6887_s6 = inlined_call_operand.hbm [shape: f32[2,1,32], index: 6, kind: input, shape index: {}]   ;;  %s6888_s7 = inlined_call_operand.hbm [shape: bf16[2,4,32,8], index: 7, kind: input, shape index: {}]   ;;  %s6889_s8 = inlined_call_operand.hbm [shape: bf16[2,4,32,8], index: 8, kind: input, shape index: {}]   ;;  %s6890_s9 = inlined_call_operand.hbm [shape: bf16[2,4,32,8], index: 9, kind: input, shape index: {}]   ;;  %s6891_s10 = inlined_call_operand.hbm [shape: f32[2,4,1,8], index: 10, kind: input, shape index: {}]   ;;  %s6892_s11 = inlined_call_operand.hbm [shape: f32[2,4,1,8], index: 11, kind: input, shape index: {}]   ;;  %s6893_s12 = inlined_call_operand.hbm [shape: f32[2,4,1,8], index: 12, kind: input, shape index: {}]   ;;  %s6894_s13 = inlined_call_operand.hbm [shape: bf16[2,4,8,32], index: 13, kind: input, shape index: {}]   ;;  %s6895_s14 = inlined_call_operand.hbm [shape: f32[2,1,32], index: 14, kind: input, shape index: {}]   ;;  %s6896_s15 = inlined_call_operand.hbm [shape: f32[2,1,32], index: 15, kind: input, shape index: {}]   ;;  %s6897_s16 = inlined_call_operand.hbm [shape: f32[2,1,32], index: 16, kind: input, shape index: {}]   ;;  %s6898_s17 = inlined_call_operand.hbm [shape: bf16[2,32,128], index: 17, kind: input, shape index: {}]   ;;  %s6899_s18 = inlined_call_operand.hbm [shape: f32[2,1,128], index: 18, kind: input, shape index: {}]   ;;  %s6900_s19 = inlined_call_operand.hbm [shape: bf16[2,128,32], index: 19, kind: input, shape index: {}]   ;;  %s6901_s20 = inlined_call_operand.hbm [shape: f32[2,1,32], index: 20, kind: input, shape index: {}]   ;;  %s6902_s21 = inlined_call_operand.hbm [shape: f32[1,32], index: 21, kind: input, shape index: {}]   ;;  %s6903_s22 = inlined_call_operand.hbm [shape: f32[1,32], index: 22, kind: input, shape index: {}]   ;;  %s6904_s23 = inlined_call_operand.hbm [shape: bf16[32,128], index: 23, kind: input, shape index: {}]   ;;  %s6905_s24 = inlined_call_operand.hbm [shape: f32[1,128], index: 24, kind: input, shape index: {}]   ;;  %s6906_s25 = inlined_call_operand.hbm [shape: f32[16,128], index: 25, kind: output, shape index: {}]  }
   0x1   :  { %6969 = sst [smem:[#allocation64_spill]] %s6881_s0 }
   0x2   :  { %6970 = sst [smem:[#allocation65_spill]] %s6882_s1 }
   0x3   :  { %6971 = sst [smem:[#allocation66_spill]] %s6883_s2 }
   0x4   :  { %6972 = sst [smem:[#allocation67_spill]] %s6884_s3 }
   0x5   :  { %6973 = sst [smem:[#allocation68_spill]] %s6885_s4 }
   0x6   :  { %6974 = sst [smem:[#allocation69_spill]] %s6886_s5 }
   0x7   :  { %6975 = sst [smem:[#allocation70_spill]] %s6887_s6 }
   0x8   :  { %6976 = sst [smem:[#allocation71_spill]] %s6888_s7 }
   0x9   :  { %6977 = sst [smem:[#allocation72_spill]] %s6889_s8 }
   0xa   :  { %6978 = sst [smem:[#allocation73_spill]] %s6890_s9 }
   0xb   :  { %6979 = sst [smem:[#allocation74_spill]] %s6891_s10 }
   0xc   :  { %6980 = sst [smem:[#allocation75_spill]] %s6892_s11 }
   0xd   :  { %6981 = sst [smem:[#allocation76_spill]] %s6893_s12 }
   0xe   :  { %6982 = sst [smem:[#allocation77_spill]] %s6894_s13 }
   0xf   :  { %6983 = sst [smem:[#allocation78_spill]] %s6895_s14 }
  0x10   :  { %6984 = sst [smem:[#allocation79_spill]] %s6896_s15 }
  0x11   :  { %6985 = sst [smem:[#allocation80_spill]] %s6897_s16 }
  0x12   :  { %6986 = sst [smem:[#allocation81_spill]] %s6899_s18 }
  0x13   :  { %6987 = sst [smem:[#allocation82_spill]] %s6901_s20 }
  0x14   :  { %6988 = sst [smem:[#allocation83_spill]] %s6902_s21 }
  0x15   :  { %6989 = sst [smem:[#allocation84_spill]] %s6903_s22 }
  0x16   :  { %6990 = sst [smem:[#allocation85_spill]] %s6904_s23 }
  0x17   :  { %6991 = sst [smem:[#allocation86_spill]] %s6906_s25 }
  0x18   :  { %30 = vsyncpa [#allocation4], 0 }
  0x19   :  { %31 = vsyncpa [#allocation7], 0 }
  0x1a   :  { %32 = vsyncpa [#allocation10], 0 }
  0x1b   :  { %33 = vsyncpa [#allocation13], 0 }
  0x1c   :  { %35 = vsyncpa [#allocation13 + $0x1], 0 }
  0x1d   :  { %36 = vsyncpa [#allocation16], 0 }
  0x1e   :  { %38 = vsyncpa [#allocation16 + $0x1], 0 }
  0x1f   :  { %39 = vsyncpa [#allocation19], 0 }
  0x20   :  { %41 = vsyncpa [#allocation19 + $0x1], 0 }
  0x21   :  { %42 = vsyncpa [#allocation22], 0 }
  0x22   :  { %44 = vsyncpa [#allocation22 + $0x1], 0 }
  0x23   :  { %45 = vsyncpa [#allocation25], 0 }
  0x24   :  { %47 = vsyncpa [#allocation25 + $0x1], 0 }
  0x25   :  { %48 = vsyncpa [#allocation28], 0 }
  0x26   :  { %50 = vsyncpa [#allocation28 + $0x1], 0 }
  0x27   :  { %51 = vsyncpa [#allocation31], 0 }
  0x28   :  { %53 = vsyncpa [#allocation31 + $0x1], 0 }
  0x29   :  { %54 = vsyncpa [#allocation34], 0 }
  0x2a   :  { %56 = vsyncpa [#allocation34 + $0x1], 0 }
  0x2b   :  { %57 = vsyncpa [#allocation37], 0 }
  0x2c   :  { %58 = vsyncpa [#allocation40], 0 }
  0x2d   :  { %59 = vsyncpa [#allocation5], 0  ;;  %s5669_s29 = smov 0   ;;  %s5671_s2 = smov 0  }
  0x2e   :  { %s5673_s6 = smov 0   ;;  %s5675_s30 = smov 0  }
  0x2f   :  { %s5677_s7 = smov 0   ;;  %s5679_s3 = smov 0  }
  0x30 LB: > { %6992 = sst [smem:[#allocation57_spill]] %s5479_s2  ;;  %s5698_s26 = sadd.s32 4294967295, %s5495_s3   ;;  %s5495_s3 = sphi %s5679_s3, %s65_s3   ;;  %s5491_s7 = sphi %s5677_s7, %s7075_s7   ;;  %s5487_s30 = sphi %s5675_s30, %s7074_s30   ;;  %s5483_s6 = sphi %s5673_s6, %s7073_s6   ;;  %s5479_s2 = sphi %s5671_s2, %s7072_s2   ;;  %s5475_s29 = sphi %s5669_s29, %s7069_s29  }
  0x31   : > { %6993 = sst [smem:[#allocation58_spill]] %s5487_s30  ;;  %s74_s1 = sadd.s32 1, %s5491_s7 }
  0x32   : > { %6994 = sst [smem:[#allocation59_spill]] %s5698_s26  ;;  %p75_p0 = scmp.ge.s32.totalorder %s74_s1, 2 }
  0x33   : > { %s194_s8 = sadd.s32 1, %s5483_s6  ;;  %p201_p1 = scmp.ne.s32.totalorder %s5483_s6, %s5479_s2 }
  0x34   : > { %p202_p2 = scmp.eq.s32.totalorder %s5495_s3, 0  ;;  %s7077_s1 = smov (%p75_p0, %s74_s1), 0 }
  0x35   : > { %6995 = sst [smem:[#allocation60_spill]] %s7077_s1  ;;  %p207_p4 = scmp.ne.s32.totalorder %s5479_s2, %s5475_s29 }
  0x36   : > { %p5707_p3 = por %p202_p2, %p201_p1  ;;  %s191_s4 = ssub.s32 %s5491_s7, %s7077_s1 }
  0x37   : > { %p6927_p5 = scmp.eq.s32.totalorder %s5698_s26, 0  ;;  %p192_p6 = scmp.eq.s32.totalorder %s191_s4, 0 }
  0x38   : > { %s6996_s27 = scalar_select %p5707_p3, 1, 0 }
  0x39   : > { %p3887_p7 = scmp.ge.s32.totalorder %s5495_s3, 1  ;;  %p5718_p8 = por %p6927_p5, %p207_p4 }
  0x3a   : > { %p718_p9 = scmp.lt.s32.totalorder %s5495_s3, 3  ;;  %s5497_s0 = smov [#allocation6]  }
  0x3b   : > { %s6997_s28 = scalar_select %p5718_p8, 1, 0 }
  0x3c   : > { %s5724_s9 = scalar_select %p192_p6, %s5483_s6, %s194_s8  }
  0x3d   : > { %6998 = sst [smem:[#allocation61_spill]] %s6997_s28  ;;  %p5726_p10 = pnand %p3887_p7, %p718_p9 }
  0x3e   : > { %6999 = sst [smem:[#allocation62_spill]] %s5724_s9  ;;  %s746_s29 = sshll.u32 %s5497_s0, 4  ;;  %s747_s29 = int_to_ptr.vmem [resolvable:$true] %s746_s29 }
  0x3f   : > { %s7000_s5 = scalar_select %p5726_p10, 1, 0 }
  0x40   : > { %p4459_p11 = pneg %p5726_p10  ;;  %s5498_s1 = smov [#allocation9]  }
  0x41   : > { %7001 = sst [smem:[#allocation63_spill]] %s7000_s5  ;;  %s771_s25 = sshll.u32 %s5498_s1, 4  ;;  %s5738_s25 = int_to_ptr.vmem [resolvable:$true] %s771_s25 }
  0x42   : > { %p5734_p12 = pnand %p4459_p11, %p6927_p5  ;;  %s7003_s30 = sld [smem:[#allocation65_spill]] }
  0x44   : > { %p5748_p0 = pneg %p5734_p12 }
  0x48   : > { %s7004_s28 = smov %s7003_s30  ;;  %s4667_s2 = scalar_lea.hbm %s7003_s30, 256 }
  0x49   : > { %p4668_p13 = scmp.ne.s32.totalorder %s7004_s28, %s4667_s2  ;;  %p4674_p4 = scmp.lt.u32.totalorder %s4667_s2, %s7004_s28 }
  0x4b   : > { %p4670_p1 = pnand %p5748_p0, %p4668_p13 }
  0x4d   : > { %p4671_p2 = pneg %p4670_p1 }
  0x4f   : > { %p4676_p6 = pnand %p4674_p4, %p4671_p2 }
  0x51   : > { %4679 = shalt.err (!%p4676_p6)
}
  0x52   : > { %s4680_s30 = scalar_lea.vmem %s747_s29, 256  ;;  %p4688_p5 = scmp.lt.s32.totalorder %s747_s29, %s747_s29 }
  0x53   : > { %p4681_p7 = scmp.ne.s32.totalorder %s747_s29, %s4680_s30  ;;  %p4689_p8 = scmp.lt.s32.totalorder %s4680_s30, %s4680_s30 }
  0x55   : > { %p4683_p9 = pnand %p4681_p7, %p5748_p0  ;;  %p4690_p10 = por %p4689_p8, %p4688_p5 }
  0x57   : > { %p4684_p11 = pneg %p4683_p9 }
  0x59   : > { %p4691_p3 = pnand %p4690_p10, %p4684_p11 }
  0x5b   : > { %4694 = shalt.err (!%p4691_p3)
}
  0x5c   : > { %s6935_s20 = smov 128   ;;  %s6937_s9 = smov 8  }
  0x5d   : > { %4465 = dma.hbm_to_vmem [thread:$0]  (!%p5734_p12), %s7004_s28, 256, %s747_s29, [#allocation7], %s6935_s20, %s6935_s20, %s6937_s9  }
  0x5e   : > { %s7006_s1 = sld [smem:[#allocation67_spill]] }
  0x64   : > { %s4695_s18 = scalar_lea.hbm %s7006_s1, 16 }
  0x65   : > { %p4696_p3 = scmp.ne.s32.totalorder %s7006_s1, %s4695_s18  ;;  %p4702_p10 = scmp.lt.u32.totalorder %s4695_s18, %s7006_s1 }
  0x67   : > { %p4698_p5 = pnand %p4696_p3, %p5748_p0 }
  0x69   : > { %p4699_p8 = pneg %p4698_p5 }
  0x6b   : > { %p4704_p13 = pnand %p4702_p10, %p4699_p8 }
  0x6d   : > { %4707 = shalt.err (!%p4704_p13)
}
  0x6e   : > { %s4708_s29 = scalar_lea.vmem %s5738_s25, 16  ;;  %s4715_s16 = scalar_lea.vmem %s5738_s25, 32 }
  0x6f   : > { %p4709_p1 = scmp.ne.s32.totalorder %s5738_s25, %s4708_s29  ;;  %p4716_p6 = scmp.lt.s32.totalorder %s5738_s25, %s5738_s25 }
  0x70   : > { %p4717_p7 = scmp.lt.s32.totalorder %s4715_s16, %s4708_s29 }
  0x71   : > { %p4711_p2 = pnand %p4709_p1, %p5748_p0 }
  0x72   : > { %p4718_p9 = por %p4717_p7, %p4716_p6 }
  0x73   : > { %p4712_p4 = pneg %p4711_p2 }
  0x75   : > { %p4719_p11 = pnand %p4718_p9, %p4712_p4 }
  0x77   : > { %4722 = shalt.err (!%p4719_p11)
}
  0x78   : > { %4471 = dma.hbm_to_vmem [thread:$0]  (!%p5734_p12), %s7006_s1, 16, %s5738_s25, [#allocation10]  }
  0x79   : > { %s5501_s18 = smov [#allocation36]   ;;  %s5502_s26 = smov [#allocation39]  }
  0x7a   : > { %s795_s2 = sshll.u32 %s5501_s18, 4  ;;  %s816_s5 = sshll.u32 %s5502_s26, 4  ;;  %s796_s2 = int_to_ptr.vmem [resolvable:$true] %s795_s2  ;;  %s817_s5 = int_to_ptr.vmem [resolvable:$true] %s816_s5 }
  0x7b   : > { %s7007_s21 = sld [smem:[#allocation83_spill]] }
  0x81   : > { %s4723_s29 = scalar_lea.hbm %s7007_s21, 16 }
  0x82   : > { %p4724_p3 = scmp.ne.s32.totalorder %s7007_s21, %s4723_s29  ;;  %p4730_p10 = scmp.lt.u32.totalorder %s4723_s29, %s7007_s21 }
  0x84   : > { %p4726_p5 = pnand %p4724_p3, %p5748_p0 }
  0x86   : > { %p4727_p8 = pneg %p4726_p5 }
  0x88   : > { %p4732_p13 = pnand %p4730_p10, %p4727_p8 }
  0x8a   : > { %4735 = shalt.err (!%p4732_p13)
}
  0x8b   : > { %s4736_s25 = scalar_lea.vmem %s796_s2, 16  ;;  %s4743_s14 = scalar_lea.vmem %s796_s2, 32 }
  0x8c   : > { %p4737_p1 = scmp.ne.s32.totalorder %s796_s2, %s4736_s25  ;;  %p4744_p6 = scmp.lt.s32.totalorder %s796_s2, %s796_s2 }
  0x8d   : > { %p4745_p7 = scmp.lt.s32.totalorder %s4743_s14, %s4736_s25 }
  0x8e   : > { %p4739_p2 = pnand %p4737_p1, %p5748_p0 }
  0x8f   : > { %p4746_p9 = por %p4745_p7, %p4744_p6 }
  0x90   : > { %p4740_p4 = pneg %p4739_p2 }
  0x92   : > { %p4747_p11 = pnand %p4746_p9, %p4740_p4 }
  0x94   : > { %4750 = shalt.err (!%p4747_p11)
}
  0x95   : > { %4477 = dma.hbm_to_vmem [thread:$0]  (!%p5734_p12), %s7007_s21, 16, %s796_s2, [#allocation37]  }
  0x96   : > { %s7008_s23 = sld [smem:[#allocation85_spill]] }
  0x9c   : > { %s4751_s8 = scalar_lea.hbm %s7008_s23, 256 }
  0x9d   : > { %p4752_p3 = scmp.ne.s32.totalorder %s7008_s23, %s4751_s8  ;;  %p4758_p10 = scmp.lt.u32.totalorder %s4751_s8, %s7008_s23 }
  0x9f   : > { %p4754_p5 = pnand %p4752_p3, %p5748_p0 }
  0xa1   : > { %p4755_p8 = pneg %p4754_p5 }
  0xa3   : > { %p4760_p13 = pnand %p4758_p10, %p4755_p8 }
  0xa5   : > { %4763 = shalt.err (!%p4760_p13)
}
  0xa6   : > { %s4764_s25 = scalar_lea.vmem %s817_s5, 256  ;;  %p4772_p6 = scmp.lt.s32.totalorder %s817_s5, %s817_s5 }
  0xa7   : > { %p4765_p1 = scmp.ne.s32.totalorder %s817_s5, %s4764_s25  ;;  %p4773_p7 = scmp.lt.s32.totalorder %s4764_s25, %s4764_s25 }
  0xa9   : > { %p4767_p2 = pnand %p4765_p1, %p5748_p0  ;;  %p4774_p9 = por %p4773_p7, %p4772_p6 }
  0xab   : > { %p4768_p4 = pneg %p4767_p2 }
  0xad   : > { %p4775_p11 = pnand %p4774_p9, %p4768_p4 }
  0xaf   : > { %4778 = shalt.err (!%p4775_p11)
}
  0xb0   : > { %s5503_s2 = smov 64   ;;  %s5504_s14 = smov 4  }
  0xb1   : > { %4483 = dma.hbm_to_vmem [thread:$0]  (!%p5734_p12), %s7008_s23, 256, %s817_s5, [#allocation40], %s5503_s2, %s5503_s2, %s5504_s14  }
  0xb2   : > { %s5505_s9 = smov [#allocation3]   ;;  %s5506_s8 = smov [#allocation8]  }
  0xb3   : > { %s733_s26 = sshll.u32 %s5505_s9, 4  ;;  %s760_s30 = sshll.u32 %s5506_s8, 4  ;;  %s734_s26 = int_to_ptr.vmem [resolvable:$true] %s733_s26  ;;  %s761_s30 = int_to_ptr.vmem [resolvable:$true] %s760_s30 }
  0xb4   : > { %s7009_s12 = sld [smem:[#allocation64_spill]] }
  0xba   : > { %s4779_s25 = scalar_lea.hbm %s7009_s12, 256 }
  0xbb   : > { %p4780_p3 = scmp.ne.s32.totalorder %s7009_s12, %s4779_s25  ;;  %p4786_p10 = scmp.lt.u32.totalorder %s4779_s25, %s7009_s12 }
  0xbd   : > { %p4782_p5 = pnand %p4780_p3, %p5748_p0 }
  0xbf   : > { %p4783_p8 = pneg %p4782_p5 }
  0xc1   : > { %p4788_p13 = pnand %p4786_p10, %p4783_p8 }
  0xc3   : > { %4791 = shalt.err (!%p4788_p13)
}
  0xc4   : > { %s4792_s5 = scalar_lea.vmem %s734_s26, 256  ;;  %p4800_p6 = scmp.lt.s32.totalorder %s734_s26, %s734_s26 }
  0xc5   : > { %p4793_p1 = scmp.ne.s32.totalorder %s734_s26, %s4792_s5  ;;  %p4801_p7 = scmp.lt.s32.totalorder %s4792_s5, %s4792_s5 }
  0xc7   : > { %p4795_p2 = pnand %p4793_p1, %p5748_p0  ;;  %p4802_p9 = por %p4801_p7, %p4800_p6 }
  0xc9   : > { %p4796_p4 = pneg %p4795_p2 }
  0xcb   : > { %p4803_p11 = pnand %p4802_p9, %p4796_p4 }
  0xcd   : > { %4806 = shalt.err (!%p4803_p11)
}
  0xce   : > { %s7010_s21 = smov 8   ;;  %s7011_s1 = smov 128  }
  0xcf   : > { %4462 = dma.hbm_to_vmem [thread:$0]  (!%p5734_p12), %s7009_s12, 256, %s734_s26, [#allocation4], %s7011_s1, %s7011_s1, %s7010_s21  }
  0xd0   : > { %s7012_s20 = sld [smem:[#allocation66_spill]] }
  0xd6   : > { %s4807_s18 = scalar_lea.hbm %s7012_s20, 32 }
  0xd7   : > { %p4808_p3 = scmp.ne.s32.totalorder %s7012_s20, %s4807_s18  ;;  %p4814_p10 = scmp.lt.u32.totalorder %s4807_s18, %s7012_s20 }
  0xd9   : > { %p4810_p5 = pnand %p4808_p3, %p5748_p0 }
  0xdb   : > { %p4811_p8 = pneg %p4810_p5 }
  0xdd   : > { %p4816_p13 = pnand %p4814_p10, %p4811_p8 }
  0xdf   : > { %4819 = shalt.err (!%p4816_p13)
}
  0xe0   : > { %s4820_s25 = scalar_lea.vmem %s761_s30, 32  ;;  %p4828_p6 = scmp.lt.s32.totalorder %s761_s30, %s761_s30 }
  0xe1   : > { %p4821_p1 = scmp.ne.s32.totalorder %s761_s30, %s4820_s25  ;;  %p4829_p7 = scmp.lt.s32.totalorder %s4820_s25, %s4820_s25 }
  0xe3   : > { %p4823_p2 = pnand %p4821_p1, %p5748_p0  ;;  %p4830_p9 = por %p4829_p7, %p4828_p6 }
  0xe5   : > { %p4824_p4 = pneg %p4823_p2 }
  0xe7   : > { %p4831_p11 = pnand %p4830_p9, %p4824_p4 }
  0xe9   : > { %4834 = shalt.err (!%p4831_p11)
}
  0xea   : > { %4468 = dma.hbm_to_vmem [thread:$0]  (!%p5734_p12), %s7012_s20, 32, %s761_s30, [#allocation7]  }
  0xeb   : > { %s5507_s10 = smov [#allocation11]   ;;  %s5508_s2 = smov [#allocation38]  }
  0xec   : > { %s781_s28 = sshll.u32 %s5507_s10, 4  ;;  %s806_s14 = sshll.u32 %s5508_s2, 4  ;;  %s782_s28 = int_to_ptr.vmem [resolvable:$true] %s781_s28  ;;  %s807_s14 = int_to_ptr.vmem [resolvable:$true] %s806_s14 }
  0xed   : > { %s7013_s8 = sld [smem:[#allocation68_spill]] }
  0xf3   : > { %s4835_s29 = scalar_lea.hbm %s7013_s8, 256 }
  0xf4   : > { %p4836_p3 = scmp.ne.s32.totalorder %s7013_s8, %s4835_s29  ;;  %p4842_p10 = scmp.lt.u32.totalorder %s4835_s29, %s7013_s8 }
  0xf6   : > { %p4838_p5 = pnand %p4836_p3, %p5748_p0 }
  0xf8   : > { %p4839_p8 = pneg %p4838_p5 }
  0xfa   : > { %p4844_p13 = pnand %p4842_p10, %p4839_p8 }
  0xfc   : > { %4847 = shalt.err (!%p4844_p13)
}
  0xfd   : > { %s4848_s30 = scalar_lea.vmem %s782_s28, 256  ;;  %p4856_p6 = scmp.lt.s32.totalorder %s782_s28, %s782_s28 }
  0xfe   : > { %p4849_p1 = scmp.ne.s32.totalorder %s782_s28, %s4848_s30  ;;  %p4857_p7 = scmp.lt.s32.totalorder %s4848_s30, %s4848_s30 }
 0x100   : > { %p4851_p2 = pnand %p4849_p1, %p5748_p0  ;;  %p4858_p9 = por %p4857_p7, %p4856_p6 }
 0x102   : > { %p4852_p4 = pneg %p4851_p2 }
 0x104   : > { %p4859_p11 = pnand %p4858_p9, %p4852_p4 }
 0x106   : > { %4862 = shalt.err (!%p4859_p11)
}
 0x107   : > { %4474 = dma.hbm_to_vmem [thread:$0]  (!%p5734_p12), %s7013_s8, 256, %s782_s28, [#allocation10], %s7011_s1, %s7011_s1, %s7010_s21  }
 0x108   : > { %s7014_s22 = sld [smem:[#allocation84_spill]] }
 0x10e   : > { %s4863_s18 = scalar_lea.hbm %s7014_s22, 16 }
 0x10f   : > { %p4864_p3 = scmp.ne.s32.totalorder %s7014_s22, %s4863_s18  ;;  %p4870_p10 = scmp.lt.u32.totalorder %s4863_s18, %s7014_s22 }
 0x111   : > { %p4866_p5 = pnand %p4864_p3, %p5748_p0 }
 0x113   : > { %p4867_p8 = pneg %p4866_p5 }
 0x115   : > { %p4872_p13 = pnand %p4870_p10, %p4867_p8 }
 0x117   : > { %4875 = shalt.err (!%p4872_p13)
}
 0x118   : > { %s4876_s26 = scalar_lea.vmem %s807_s14, 16  ;;  %s4883_s21 = scalar_lea.vmem %s807_s14, 32 }
 0x119   : > { %p4877_p1 = scmp.ne.s32.totalorder %s807_s14, %s4876_s26  ;;  %p4884_p6 = scmp.lt.s32.totalorder %s807_s14, %s807_s14 }
 0x11a   : > { %p4885_p7 = scmp.lt.s32.totalorder %s4883_s21, %s4876_s26 }
 0x11b   : > { %p4879_p2 = pnand %p4877_p1, %p5748_p0 }
 0x11c   : > { %p4886_p9 = por %p4885_p7, %p4884_p6 }
 0x11d   : > { %p4880_p4 = pneg %p4879_p2 }
 0x11f   : > { %p4887_p11 = pnand %p4886_p9, %p4880_p4 }
 0x121   : > { %4890 = shalt.err (!%p4887_p11)
}
 0x122   : > { %4480 = dma.hbm_to_vmem [thread:$0]  (!%p5734_p12), %s7014_s22, 16, %s807_s14, [#allocation37]  }
 0x123   : > { %s5509_s30 = smov [#allocation41]   ;;  %s4891_s2 = scalar_lea.hbm %s6905_s24, 16 }
 0x124   : > { %s830_s12 = sshll.u32 %s5509_s30, 4  ;;  %p4892_p3 = scmp.ne.s32.totalorder %s6905_s24, %s4891_s2  ;;  %s831_s12 = int_to_ptr.vmem [resolvable:$true] %s830_s12 }
 0x125   : > { %p4898_p10 = scmp.lt.u32.totalorder %s4891_s2, %s6905_s24 }
 0x126   : > { %p4894_p5 = pnand %p4892_p3, %p5748_p0 }
 0x128   : > { %p4895_p8 = pneg %p4894_p5 }
 0x12a   : > { %p4900_p13 = pnand %p4898_p10, %p4895_p8 }
 0x12c   : > { %4903 = shalt.err (!%p4900_p13)
}
 0x12d   : > { %s4904_s14 = scalar_lea.vmem %s831_s12, 16  ;;  %s4911_s25 = scalar_lea.vmem %s831_s12, 32 }
 0x12e   : > { %p4905_p1 = scmp.ne.s32.totalorder %s831_s12, %s4904_s14  ;;  %p4912_p6 = scmp.lt.s32.totalorder %s831_s12, %s831_s12 }
 0x12f   : > { %p4913_p7 = scmp.lt.s32.totalorder %s4911_s25, %s4904_s14 }
 0x130   : > { %p4907_p2 = pnand %p4905_p1, %p5748_p0 }
 0x131   : > { %p4914_p9 = por %p4913_p7, %p4912_p6 }
 0x132   : > { %p4908_p4 = pneg %p4907_p2 }
 0x134   : > { %p4915_p11 = pnand %p4914_p9, %p4908_p4 }
 0x136   : > { %4918 = shalt.err (!%p4915_p11)
}
 0x137   : > { %4486 = dma.hbm_to_vmem [thread:$0]  (!%p5734_p12), %s6905_s24, 16, %s831_s12, [#allocation40]  }
 0x138   : > { %p3897_p3 = scmp.ge.s32.totalorder %s5495_s3, 2 }
 0x139   : > { %s5925_s0 = sand.u32 (!%p3897_p3), 1, %s5495_s3   ;;  %s5928_s1 = sand.u32 (!%p3897_p3), 1, %s5483_s6  }
 0x13a   : > { %837 = sbr.rel (%p3897_p3) target bundleno = 757 (0x2f5), region = 52  ;;  %s5931_s28 = sshll.u32 (!%p3897_p3), %s5491_s7, 4 }
 0x13b   : > { %s844_s4 = scalar_lea.vmem (!%p3897_p3), [#allocation12], %s5928_s1  ;;  %s7015_s10 = sld [smem:[#allocation69_spill]] (!%p3897_p3) }
 0x13c   : > { %s851_s30 = sshll.u32 (!%p3897_p3), %s844_s4, 4  ;;  %s6943_s18 = scalar_lea.sflag (!%p3897_p3), [#allocation13], %s5925_s0  ;;  %s852_s30 = int_to_ptr.vmem [resolvable:$true] %s851_s30 }
 0x13d   : > { %p7016_p0 = scmp.ne.s32.totalorder (!%p3897_p3), %s6996_s27, 0 }
 0x141   : > { %s5938_s2 = scalar_lea.hbm %s7015_s10, %s5931_s28  ;;  %s4923_s14 = scalar_lea.hbm %s7015_s10, 32 }
 0x142   : > { %s4919_s9 = scalar_lea.hbm %s5938_s2, 16  ;;  %p4924_p10 = scmp.lt.u32.totalorder %s5938_s2, %s7015_s10 }
 0x143   : > { %p4920_p12 = scmp.ne.s32.totalorder %s5938_s2, %s4919_s9  ;;  %p4925_p13 = scmp.lt.u32.totalorder %s4923_s14, %s4919_s9 }
 0x144   : > { %p4927_p2 = scmp.lt.u32.totalorder %s4919_s9, %s5938_s2 }
 0x145   : > { %p4921_p5 = pnand %p4920_p12, %p7016_p0  ;;  %p4926_p1 = por %p4925_p13, %p4924_p10 }
 0x147   : > { %p4922_p8 = pneg %p4921_p5  ;;  %p4928_p4 = por %p4927_p2, %p4926_p1 }
 0x149   : > { %p4929_p6 = pnand %p4928_p4, %p4922_p8 }
 0x14b   : > { %4932 = shalt.err (!%p4929_p6)
}
 0x14c   : > { %s4933_s21 = scalar_lea.vmem %s852_s30, 16  ;;  %s5510_s4 = smov [#allocation12]  }
 0x14d   : > { %p4934_p7 = scmp.ne.s32.totalorder %s852_s30, %s4933_s21  ;;  %s4937_s5 = sshll.u32 %s5510_s4, 4  ;;  %s4938_s5 = int_to_ptr.vmem [resolvable:$false] %s4937_s5 }
 0x14e   : > { %s4939_s12 = scalar_lea.vmem %s4938_s5, 32  ;;  %p4940_p3 = scmp.lt.s32.totalorder %s852_s30, %s4938_s5 }
 0x14f   : > { %p4935_p9 = pnand %p4934_p7, %p7016_p0  ;;  %p4941_p12 = scmp.lt.s32.totalorder %s4939_s12, %s4933_s21 }
 0x151   : > { %p4936_p11 = pneg %p4935_p9  ;;  %p4942_p5 = por %p4941_p12, %p4940_p3 }
 0x153   : > { %p4943_p10 = pnand %p4942_p5, %p4936_p11 }
 0x155   : > { %4946 = shalt.err (!%p4943_p10)
}
 0x156   : > { %4405 = dma.hbm_to_vmem [thread:$0]  (%p7016_p0), %s5938_s2, 16, %s852_s30, %s6943_s18  }
 0x157   : > { %s5961_s9 = sshll.u32 %s5928_s1, 6  ;;  %s5964_s29 = sshll.u32 %s5491_s7, 10 }
 0x158   : > { %s7017_s25 = sld [smem:[#allocation71_spill]]  ;;  %s879_s21 = scalar_lea.vmem [#allocation15], %s5961_s9 }
 0x159   : > { %s886_s4 = sshll.u32 %s879_s21, 4  ;;  %s6947_s30 = scalar_lea.sflag [#allocation16], %s5925_s0  ;;  %s5973_s4 = int_to_ptr.vmem [resolvable:$true] %s886_s4 }
 0x15e   : > { %s5970_s26 = scalar_lea.hbm %s7017_s25, %s5964_s29  ;;  %s4951_s16 = scalar_lea.hbm %s7017_s25, 2048 }
 0x15f   : > { %s4947_s2 = scalar_lea.hbm %s5970_s26, 1024  ;;  %p4952_p2 = scmp.lt.u32.totalorder %s5970_s26, %s7017_s25 }
 0x160   : > { %p4948_p8 = scmp.ne.s32.totalorder %s5970_s26, %s4947_s2  ;;  %p4953_p4 = scmp.lt.u32.totalorder %s4951_s16, %s4947_s2 }
 0x161   : > { %p4955_p7 = scmp.lt.u32.totalorder %s4947_s2, %s5970_s26 }
 0x162   : > { %p4949_p13 = pnand %p4948_p8, %p7016_p0  ;;  %p4954_p6 = por %p4953_p4, %p4952_p2 }
 0x164   : > { %p4950_p1 = pneg %p4949_p13  ;;  %p4956_p9 = por %p4955_p7, %p4954_p6 }
 0x166   : > { %p4957_p11 = pnand %p4956_p9, %p4950_p1 }
 0x168   : > { %4960 = shalt.err (!%p4957_p11)
}
 0x169   : > { %s4961_s21 = scalar_lea.vmem %s5973_s4, 1024  ;;  %s5511_s5 = smov [#allocation15]  }
 0x16a   : > { %p4962_p3 = scmp.ne.s32.totalorder %s5973_s4, %s4961_s21  ;;  %s4965_s12 = sshll.u32 %s5511_s5, 4  ;;  %s4966_s12 = int_to_ptr.vmem [resolvable:$false] %s4965_s12 }
 0x16b   : > { %s4967_s18 = scalar_lea.vmem %s4966_s12, 2048  ;;  %p4968_p10 = scmp.lt.s32.totalorder %s5973_s4, %s4966_s12 }
 0x16c   : > { %p4963_p12 = pnand %p4962_p3, %p7016_p0  ;;  %p4969_p8 = scmp.lt.s32.totalorder %s4967_s18, %s4961_s21 }
 0x16e   : > { %p4964_p5 = pneg %p4963_p12  ;;  %p4970_p13 = por %p4969_p8, %p4968_p10 }
 0x170   : > { %p4971_p2 = pnand %p4970_p13, %p4964_p5 }
 0x172   : > { %4974 = shalt.err (!%p4971_p2)
}
 0x173   : > { %s6949_s2 = smov 64   ;;  %s6951_s16 = smov 4  }
 0x174   : > { %4407 = dma.hbm_to_vmem [thread:$0]  (%p7016_p0), %s5970_s26, 1024, %s5973_s4, %s6947_s30, %s6949_s2, %s6949_s2, %s6951_s16  }
 0x175   : > { %s7018_s5 = sld [smem:[#allocation73_spill]]  ;;  %s921_s18 = scalar_lea.vmem [#allocation18], %s5961_s9 }
 0x176   : > { %s928_s8 = sshll.u32 %s921_s18, 4  ;;  %s6010_s10 = sshll.u32 %s5928_s1, 2  ;;  %s6012_s8 = int_to_ptr.vmem [resolvable:$true] %s928_s8 }
 0x177   : > { %s6015_s20 = sshll.u32 %s5491_s7, 6  ;;  %s6948_s22 = scalar_lea.sflag [#allocation19], %s5925_s0 }
 0x17b   : > { %s6006_s12 = scalar_lea.hbm %s7018_s5, %s5964_s29  ;;  %s4979_s14 = scalar_lea.hbm %s7018_s5, 2048 }
 0x17c   : > { %s4975_s23 = scalar_lea.hbm %s6006_s12, 1024  ;;  %p4980_p7 = scmp.lt.u32.totalorder %s6006_s12, %s7018_s5 }
 0x17d   : > { %p4976_p1 = scmp.ne.s32.totalorder %s6006_s12, %s4975_s23  ;;  %p4981_p9 = scmp.lt.u32.totalorder %s4979_s14, %s4975_s23 }
 0x17e   : > { %p4983_p3 = scmp.lt.u32.totalorder %s4975_s23, %s6006_s12 }
 0x17f   : > { %p4977_p4 = pnand %p4976_p1, %p7016_p0  ;;  %p4982_p11 = por %p4981_p9, %p4980_p7 }
 0x181   : > { %p4978_p6 = pneg %p4977_p4  ;;  %p4984_p12 = por %p4983_p3, %p4982_p11 }
 0x183   : > { %p4985_p5 = pnand %p4984_p12, %p4978_p6 }
 0x185   : > { %4988 = shalt.err (!%p4985_p5)
}
 0x186   : > { %s4989_s18 = scalar_lea.vmem %s6012_s8, 1024  ;;  %s5514_s26 = smov [#allocation18]  }
 0x187   : > { %p4990_p10 = scmp.ne.s32.totalorder %s6012_s8, %s4989_s18  ;;  %s4993_s4 = sshll.u32 %s5514_s26, 4  ;;  %s4994_s4 = int_to_ptr.vmem [resolvable:$false] %s4993_s4 }
 0x188   : > { %s4995_s30 = scalar_lea.vmem %s4994_s4, 2048  ;;  %p4996_p2 = scmp.lt.s32.totalorder %s6012_s8, %s4994_s4 }
 0x189   : > { %p4991_p8 = pnand %p4990_p10, %p7016_p0  ;;  %p4997_p1 = scmp.lt.s32.totalorder %s4995_s30, %s4989_s18 }
 0x18b   : > { %p4992_p13 = pneg %p4991_p8  ;;  %p4998_p4 = por %p4997_p1, %p4996_p2 }
 0x18d   : > { %p4999_p7 = pnand %p4998_p4, %p4992_p13 }
 0x18f   : > { %5002 = shalt.err (!%p4999_p7)
}
 0x190   : > { %4409 = dma.hbm_to_vmem [thread:$0]  (%p7016_p0), %s6006_s12, 1024, %s6012_s8, %s6948_s22, %s6949_s2, %s6949_s2, %s6951_s16  }
 0x191   : > { %s7019_s11 = sld [smem:[#allocation75_spill]]  ;;  %s963_s18 = scalar_lea.vmem [#allocation21], %s6010_s10 }
 0x192   : > { %s970_s26 = sshll.u32 %s963_s18, 4  ;;  %s6954_s4 = scalar_lea.sflag [#allocation22], %s5925_s0  ;;  %s6051_s26 = int_to_ptr.vmem [resolvable:$true] %s970_s26 }
 0x197   : > { %s6048_s21 = scalar_lea.hbm %s7019_s11, %s6015_s20  ;;  %s5007_s23 = scalar_lea.hbm %s7019_s11, 128 }
 0x198   : > { %s5003_s30 = scalar_lea.hbm %s6048_s21, 64  ;;  %p5008_p3 = scmp.lt.u32.totalorder %s6048_s21, %s7019_s11 }
 0x199   : > { %p5004_p6 = scmp.ne.s32.totalorder %s6048_s21, %s5003_s30  ;;  %p5009_p12 = scmp.lt.u32.totalorder %s5007_s23, %s5003_s30 }
 0x19a   : > { %p5011_p10 = scmp.lt.u32.totalorder %s5003_s30, %s6048_s21 }
 0x19b   : > { %p5005_p9 = pnand %p5004_p6, %p7016_p0  ;;  %p5010_p5 = por %p5009_p12, %p5008_p3 }
 0x19d   : > { %p5006_p11 = pneg %p5005_p9  ;;  %p5012_p8 = por %p5011_p10, %p5010_p5 }
 0x19f   : > { %p5013_p13 = pnand %p5012_p8, %p5006_p11 }
 0x1a1   : > { %5016 = shalt.err (!%p5013_p13)
}
 0x1a2   : > { %s5017_s18 = scalar_lea.vmem %s6051_s26, 64  ;;  %s5515_s8 = smov [#allocation21]  }
 0x1a3   : > { %p5018_p2 = scmp.ne.s32.totalorder %s6051_s26, %s5017_s18  ;;  %s5021_s12 = sshll.u32 %s5515_s8, 4  ;;  %s5022_s12 = int_to_ptr.vmem [resolvable:$false] %s5021_s12 }
 0x1a4   : > { %s5023_s22 = scalar_lea.vmem %s5022_s12, 128  ;;  %p5024_p7 = scmp.lt.s32.totalorder %s6051_s26, %s5022_s12 }
 0x1a5   : > { %p5019_p1 = pnand %p5018_p2, %p7016_p0  ;;  %p5025_p6 = scmp.lt.s32.totalorder %s5023_s22, %s5017_s18 }
 0x1a7   : > { %p5020_p4 = pneg %p5019_p1  ;;  %p5026_p9 = por %p5025_p6, %p5024_p7 }
 0x1a9   : > { %p5027_p3 = pnand %p5026_p9, %p5020_p4 }
 0x1ab   : > { %5030 = shalt.err (!%p5027_p3)
}
 0x1ac   : > { %s6955_s30 = smov 16   ;;  %s6957_s23 = smov 1  }
 0x1ad   : > { %4411 = dma.hbm_to_vmem [thread:$0]  (%p7016_p0), %s6048_s21, 64, %s6051_s26, %s6954_s4, %s6955_s30, %s6955_s30, %s6957_s23  }
 0x1ae   : > { %s6959_s14 = sshll.u32 %s5928_s1, 4  ;;  %s6961_s18 = sshll.u32 %s5491_s7, 8 }
 0x1af   : > { %s7020_s13 = sld [smem:[#allocation77_spill]]  ;;  %s1005_s2 = scalar_lea.vmem [#allocation24], %s6959_s14 }
 0x1b0   : > { %s1012_s16 = sshll.u32 %s1005_s2, 4  ;;  %s6960_s5 = scalar_lea.sflag [#allocation25], %s5925_s0  ;;  %s6091_s16 = int_to_ptr.vmem [resolvable:$true] %s1012_s16 }
 0x1b5   : > { %s6087_s22 = scalar_lea.hbm %s7020_s13, %s6961_s18  ;;  %s5035_s8 = scalar_lea.hbm %s7020_s13, 512 }
 0x1b6   : > { %s5031_s11 = scalar_lea.hbm %s6087_s22, 256  ;;  %p5036_p10 = scmp.lt.u32.totalorder %s6087_s22, %s7020_s13 }
 0x1b7   : > { %p5032_p11 = scmp.ne.s32.totalorder %s6087_s22, %s5031_s11  ;;  %p5037_p8 = scmp.lt.u32.totalorder %s5035_s8, %s5031_s11 }
 0x1b8   : > { %p5039_p2 = scmp.lt.u32.totalorder %s5031_s11, %s6087_s22 }
 0x1b9   : > { %p5033_p12 = pnand %p5032_p11, %p7016_p0  ;;  %p5038_p13 = por %p5037_p8, %p5036_p10 }
 0x1bb   : > { %p5034_p5 = pneg %p5033_p12  ;;  %p5040_p1 = por %p5039_p2, %p5038_p13 }
 0x1bd   : > { %p5041_p4 = pnand %p5040_p1, %p5034_p5 }
 0x1bf   : > { %5044 = shalt.err (!%p5041_p4)
}
 0x1c0   : > { %s5045_s2 = scalar_lea.vmem %s6091_s16, 256  ;;  %s5518_s21 = smov [#allocation24]  }
 0x1c1   : > { %p5046_p7 = scmp.ne.s32.totalorder %s6091_s16, %s5045_s2  ;;  %s5049_s26 = sshll.u32 %s5518_s21, 4  ;;  %s5050_s26 = int_to_ptr.vmem [resolvable:$false] %s5049_s26 }
 0x1c2   : > { %s5051_s4 = scalar_lea.vmem %s5050_s26, 512  ;;  %p5052_p3 = scmp.lt.s32.totalorder %s6091_s16, %s5050_s26 }
 0x1c3   : > { %p5047_p6 = pnand %p5046_p7, %p7016_p0  ;;  %p5053_p11 = scmp.lt.s32.totalorder %s5051_s4, %s5045_s2 }
 0x1c5   : > { %p5048_p9 = pneg %p5047_p6  ;;  %p5054_p12 = por %p5053_p11, %p5052_p3 }
 0x1c7   : > { %p5055_p10 = pnand %p5054_p12, %p5048_p9 }
 0x1c9   : > { %5058 = shalt.err (!%p5055_p10)
}
 0x1ca   : > { %s7021_s11 = smov 4   ;;  %s7022_s8 = smov 64  }
 0x1cb   : > { %4413 = dma.hbm_to_vmem [thread:$0]  (%p7016_p0), %s6087_s22, 256, %s6091_s16, %s6960_s5, %s7022_s8, %s7022_s8, %s7021_s11  }
 0x1cc   : > { %s7023_s15 = sld [smem:[#allocation79_spill]]  ;;  %s1042_s26 = scalar_lea.vmem [#allocation27], %s5928_s1 }
 0x1cd   : > { %s1049_s4 = sshll.u32 %s1042_s26, 4  ;;  %s6963_s30 = scalar_lea.sflag [#allocation28], %s5925_s0  ;;  %s1050_s4 = int_to_ptr.vmem [resolvable:$true] %s1049_s4 }
 0x1d2   : > { %s6124_s2 = scalar_lea.hbm %s7023_s15, %s5931_s28  ;;  %s5063_s22 = scalar_lea.hbm %s7023_s15, 32 }
 0x1d3   : > { %s5059_s23 = scalar_lea.hbm %s6124_s2, 16  ;;  %p5064_p2 = scmp.lt.u32.totalorder %s6124_s2, %s7023_s15 }
 0x1d4   : > { %p5060_p5 = scmp.ne.s32.totalorder %s6124_s2, %s5059_s23  ;;  %p5065_p1 = scmp.lt.u32.totalorder %s5063_s22, %s5059_s23 }
 0x1d5   : > { %p5067_p7 = scmp.lt.u32.totalorder %s5059_s23, %s6124_s2 }
 0x1d6   : > { %p5061_p8 = pnand %p5060_p5, %p7016_p0  ;;  %p5066_p4 = por %p5065_p1, %p5064_p2 }
 0x1d8   : > { %p5062_p13 = pneg %p5061_p8  ;;  %p5068_p6 = por %p5067_p7, %p5066_p4 }
 0x1da   : > { %p5069_p9 = pnand %p5068_p6, %p5062_p13 }
 0x1dc   : > { %5072 = shalt.err (!%p5069_p9)
}
 0x1dd   : > { %s5073_s26 = scalar_lea.vmem %s1050_s4, 16  ;;  %s5519_s5 = smov [#allocation27]  }
 0x1de   : > { %p5074_p3 = scmp.ne.s32.totalorder %s1050_s4, %s5073_s26  ;;  %s5077_s18 = sshll.u32 %s5519_s5, 4  ;;  %s5078_s18 = int_to_ptr.vmem [resolvable:$false] %s5077_s18 }
 0x1df   : > { %s5079_s14 = scalar_lea.vmem %s5078_s18, 32  ;;  %p5080_p10 = scmp.lt.s32.totalorder %s1050_s4, %s5078_s18 }
 0x1e0   : > { %p5075_p11 = pnand %p5074_p3, %p7016_p0  ;;  %p5081_p5 = scmp.lt.s32.totalorder %s5079_s14, %s5073_s26 }
 0x1e2   : > { %p5076_p12 = pneg %p5075_p11  ;;  %p5082_p8 = por %p5081_p5, %p5080_p10 }
 0x1e4   : > { %p5083_p1 = pnand %p5082_p8, %p5076_p12 }
 0x1e6   : > { %5086 = shalt.err (!%p5083_p1)
}
 0x1e7   : > { %4415 = dma.hbm_to_vmem [thread:$0]  (%p7016_p0), %s6124_s2, 16, %s1050_s4, %s6963_s30  }
 0x1e8   : > { %s7024_s23 = sshll.u32 %s5491_s7, 8  ;;  %s7025_s18 = sshll.u32 %s5928_s1, 4 }
 0x1e9   : > { %s6152_s22 = scalar_lea.hbm %s6898_s17, %s7024_s23  ;;  %s1077_s12 = scalar_lea.vmem [#allocation30], %s7025_s18 }
 0x1ea   : > { %s1084_s21 = sshll.u32 %s1077_s12, 4  ;;  %s6962_s26 = scalar_lea.sflag [#allocation31], %s5925_s0  ;;  %s6156_s21 = int_to_ptr.vmem [resolvable:$true] %s1084_s21 }
 0x1eb   : > { %s5087_s14 = scalar_lea.hbm %s6152_s22, 256  ;;  %s5091_s23 = scalar_lea.hbm %s6898_s17, 512 }
 0x1ec   : > { %p5088_p13 = scmp.ne.s32.totalorder %s6152_s22, %s5087_s14  ;;  %p5092_p7 = scmp.lt.u32.totalorder %s6152_s22, %s6898_s17 }
 0x1ed   : > { %p5093_p6 = scmp.lt.u32.totalorder %s5091_s23, %s5087_s14  ;;  %p5095_p3 = scmp.lt.u32.totalorder %s5087_s14, %s6152_s22 }
 0x1ee   : > { %p5089_p2 = pnand %p5088_p13, %p7016_p0 }
 0x1ef   : > { %p5094_p9 = por %p5093_p6, %p5092_p7 }
 0x1f0   : > { %p5090_p4 = pneg %p5089_p2 }
 0x1f1   : > { %p5096_p11 = por %p5095_p3, %p5094_p9 }
 0x1f3   : > { %p5097_p12 = pnand %p5096_p11, %p5090_p4 }
 0x1f5   : > { %5100 = shalt.err (!%p5097_p12)
}
 0x1f6   : > { %s5101_s18 = scalar_lea.vmem %s6156_s21, 256  ;;  %s5520_s12 = smov [#allocation30]  }
 0x1f7   : > { %p5102_p10 = scmp.ne.s32.totalorder %s6156_s21, %s5101_s18  ;;  %s5105_s2 = sshll.u32 %s5520_s12, 4  ;;  %s5106_s2 = int_to_ptr.vmem [resolvable:$false] %s5105_s2 }
 0x1f8   : > { %s5107_s4 = scalar_lea.vmem %s5106_s2, 512  ;;  %p5108_p1 = scmp.lt.s32.totalorder %s6156_s21, %s5106_s2 }
 0x1f9   : > { %p5103_p5 = pnand %p5102_p10, %p7016_p0  ;;  %p5109_p13 = scmp.lt.s32.totalorder %s5107_s4, %s5101_s18 }
 0x1fb   : > { %p5104_p8 = pneg %p5103_p5  ;;  %p5110_p2 = por %p5109_p13, %p5108_p1 }
 0x1fd   : > { %p5111_p7 = pnand %p5110_p2, %p5104_p8 }
 0x1ff   : > { %5114 = shalt.err (!%p5111_p7)
}
 0x200   : > { %4417 = dma.hbm_to_vmem [thread:$0]  (%p7016_p0), %s6152_s22, 256, %s6156_s21, %s6962_s26, %s7022_s8, %s7022_s8, %s7021_s11  }
 0x201   : > { %s6189_s16 = scalar_lea.hbm %s6900_s19, %s5964_s29  ;;  %s1115_s5 = scalar_lea.vmem [#allocation33], %s5961_s9 }
 0x202   : > { %s1122_s18 = sshll.u32 %s1115_s5, 4  ;;  %s6964_s12 = scalar_lea.sflag [#allocation34], %s5925_s0  ;;  %s6192_s18 = int_to_ptr.vmem [resolvable:$true] %s1122_s18 }
 0x203   : > { %s5115_s2 = scalar_lea.hbm %s6189_s16, 1024  ;;  %s5119_s4 = scalar_lea.hbm %s6900_s19, 2048 }
 0x204   : > { %p5116_p4 = scmp.ne.s32.totalorder %s6189_s16, %s5115_s2  ;;  %p5120_p3 = scmp.lt.u32.totalorder %s6189_s16, %s6900_s19 }
 0x205   : > { %p5121_p11 = scmp.lt.u32.totalorder %s5119_s4, %s5115_s2  ;;  %p5123_p10 = scmp.lt.u32.totalorder %s5115_s2, %s6189_s16 }
 0x206   : > { %p5117_p6 = pnand %p5116_p4, %p7016_p0 }
 0x207   : > { %p5122_p12 = por %p5121_p11, %p5120_p3 }
 0x208   : > { %p5118_p9 = pneg %p5117_p6 }
 0x209   : > { %p5124_p5 = por %p5123_p10, %p5122_p12 }
 0x20b   : > { %p5125_p8 = pnand %p5124_p5, %p5118_p9 }
 0x20d   : > { %5128 = shalt.err (!%p5125_p8)
}
 0x20e   : > { %s5129_s5 = scalar_lea.vmem %s6192_s18, 1024  ;;  %s5521_s22 = smov [#allocation33]  }
 0x20f   : > { %p5130_p1 = scmp.ne.s32.totalorder %s6192_s18, %s5129_s5  ;;  %s5133_s21 = sshll.u32 %s5521_s22, 4  ;;  %s5134_s21 = int_to_ptr.vmem [resolvable:$false] %s5133_s21 }
 0x210   : > { %s5135_s14 = scalar_lea.vmem %s5134_s21, 2048  ;;  %p5136_p7 = scmp.lt.s32.totalorder %s6192_s18, %s5134_s21 }
 0x211   : > { %p5131_p13 = pnand %p5130_p1, %p7016_p0  ;;  %p5137_p4 = scmp.lt.s32.totalorder %s5135_s14, %s5129_s5 }
 0x213   : > { %p5132_p2 = pneg %p5131_p13  ;;  %p5138_p6 = por %p5137_p4, %p5136_p7 }
 0x215   : > { %p5139_p3 = pnand %p5138_p6, %p5132_p2 }
 0x217   : > { %5142 = shalt.err (!%p5139_p3)
}
 0x218   : > { %4419 = dma.hbm_to_vmem [thread:$0]  (%p7016_p0), %s6189_s16, 1024, %s6192_s18, %s6964_s12, %s7022_s8, %s7022_s8, %s7021_s11  }
 0x219   : > { %s7026_s23 = sld [smem:[#allocation70_spill]]  ;;  %s861_s22 = scalar_lea.vmem [#allocation14], %s5928_s1 }
 0x21a   : > { %s868_s21 = sshll.u32 %s861_s22, 4  ;;  %s869_s21 = int_to_ptr.vmem [resolvable:$true] %s868_s21 }
 0x21f   : > { %s6225_s5 = scalar_lea.hbm %s7026_s23, %s5931_s28  ;;  %s5147_s16 = scalar_lea.hbm %s7026_s23, 32 }
 0x220   : > { %s5143_s14 = scalar_lea.hbm %s6225_s5, 16  ;;  %p5148_p10 = scmp.lt.u32.totalorder %s6225_s5, %s7026_s23 }
 0x221   : > { %p5144_p9 = scmp.ne.s32.totalorder %s6225_s5, %s5143_s14  ;;  %p5149_p5 = scmp.lt.u32.totalorder %s5147_s16, %s5143_s14 }
 0x222   : > { %p5151_p1 = scmp.lt.u32.totalorder %s5143_s14, %s6225_s5 }
 0x223   : > { %p5145_p11 = pnand %p5144_p9, %p7016_p0  ;;  %p5150_p8 = por %p5149_p5, %p5148_p10 }
 0x225   : > { %p5146_p12 = pneg %p5145_p11  ;;  %p5152_p13 = por %p5151_p1, %p5150_p8 }
 0x227   : > { %p5153_p2 = pnand %p5152_p13, %p5146_p12 }
 0x229   : > { %5156 = shalt.err (!%p5153_p2)
}
 0x22a   : > { %s5157_s4 = scalar_lea.vmem %s869_s21, 16  ;;  %s5522_s22 = smov [#allocation14]  }
 0x22b   : > { %p5158_p7 = scmp.ne.s32.totalorder %s869_s21, %s5157_s4  ;;  %s5161_s12 = sshll.u32 %s5522_s22, 4  ;;  %s5162_s12 = int_to_ptr.vmem [resolvable:$false] %s5161_s12 }
 0x22c   : > { %s5163_s30 = scalar_lea.vmem %s5162_s12, 32  ;;  %p5164_p3 = scmp.lt.s32.totalorder %s869_s21, %s5162_s12 }
 0x22d   : > { %p5159_p4 = pnand %p5158_p7, %p7016_p0  ;;  %p5165_p9 = scmp.lt.s32.totalorder %s5163_s30, %s5157_s4 }
 0x22f   : > { %p5160_p6 = pneg %p5159_p4  ;;  %p5166_p11 = por %p5165_p9, %p5164_p3 }
 0x231   : > { %p5167_p5 = pnand %p5166_p11, %p5160_p6 }
 0x233   : > { %5170 = shalt.err (!%p5167_p5)
}
 0x234   : > { %s7027_s26 = scalar_lea.sflag [#allocation13], %s5925_s0  ;;  %s7028_s18 = sld [smem:[#allocation72_spill]] }
 0x235   : > { %4406 = dma.hbm_to_vmem [thread:$0]  (%p7016_p0), %s6225_s5, 16, %s869_s21, %s7027_s26  }
 0x236   : > { %s900_s12 = scalar_lea.vmem [#allocation17], %s5961_s9 }
 0x237   : > { %s907_s4 = sshll.u32 %s900_s12, 4  ;;  %s6254_s4 = int_to_ptr.vmem [resolvable:$true] %s907_s4 }
 0x23a   : > { %s6251_s2 = scalar_lea.hbm %s7028_s18, %s5964_s29  ;;  %s5175_s21 = scalar_lea.hbm %s7028_s18, 2048 }
 0x23b   : > { %s5171_s22 = scalar_lea.hbm %s6251_s2, 1024  ;;  %p5176_p1 = scmp.lt.u32.totalorder %s6251_s2, %s7028_s18 }
 0x23c   : > { %p5172_p12 = scmp.ne.s32.totalorder %s6251_s2, %s5171_s22  ;;  %p5177_p13 = scmp.lt.u32.totalorder %s5175_s21, %s5171_s22 }
 0x23d   : > { %p5179_p7 = scmp.lt.u32.totalorder %s5171_s22, %s6251_s2 }
 0x23e   : > { %p5173_p10 = pnand %p5172_p12, %p7016_p0  ;;  %p5178_p2 = por %p5177_p13, %p5176_p1 }
 0x240   : > { %p5174_p8 = pneg %p5173_p10  ;;  %p5180_p4 = por %p5179_p7, %p5178_p2 }
 0x242   : > { %p5181_p6 = pnand %p5180_p4, %p5174_p8 }
 0x244   : > { %5184 = shalt.err (!%p5181_p6)
}
 0x245   : > { %s5185_s9 = scalar_lea.vmem %s6254_s4, 1024  ;;  %s5523_s14 = smov [#allocation17]  }
 0x246   : > { %p5186_p3 = scmp.ne.s32.totalorder %s6254_s4, %s5185_s9  ;;  %s5189_s16 = sshll.u32 %s5523_s14, 4  ;;  %s5190_s16 = int_to_ptr.vmem [resolvable:$false] %s5189_s16 }
 0x247   : > { %s5191_s12 = scalar_lea.vmem %s5190_s16, 2048  ;;  %p5192_p5 = scmp.lt.s32.totalorder %s6254_s4, %s5190_s16 }
 0x248   : > { %p5187_p9 = pnand %p5186_p3, %p7016_p0  ;;  %p5193_p12 = scmp.lt.s32.totalorder %s5191_s12, %s5185_s9 }
 0x24a   : > { %p5188_p11 = pneg %p5187_p9  ;;  %p5194_p10 = por %p5193_p12, %p5192_p5 }
 0x24c   : > { %p5195_p1 = pnand %p5194_p10, %p5188_p11 }
 0x24e   : > { %5198 = shalt.err (!%p5195_p1)
}
 0x24f   : > { %s7029_s22 = scalar_lea.sflag [#allocation16], %s5925_s0  ;;  %s7030_s21 = sld [smem:[#allocation74_spill]] }
 0x250   : > { %4408 = dma.hbm_to_vmem [thread:$0]  (%p7016_p0), %s6251_s2, 1024, %s6254_s4, %s7029_s22, %s7022_s8, %s7022_s8, %s7021_s11  }
 0x251   : > { %s942_s29 = scalar_lea.vmem [#allocation20], %s6010_s10 }
 0x252   : > { %s949_s9 = sshll.u32 %s942_s29, 4  ;;  %s6289_s9 = int_to_ptr.vmem [resolvable:$true] %s949_s9 }
 0x255   : > { %s6286_s26 = scalar_lea.hbm %s7030_s21, %s6015_s20  ;;  %s5203_s8 = scalar_lea.hbm %s7030_s21, 128 }
 0x256   : > { %s5199_s14 = scalar_lea.hbm %s6286_s26, 64  ;;  %p5204_p7 = scmp.lt.u32.totalorder %s6286_s26, %s7030_s21 }
 0x257   : > { %p5200_p8 = scmp.ne.s32.totalorder %s6286_s26, %s5199_s14  ;;  %p5205_p4 = scmp.lt.u32.totalorder %s5203_s8, %s5199_s14 }
 0x258   : > { %p5207_p3 = scmp.lt.u32.totalorder %s5199_s14, %s6286_s26 }
 0x259   : > { %p5201_p13 = pnand %p5200_p8, %p7016_p0  ;;  %p5206_p6 = por %p5205_p4, %p5204_p7 }
 0x25b   : > { %p5202_p2 = pneg %p5201_p13  ;;  %p5208_p9 = por %p5207_p3, %p5206_p6 }
 0x25d   : > { %p5209_p11 = pnand %p5208_p9, %p5202_p2 }
 0x25f   : > { %5212 = shalt.err (!%p5209_p11)
}
 0x260   : > { %s5213_s12 = scalar_lea.vmem %s6289_s9, 64  ;;  %s5524_s22 = smov [#allocation20]  }
 0x261   : > { %p5214_p5 = scmp.ne.s32.totalorder %s6289_s9, %s5213_s12  ;;  %s5217_s30 = sshll.u32 %s5524_s22, 4  ;;  %s5218_s30 = int_to_ptr.vmem [resolvable:$false] %s5217_s30 }
 0x262   : > { %s5219_s5 = scalar_lea.vmem %s5218_s30, 128  ;;  %p5220_p1 = scmp.lt.s32.totalorder %s6289_s9, %s5218_s30 }
 0x263   : > { %p5215_p12 = pnand %p5214_p5, %p7016_p0  ;;  %p5221_p8 = scmp.lt.s32.totalorder %s5219_s5, %s5213_s12 }
 0x265   : > { %p5216_p10 = pneg %p5215_p12  ;;  %p5222_p13 = por %p5221_p8, %p5220_p1 }
 0x267   : > { %p5223_p7 = pnand %p5222_p13, %p5216_p10 }
 0x269   : > { %5226 = shalt.err (!%p5223_p7)
}
 0x26a   : > { %s7031_s29 = smov 1   ;;  %s7032_s14 = smov 16  }
 0x26b   : > { %s7033_s16 = scalar_lea.sflag [#allocation19], %s5925_s0  ;;  %s7034_s2 = sld [smem:[#allocation76_spill]] }
 0x26c   : > { %4410 = dma.hbm_to_vmem [thread:$0]  (%p7016_p0), %s6286_s26, 64, %s6289_s9, %s7033_s16, %s7032_s14, %s7032_s14, %s7031_s29  }
 0x26d   : > { %s984_s22 = scalar_lea.vmem [#allocation23], %s6010_s10 }
 0x26e   : > { %s991_s30 = sshll.u32 %s984_s22, 4  ;;  %s6324_s30 = int_to_ptr.vmem [resolvable:$true] %s991_s30 }
 0x271   : > { %s7035_s4 = smov %s7034_s2  ;;  %s6321_s12 = scalar_lea.hbm %s7034_s2, %s6015_s20 }
 0x272   : > { %s5227_s5 = scalar_lea.hbm %s6321_s12, 64  ;;  %s5231_s9 = scalar_lea.hbm %s7035_s4, 128 }
 0x273   : > { %p5228_p2 = scmp.ne.s32.totalorder %s6321_s12, %s5227_s5  ;;  %p5232_p3 = scmp.lt.u32.totalorder %s6321_s12, %s7035_s4 }
 0x274   : > { %p5233_p9 = scmp.lt.u32.totalorder %s5231_s9, %s5227_s5  ;;  %p5235_p5 = scmp.lt.u32.totalorder %s5227_s5, %s6321_s12 }
 0x275   : > { %p5229_p4 = pnand %p5228_p2, %p7016_p0 }
 0x276   : > { %p5234_p11 = por %p5233_p9, %p5232_p3 }
 0x277   : > { %p5230_p6 = pneg %p5229_p4 }
 0x278   : > { %p5236_p12 = por %p5235_p5, %p5234_p11 }
 0x27a   : > { %p5237_p10 = pnand %p5236_p12, %p5230_p6 }
 0x27c   : > { %5240 = shalt.err (!%p5237_p10)
}
 0x27d   : > { %s5241_s10 = scalar_lea.vmem %s6324_s30, 64  ;;  %s5525_s13 = smov [#allocation23]  }
 0x27e   : > { %p5242_p1 = scmp.ne.s32.totalorder %s6324_s30, %s5241_s10  ;;  %s5245_s11 = sshll.u32 %s5525_s13, 4  ;;  %s5246_s11 = int_to_ptr.vmem [resolvable:$false] %s5245_s11 }
 0x27f   : > { %s5247_s8 = scalar_lea.vmem %s5246_s11, 128  ;;  %p5248_p7 = scmp.lt.s32.totalorder %s6324_s30, %s5246_s11 }
 0x280   : > { %p5243_p8 = pnand %p5242_p1, %p7016_p0  ;;  %p5249_p2 = scmp.lt.s32.totalorder %s5247_s8, %s5241_s10 }
 0x282   : > { %p5244_p13 = pneg %p5243_p8  ;;  %p5250_p4 = por %p5249_p2, %p5248_p7 }
 0x284   : > { %p5251_p3 = pnand %p5250_p4, %p5244_p13 }
 0x286   : > { %5254 = shalt.err (!%p5251_p3)
}
 0x287   : > { %s7036_s2 = scalar_lea.sflag [#allocation22], %s5925_s0  ;;  %s7037_s26 = sld [smem:[#allocation78_spill]] }
 0x288   : > { %4412 = dma.hbm_to_vmem [thread:$0]  (%p7016_p0), %s6321_s12, 64, %s6324_s30, %s7036_s2, %s7032_s14, %s7032_s14, %s7031_s29  }
 0x289   : > { %s1025_s16 = scalar_lea.vmem [#allocation26], %s5928_s1 }
 0x28a   : > { %s1032_s20 = sshll.u32 %s1025_s16, 4  ;;  %s1033_s20 = int_to_ptr.vmem [resolvable:$true] %s1032_s20 }
 0x28d   : > { %s6356_s9 = scalar_lea.hbm %s7037_s26, %s5931_s28  ;;  %s5259_s29 = scalar_lea.hbm %s7037_s26, 32 }
 0x28e   : > { %s5255_s10 = scalar_lea.hbm %s6356_s9, 16  ;;  %p5260_p5 = scmp.lt.u32.totalorder %s6356_s9, %s7037_s26 }
 0x28f   : > { %p5256_p6 = scmp.ne.s32.totalorder %s6356_s9, %s5255_s10  ;;  %p5261_p12 = scmp.lt.u32.totalorder %s5259_s29, %s5255_s10 }
 0x290   : > { %p5263_p1 = scmp.lt.u32.totalorder %s5255_s10, %s6356_s9 }
 0x291   : > { %p5257_p9 = pnand %p5256_p6, %p7016_p0  ;;  %p5262_p10 = por %p5261_p12, %p5260_p5 }
 0x293   : > { %p5258_p11 = pneg %p5257_p9  ;;  %p5264_p8 = por %p5263_p1, %p5262_p10 }
 0x295   : > { %p5265_p13 = pnand %p5264_p8, %p5258_p11 }
 0x297   : > { %5268 = shalt.err (!%p5265_p13)
}
 0x298   : > { %s5269_s30 = scalar_lea.vmem %s1033_s20, 16  ;;  %s5526_s8 = smov [#allocation26]  }
 0x299   : > { %p5270_p7 = scmp.ne.s32.totalorder %s1033_s20, %s5269_s30  ;;  %s5273_s2 = sshll.u32 %s5526_s8, 4  ;;  %s5274_s2 = int_to_ptr.vmem [resolvable:$false] %s5273_s2 }
 0x29a   : > { %s5275_s22 = scalar_lea.vmem %s5274_s2, 32  ;;  %p5276_p3 = scmp.lt.s32.totalorder %s1033_s20, %s5274_s2 }
 0x29b   : > { %p5271_p2 = pnand %p5270_p7, %p7016_p0  ;;  %p5277_p6 = scmp.lt.s32.totalorder %s5275_s22, %s5269_s30 }
 0x29d   : > { %p5272_p4 = pneg %p5271_p2  ;;  %p5278_p9 = por %p5277_p6, %p5276_p3 }
 0x29f   : > { %p5279_p5 = pnand %p5278_p9, %p5272_p4 }
 0x2a1   : > { %5282 = shalt.err (!%p5279_p5)
}
 0x2a2   : > { %s7038_s5 = scalar_lea.sflag [#allocation25], %s5925_s0  ;;  %s7039_s13 = sld [smem:[#allocation80_spill]] }
 0x2a3   : > { %4414 = dma.hbm_to_vmem [thread:$0]  (%p7016_p0), %s6356_s9, 16, %s1033_s20, %s7038_s5  }
 0x2a4   : > { %s1059_s29 = scalar_lea.vmem [#allocation29], %s5928_s1 }
 0x2a5   : > { %s1066_s14 = sshll.u32 %s1059_s29, 4  ;;  %s1067_s14 = int_to_ptr.vmem [resolvable:$true] %s1066_s14 }
 0x2a8   : > { %s6382_s11 = scalar_lea.hbm %s7039_s13, %s5931_s28  ;;  %s5287_s9 = scalar_lea.hbm %s7039_s13, 32 }
 0x2a9   : > { %s5283_s12 = scalar_lea.hbm %s6382_s11, 16  ;;  %p5288_p1 = scmp.lt.u32.totalorder %s6382_s11, %s7039_s13 }
 0x2aa   : > { %p5284_p11 = scmp.ne.s32.totalorder %s6382_s11, %s5283_s12  ;;  %p5289_p8 = scmp.lt.u32.totalorder %s5287_s9, %s5283_s12 }
 0x2ab   : > { %p5291_p7 = scmp.lt.u32.totalorder %s5283_s12, %s6382_s11 }
 0x2ac   : > { %p5285_p12 = pnand %p5284_p11, %p7016_p0  ;;  %p5290_p13 = por %p5289_p8, %p5288_p1 }
 0x2ae   : > { %p5286_p10 = pneg %p5285_p12  ;;  %p5292_p2 = por %p5291_p7, %p5290_p13 }
 0x2b0   : > { %p5293_p4 = pnand %p5292_p2, %p5286_p10 }
 0x2b2   : > { %5296 = shalt.err (!%p5293_p4)
}
 0x2b3   : > { %s5297_s22 = scalar_lea.vmem %s1067_s14, 16  ;;  %s5527_s5 = smov [#allocation29]  }
 0x2b4   : > { %p5298_p3 = scmp.ne.s32.totalorder %s1067_s14, %s5297_s22  ;;  %s5301_s16 = sshll.u32 %s5527_s5, 4  ;;  %s5302_s16 = int_to_ptr.vmem [resolvable:$false] %s5301_s16 }
 0x2b5   : > { %s5303_s10 = scalar_lea.vmem %s5302_s16, 32  ;;  %p5304_p5 = scmp.lt.s32.totalorder %s1067_s14, %s5302_s16 }
 0x2b6   : > { %p5299_p6 = pnand %p5298_p3, %p7016_p0  ;;  %p5305_p11 = scmp.lt.s32.totalorder %s5303_s10, %s5297_s22 }
 0x2b8   : > { %p5300_p9 = pneg %p5299_p6  ;;  %p5306_p12 = por %p5305_p11, %p5304_p5 }
 0x2ba   : > { %p5307_p1 = pnand %p5306_p12, %p5300_p9 }
 0x2bc   : > { %5310 = shalt.err (!%p5307_p1)
}
 0x2bd   : > { %s7040_s29 = scalar_lea.sflag [#allocation28], %s5925_s0  ;;  %s7041_s8 = sld [smem:[#allocation81_spill]] }
 0x2be   : > { %4416 = dma.hbm_to_vmem [thread:$0]  (%p7016_p0), %s6382_s11, 16, %s1067_s14, %s7040_s29  }
 0x2bf   : > { %s1097_s20 = scalar_lea.vmem [#allocation32], %s5928_s1 }
 0x2c0   : > { %s1104_s2 = sshll.u32 %s1097_s20, 4  ;;  %s1105_s2 = int_to_ptr.vmem [resolvable:$true] %s1104_s2 }
 0x2c3   : > { %s6408_s9 = scalar_lea.hbm %s7041_s8, %s5931_s28  ;;  %s5315_s11 = scalar_lea.hbm %s7041_s8, 32 }
 0x2c4   : > { %s5311_s22 = scalar_lea.hbm %s6408_s9, 16  ;;  %p5316_p7 = scmp.lt.u32.totalorder %s6408_s9, %s7041_s8 }
 0x2c5   : > { %p5312_p10 = scmp.ne.s32.totalorder %s6408_s9, %s5311_s22  ;;  %p5317_p2 = scmp.lt.u32.totalorder %s5315_s11, %s5311_s22 }
 0x2c6   : > { %p5319_p3 = scmp.lt.u32.totalorder %s5311_s22, %s6408_s9 }
 0x2c7   : > { %p5313_p8 = pnand %p5312_p10, %p7016_p0  ;;  %p5318_p4 = por %p5317_p2, %p5316_p7 }
 0x2c9   : > { %p5314_p13 = pneg %p5313_p8  ;;  %p5320_p6 = por %p5319_p3, %p5318_p4 }
 0x2cb   : > { %p5321_p9 = pnand %p5320_p6, %p5314_p13 }
 0x2cd   : > { %5324 = shalt.err (!%p5321_p9)
}
 0x2ce   : > { %s5325_s29 = scalar_lea.vmem %s1105_s2, 16  ;;  %s5528_s12 = smov [#allocation32]  }
 0x2cf   : > { %p5326_p5 = scmp.ne.s32.totalorder %s1105_s2, %s5325_s29  ;;  %s5329_s30 = sshll.u32 %s5528_s12, 4  ;;  %s5330_s30 = int_to_ptr.vmem [resolvable:$false] %s5329_s30 }
 0x2d0   : > { %s5331_s20 = scalar_lea.vmem %s5330_s30, 32  ;;  %p5332_p1 = scmp.lt.s32.totalorder %s1105_s2, %s5330_s30 }
 0x2d1   : > { %p5327_p11 = pnand %p5326_p5, %p7016_p0  ;;  %p5333_p10 = scmp.lt.s32.totalorder %s5331_s20, %s5325_s29 }
 0x2d3   : > { %p5328_p12 = pneg %p5327_p11  ;;  %p5334_p8 = por %p5333_p10, %p5332_p1 }
 0x2d5   : > { %p5335_p2 = pnand %p5334_p8, %p5328_p12 }
 0x2d7   : > { %5338 = shalt.err (!%p5335_p2)
}
 0x2d8   : > { %s7042_s22 = scalar_lea.sflag [#allocation31], %s5925_s0  ;;  %s7043_s11 = sld [smem:[#allocation82_spill]] }
 0x2d9   : > { %4418 = dma.hbm_to_vmem [thread:$0]  (%p7016_p0), %s6408_s9, 16, %s1105_s2, %s7042_s22  }
 0x2da   : > { %s1135_s10 = scalar_lea.vmem [#allocation35], %s5928_s1 }
 0x2db   : > { %s1142_s29 = sshll.u32 %s1135_s10, 4  ;;  %s1143_s29 = int_to_ptr.vmem [resolvable:$true] %s1142_s29 }
 0x2de   : > { %s6434_s14 = scalar_lea.hbm %s7043_s11, %s5931_s28  ;;  %s5343_s9 = scalar_lea.hbm %s7043_s11, 32 }
 0x2df   : > { %s5339_s12 = scalar_lea.hbm %s6434_s14, 16  ;;  %p5344_p3 = scmp.lt.u32.totalorder %s6434_s14, %s7043_s11 }
 0x2e0   : > { %p5340_p13 = scmp.ne.s32.totalorder %s6434_s14, %s5339_s12  ;;  %p5345_p6 = scmp.lt.u32.totalorder %s5343_s9, %s5339_s12 }
 0x2e1   : > { %p5347_p5 = scmp.lt.u32.totalorder %s5339_s12, %s6434_s14 }
 0x2e2   : > { %p5341_p7 = pnand %p5340_p13, %p7016_p0  ;;  %p5346_p9 = por %p5345_p6, %p5344_p3 }
 0x2e4   : > { %p5342_p4 = pneg %p5341_p7  ;;  %p5348_p11 = por %p5347_p5, %p5346_p9 }
 0x2e6   : > { %p5349_p12 = pnand %p5348_p11, %p5342_p4 }
 0x2e8   : > { %5352 = shalt.err (!%p5349_p12)
}
 0x2e9   : > { %s5353_s1 = scalar_lea.vmem %s1143_s29, 16  ;;  %s5529_s28 = smov [#allocation35]  }
 0x2ea   : > { %p5354_p1 = scmp.ne.s32.totalorder %s1143_s29, %s5353_s1  ;;  %s5357_s5 = sshll.u32 %s5529_s28, 4  ;;  %s5358_s5 = int_to_ptr.vmem [resolvable:$false] %s5357_s5 }
 0x2eb   : > { %s5359_s16 = scalar_lea.vmem %s5358_s5, 32  ;;  %p5360_p2 = scmp.lt.s32.totalorder %s1143_s29, %s5358_s5 }
 0x2ec   : > { %p5355_p10 = pnand %p5354_p1, %p7016_p0  ;;  %p5361_p13 = scmp.lt.s32.totalorder %s5359_s16, %s5353_s1 }
 0x2ee   : > { %p5356_p8 = pneg %p5355_p10  ;;  %p5362_p7 = por %p5361_p13, %p5360_p2 }
 0x2f0   : > { %p5363_p3 = pnand %p5362_p7, %p5356_p8 }
 0x2f2   : > { %5366 = shalt.err (!%p5363_p3)
}
 0x2f3   : > { %s7044_s10 = scalar_lea.sflag [#allocation34], %s5925_s0 }
 0x2f4   : > { %4420 = dma.hbm_to_vmem [thread:$0]  (%p7016_p0), %s6434_s14, 16, %s1143_s29, %s7044_s10  }
 0x2f5 PF: > { %s7045_s12 = sld [smem:[#allocation63_spill]] }
 0x2fb   : > { %p7046_p4 = scmp.ne.s32.totalorder %s7045_s12, 0 }
 0x2fc   : > { %s7047_s30 = sld [smem:[#allocation59_spill]] (!%p7046_p4) }
 0x2fd   : > { %1151 = sbr.rel (%p7046_p4) target bundleno = 6640 (0x19f0), region = 120 }
 0x302   : > { %p7048_p6 = scmp.eq.s32.totalorder (!%p7046_p4), %s7047_s30, 0 }
 0x304   : > { %5418 = dma.done.wait (%p7048_p6), [#allocation4], 256   ;;  %p7049_p9 = pmov %p7048_p6 }
 0x305   : > { %p7050_p5 = pmov %p7048_p6 }
 0x306   : > { %5420 = vsyncadd (%p7049_p9), [#allocation4], 4294967040 }
 0x307   : > { %5422 = dma.done.wait (%p7050_p5), [#allocation7], 288   ;;  %p7051_p11 = pmov %p7050_p5 }
 0x308   : > { %p7052_p12 = pmov %p7050_p5 }
 0x309   : > { %5424 = vsyncadd (%p7051_p11), [#allocation7], 4294967008 }
 0x30a   : > { %5426 = dma.done.wait (%p7052_p12), [#allocation10], 272   ;;  %p7053_p0 = pmov %p7050_p5 }
 0x30b   : > { %s7054_s27 = sld [smem:[#allocation57_spill]]  ;;  %s7055_s0 = sld [smem:[#allocation61_spill]] }
 0x30c   : > { %5428 = vsyncadd (%p7053_p0), [#allocation10], 4294967024  ;;  %s6471_s14 = sand.u32 1, %s7047_s30  }
 0x30d   : > { %s1174_s20 = scalar_lea.sflag [#allocation13], %s6471_s14 }
 0x311   : > { %s6474_s29 = sand.u32 1, %s7054_s27   ;;  %p7056_p1 = scmp.ne.s32.totalorder %s7055_s0, 0 }
 0x313   : > { %5430 = dma.done.wait (%p7056_p1), %s1174_s20, 32  }
 0x314   : > { %5432 = vsyncadd (%p7056_p1), %s1174_s20, 4294967264  ;;  %s6483_s2 = sshll.u32 %s6474_s29, 6  ;;  %s1190_s1 = scalar_lea.sflag [#allocation16], %s6471_s14 }
 0x315   : > { %s6488_s28 = scalar_lea.vmem [#allocation15], %s6483_s2 }
 0x316   : > { %5434 = dma.done.wait (%p7056_p1), %s1190_s1, 2048  }
 0x317   : > { %5436 = vsyncadd (%p7056_p1), %s1190_s1, 4294965248  ;;  %s6495_s5 = scalar_lea.vmem [#allocation17], %s6483_s2  ;;  %s1208_s16 = scalar_lea.sflag [#allocation19], %s6471_s14 }
 0x318   : > { %s6499_s10 = scalar_lea.vmem [#allocation18], %s6483_s2 }
 0x319   : > { %5438 = dma.done.wait (%p7056_p1), %s1208_s16, 1088  }
 0x31a   : > { %5440 = vsyncadd (%p7056_p1), %s1208_s16, 4294966208  ;;  %s3941_s12 = sshll.u32 %s6474_s29, 2  ;;  %s1226_s20 = scalar_lea.sflag [#allocation22], %s6471_s14 }
 0x31b   : > { %s6506_s27 = scalar_lea.vmem [#allocation20], %s3941_s12  ;;  %s6509_s1 = scalar_lea.vmem [#allocation21], %s3941_s12 }
 0x31c   : > { %5442 = dma.done.wait (%p7056_p1), %s1226_s20, 128  }
 0x31d   : > { %5444 = vsyncadd (%p7056_p1), %s1226_s20, 4294967168  ;;  %s3944_s22 = sshll.u32 %s6474_s29, 4  ;;  %s6516_s9 = scalar_lea.vmem [#allocation23], %s3941_s12 }
 0x31e   : > { %s1244_s16 = scalar_lea.sflag [#allocation25], %s6471_s14  ;;  %s6519_s4 = scalar_lea.vmem [#allocation24], %s3944_s22 }
 0x31f   : > { %5446 = dma.done.wait (%p7056_p1), %s1244_s16, 272  }
 0x320   : > { %5448 = vsyncadd (%p7056_p1), %s1244_s16, 4294967024  ;;  %s1261_s20 = scalar_lea.sflag [#allocation28], %s6471_s14 }
 0x321   : > { %5450 = dma.done.wait (%p7056_p1), %s1261_s20, 32  }
 0x322   : > { %5452 = vsyncadd (%p7056_p1), %s1261_s20, 4294967264  ;;  %s1271_s12 = scalar_lea.vmem [#allocation29], %s6474_s29  ;;  %s1277_s13 = scalar_lea.sflag [#allocation31], %s6471_s14 }
 0x323   : > { %s6534_s15 = scalar_lea.vmem [#allocation30], %s3944_s22 }
 0x324   : > { %5454 = dma.done.wait (%p7056_p1), %s1277_s13, 272  }
 0x325   : > { %5456 = vsyncadd (%p7056_p1), %s1277_s13, 4294967024  ;;  %s1288_s16 = scalar_lea.vmem [#allocation32], %s6474_s29  ;;  %s1294_s11 = scalar_lea.sflag [#allocation34], %s6471_s14 }
 0x326   : > { %s6543_s8 = scalar_lea.vmem [#allocation33], %s6483_s2 }
 0x327   : > { %5458 = dma.done.wait (%p7056_p1), %s1294_s11, 1040  }
 0x328   : > { %5460 = vsyncadd (%p7056_p1), %s1294_s11, 4294966256  ;;  %s1305_s22 = scalar_lea.vmem [#allocation35], %s6474_s29  ;;  %p7057_p10 = pmov %p7053_p0 }
 0x329   : > { %p7058_p8 = pmov %p7053_p0 }
 0x32a   : > { %5462 = dma.done.wait (%p7057_p10), [#allocation37], 32  }
 0x32b   : > { %5464 = vsyncadd (%p7058_p8), [#allocation37], 4294967264  ;;  %p7059_p2 = pmov %p7053_p0 }
 0x32c   : > { %p7060_p13 = pmov %p7053_p0 }
 0x32d   : > { %5466 = dma.done.wait (%p7059_p2), [#allocation40], 272  }
 0x32e   : > { %5468 = vsyncadd (%p7060_p13), [#allocation40], 4294967024  ;;  %s7061_s13 = sld [smem:[#allocation58_spill]] }
 0x334   : > { %p3951_p7 = scmp.ne.s32.totalorder %s7061_s13, 0 }
 0x335   : > { %v1461_v0 = vld [vmem:[#allocation8] sm:$0x3] (!%p3951_p7)  ;;  %vm1473_vm0 = vcmask (!%p3951_p7), 1041408   ;;  %v5530_v2 = vmov (!%p3951_p7), 0.0   ;;  %vm5531_vm1 = vmmov (!%p3951_p7), 0   ;;  %v1459_v4 = vld [vmem:[#allocation3 + $0x8] sm:$0xff] (!%p3951_p7) }
 0x336   : > { %1457 = sbr.rel (%p3951_p7) target bundleno = 1045 (0x415), region = 224  ;;  %v1458_v1 = vld [vmem:[#allocation3] sm:$0xff] (!%p3951_p7)  ;;  %4177 = vmatprep.subr.bf16.mxu0 (!%p3951_p7), %v5530_v2  ;;  %v1475_v3 = vsel (!%p3951_p7), %vm1473_vm0, %v1461_v0, 0  ;;  %4179 = vmatprep.mubr.msk.bf16.mxu0 (!%p3951_p7), %vm5531_vm1, %v5530_v2  ;;  %vm1469_vm2 = vcmask (!%p3951_p7), 31744   ;;  %vm1522_vm3 = vcmask (!%p3951_p7), 261120   ;;  %v1519_v12 = vld [vmem:[#allocation11 + $0x8] sm:$0xff] (!%p3951_p7) }
 0x337   : > { %4178 = vmatpush3.bf16.msra.mxu0 (!%p3951_p7), %v1475_v3  ;;  %v1460_v5 = vpack.c.bf16 (!%p3951_p7), %v1459_v4, %v1458_v1  ;;  %v3952_v6 = vld [vmem:[#allocation9] ss:$0 sm:$0xff] (!%p3951_p7)  ;;  %v1518_v8 = vld [vmem:[#allocation11] sm:$0xff] (!%p3951_p7) }
 0x33a   : > { %4180 = vmatmul.mubr.msk.bf16.vlgmr.msra.gmra.mrb[0].mxu0 (!%p3951_p7), %vm1469_vm2, %v1460_v5 }
 0x40d   : > { %v1511_v7 = vpop.f32.mrb[0].mxu0 }
 0x40e   : > { %v1512_v9 = vadd.f32 %v3952_v6, %v1511_v7  ;;  %v4181_v10 = vpop.f32.mrb[1].mxu0 }
 0x40f   : > { %v1514_v11 = vpop.f32.mrb[2].mxu0 }
 0x410   : > { %v1520_v13 = vadd.f32 %v1518_v8, %v1512_v9  ;;  %v1515_v14 = vadd.f32 %v3952_v6, %v1514_v11  ;;  %v4182_v15 = vpop.f32.mrb[3].mxu0 }
 0x412   : > { %1523 = vst.msk [vmem:[#allocation2] sm:$0xff] %vm1522_vm3, %v1520_v13  ;;  %v1521_v16 = vadd.f32 %v1519_v12, %v1515_v14 }
 0x414   : > { %1524 = vst.msk [vmem:[#allocation2 + $0x8] sm:$0xff] %vm1522_vm3, %v1521_v16 }
 0x415 PF: > { %vm1531_vm4 = vcmask 261120   ;;  %v4581_v31 = vld [vmem:[%s6488_s28] sm:$0xff]   ;;  %v5532_v32 = vmov 0.0   ;;  %v4582_v33 = vld [vmem:[%s6488_s28 + $0x8] sm:$0xff]   ;;  %vm5533_vm5 = vmmov 0   ;;  %s7062_s11 = scalar_lea.vmem [#allocation12], %s6474_s29 }
 0x416   : > { %4183 = vmatprep.subr.bf16.mxu0 %v5532_v32  ;;  %4207 = vmatprep.subr.bf16.mxu1 %v5532_v32  ;;  %v3954_v42 = vld [vmem:[%s7062_s11] ss:$0 sm:$0xff]  ;;  %s7063_s30 = scalar_lea.vmem [#allocation14], %s6474_s29  ;;  %v4583_v50 = vld [vmem:[%s6495_s5] sm:$0xff]   ;;  %v4584_v52 = vld [vmem:[%s6495_s5 + $0x8] sm:$0xff]   ;;  %vm1775_vm6 = vcmask 64512  }
 0x417   : > { %4184 = vmatpush3.bf16.msra.mxu0 %v4581_v31  ;;  %4187 = vmatprep.mubr.msk.bf16.mxu0 %vm5533_vm5, %v5532_v32  ;;  %v3955_v46 = vld [vmem:[%s7063_s30] ss:$0 sm:$0xff]  ;;  %v4585_v53 = vld [vmem:[%s6499_s10] sm:$0xff]   ;;  %v4586_v54 = vld [vmem:[%s6499_s10 + $0x8] sm:$0xff]   ;;  %vm1823_vm7 = vcmask 130048   ;;  %vm2217_vm8 = vcmask 1043456  }
 0x418   : > { %4185 = vmatprep.subr.bf16.mxu0 %v5532_v32  ;;  %4209 = vmatprep.mubr.msk.bf16.mxu1 %vm5533_vm5, %v5532_v32  ;;  %v3956_v55 = vld [vmem:[%s6506_s27] ss:$0 sm:$0xff]  ;;  %v3960_v1 = vld [vmem:[%s6509_s1] ss:$0 sm:$0xff]  ;;  %v3964_v10 = vld [vmem:[%s6516_s9] ss:$0 sm:$0xff] }
 0x419   : > { %v1525_v17 = vld [vmem:[#allocation2] sm:$0xff]  ;;  %s7065_s0 = scalar_lea.vmem [#allocation27], %s6474_s29 }
 0x41a   : > { %v1532_v19 = vsel %vm1531_vm4, %v1525_v17, 0.0 }
 0x41b   : > { %v1526_v18 = vld [vmem:[#allocation2 + $0x8] sm:$0xff]  ;;  %1533 = vadd.xlane.f32.xlu0 %v1532_v19  ;;  %4186 = vmatpush3.bf16.msra.mxu0 %v4582_v33  ;;  %v4588_v19 = vld [vmem:[%s6488_s28 + $0x18] sm:$0xff]  }
 0x41c   : > { %v1535_v20 = vsel %vm1531_vm4, %v1526_v18, 0.0  ;;  %4191 = vmatprep.subr.bf16.mxu0 %v5532_v32  ;;  %v3975_v33 = vld [vmem:[%s6506_s27 + $0x1] ss:$0 sm:$0xff] }
 0x41f   : > { %1536 = vadd.xlane.f32.xlu0 %v1535_v20  ;;  %v4589_v20 = vld [vmem:[%s6499_s10 + $0x10] sm:$0xff]  }
 0x4a8   : > { %v1534_v21 = vpop.xlane.xlu0 %1533 }
 0x4a9   : > { %v1539_v22 = vmul.f32 0.03125, %v1534_v21  ;;  %v4590_v21 = vld [vmem:[%s6499_s10 + $0x18] sm:$0xff]  }
 0x4ab   : > { %v1541_v23 = vsub.f32 %v1525_v17, %v1539_v22  ;;  %v4587_v17 = vld [vmem:[%s6488_s28 + $0x10] sm:$0xff]   ;;  %v6624_v22 = vld [vmem:[#allocation6] sm:$0xff] }
 0x4ac   : > { %v1537_v24 = vpop.xlane.xlu0 %1536 }
 0x4ad   : > { %v1540_v25 = vmul.f32 0.03125, %v1537_v24  ;;  %v1543_v26 = vmul.f32 %v1541_v23, %v1541_v23  ;;  %v6626_v24 = vld [vmem:[#allocation6 + $0x8] sm:$0xff] }
 0x4af   : > { %v1542_v27 = vsub.f32 %v1526_v18, %v1540_v25  ;;  %v1545_v28 = vsel %vm1531_vm4, %v1543_v26, 0.0 }
 0x4b0   : > { %1546 = vadd.xlane.f32.xlu1 %v1545_v28 }
 0x4b1   : > { %v1544_v29 = vmul.f32 %v1542_v27, %v1542_v27 }
 0x4b3   : > { %v1548_v30 = vsel %vm1531_vm4, %v1544_v29, 0.0 }
 0x4b4   : > { %1549 = vadd.xlane.f32.xlu1 %v1548_v30 }
 0x53d   : > { %v1547_v34 = vpop.xlane.xlu1 %1546 }
 0x53e   : > { %v1551_v35 = vmul.f32 0.03125, %v1547_v34 }
 0x540   : > { %v1553_v36 = vadd.f32 1e-05, %v1551_v35 }
 0x541   : > { %v1550_v37 = vpop.xlane.xlu1 %1549 }
 0x542   : > { %4615 = vrsqrt.f32 %v1553_v36  ;;  %v1552_v38 = vmul.f32 0.03125, %v1550_v37 }
 0x544   : > { %v1554_v39 = vadd.f32 1e-05, %v1552_v38 }
 0x546   : > { %4617 = vrsqrt.f32 %v1554_v39 }
 0x54c   : > { %v4616_v40 = vpop.eup %4615 }
 0x54d   : > { %v1557_v41 = vmul.f32 %v4616_v40, %v1541_v23 }
 0x54f   : > { %v1565_v44 = vmul.f32 %v3954_v42, %v1557_v41 }
 0x550   : > { %v4618_v43 = vpop.eup %4617 }
 0x551   : > { %v1558_v45 = vmul.f32 %v4618_v43, %v1542_v27  ;;  %v1573_v48 = vadd.f32 %v3955_v46, %v1565_v44  ;;  %v3993_v43 = vld [vmem:[%s6516_s9 + $0x1] ss:$0 sm:$0xff] }
 0x553   : > { %v1566_v47 = vmul.f32 %v3954_v42, %v1558_v45 }
 0x555   : > { %v1574_v49 = vadd.f32 %v3955_v46, %v1566_v47 }
 0x557   : > { %v6578_v51 = vpack.c.bf16 %v1574_v49, %v1573_v48 }
 0x559   : > { %4188 = vmatmul.mubr.msk.bf16.vlgmr.msra.gmra.mrb[0].mxu0 %vm1531_vm4, %v6578_v51 }
 0x55a   : > { %4192 = vmatpush3.bf16.msra.mxu0 %v4583_v50  ;;  %4195 = vmatprep.mubr.msk.bf16.mxu0 %vm5533_vm5, %v5532_v32 }
 0x55b   : > { %4193 = vmatprep.subr.bf16.mxu0 %v5532_v32 }
 0x55e   : > { %4194 = vmatpush3.bf16.msra.mxu0 %v4584_v52 }
 0x55f   : > { %4199 = vmatprep.subr.bf16.mxu0 %v5532_v32 }
 0x561   : > { %4196 = vmatmul.mubr.msk.bf16.vlgmr.msra.gmra.mrb[4].mxu0 %vm1531_vm4, %v6578_v51 }
 0x562   : > { %4200 = vmatpush3.bf16.msra.mxu0 %v4585_v53  ;;  %4203 = vmatprep.mubr.msk.bf16.mxu0 %vm5533_vm5, %v5532_v32 }
 0x563   : > { %4201 = vmatprep.subr.bf16.mxu0 %v5532_v32 }
 0x566   : > { %4202 = vmatpush3.bf16.msra.mxu0 %v4586_v54 }
 0x567   : > { %4213 = vmatprep.subr.bf16.mxu0 %v5532_v32 }
 0x569   : > { %4204 = vmatmul.mubr.msk.bf16.vlgmr.msra.gmra.mrb[8].mxu0 %vm1531_vm4, %v6578_v51 }
 0x56a   : > { %4215 = vmatprep.mubr.msk.bf16.mxu0 %vm5533_vm5, %v5532_v32 }
 0x62c   : > { %v1636_v56 = vpop.f32.mrb[0].mxu0 }
 0x62d   : > { %v1637_v57 = vadd.f32 %v3956_v55, %v1636_v56  ;;  %v4189_v58 = vpop.f32.mrb[1].mxu0 }
 0x62e   : > { %v1639_v59 = vpop.f32.mrb[2].mxu0 }
 0x62f   : > { %v1640_v60 = vadd.f32 %v3956_v55, %v1639_v59  ;;  %v4190_v61 = vpop.f32.mrb[3].mxu0  ;;  %v1643_v62 = vmul.f32 0.35355338, %v1637_v57 }
 0x631   : > { %v1644_v63 = vmul.f32 0.35355338, %v1640_v60 }
 0x633   : > { %v1773_v0 = vpack.c.bf16 %v1644_v63, %v1643_v62 }
 0x634   : > { %v1702_v2 = vpop.f32.mrb[4].mxu0 }
 0x635   : > { %v4197_v3 = vpop.f32.mrb[5].mxu0  ;;  %v1703_v5 = vadd.f32 %v3960_v1, %v1702_v2 }
 0x636   : > { %v1705_v4 = vpop.f32.mrb[6].mxu0 }
 0x637   : > { %v1706_v6 = vadd.f32 %v3960_v1, %v1705_v4  ;;  %v4198_v7 = vpop.f32.mrb[7].mxu0  ;;  %v4591_v4 = vld [vmem:[%s6495_s5 + $0x10] sm:$0xff]  }
 0x639   : > { %v1774_v8 = vpack.c.bf16 %v1706_v6, %v1703_v5  ;;  %v4592_v6 = vld [vmem:[%s6495_s5 + $0x18] sm:$0xff]  }
 0x63b   : > { %v1780_v9 = vsel %vm1775_vm6, %v1774_v8, 0 }
 0x63c   : > { %v1766_v11 = vpop.f32.mrb[8].mxu0  ;;  %4208 = vmatpush3.bf16.xpose.msra.mxu1 %v1780_v9 }
 0x63d   : > { %v4205_v12 = vpop.f32.mrb[9].mxu0  ;;  %4219 = vmatprep.subr.bf16.mxu1 %v5532_v32  ;;  %v1767_v14 = vadd.f32 %v3964_v10, %v1766_v11 }
 0x63e   : > { %v1769_v13 = vpop.f32.mrb[10].mxu0  ;;  %v3984_v12 = vld [vmem:[%s6509_s1 + $0x1] ss:$0 sm:$0xff] }
 0x63f   : > { %v1770_v15 = vadd.f32 %v3964_v10, %v1769_v13  ;;  %v4206_v16 = vpop.f32.mrb[11].mxu0 }
 0x641   : > { %v1847_v18 = vpack.c.bf16 %v1770_v15, %v1767_v14 }
 0x643   : > { %4210 = vmatmul.mubr.msk.bf16.vlgmr.msra.gmra.mrb[0].mxu1 %vm1775_vm6, %v1773_v0  ;;  %4214 = vmatpush3.bf16.msra.mxu0 %v1847_v18 }
 0x644   : > { %4220 = vmatpush3.bf16.msra.mxu1 %v4587_v17  ;;  %4223 = vmatprep.mubr.msk.bf16.mxu1 %vm5533_vm5, %v5532_v32 }
 0x645   : > { %4221 = vmatprep.subr.bf16.mxu1 %v5532_v32  ;;  %4227 = vmatprep.subr.bf16.mxu0 %v5532_v32 }
 0x648   : > { %4222 = vmatpush3.bf16.msra.mxu1 %v4588_v19 }
 0x649   : > { %4235 = vmatprep.subr.bf16.mxu1 %v5532_v32 }
 0x64b   : > { %4224 = vmatmul.mubr.msk.bf16.vlgmr.msra.gmra.mrb[4].mxu1 %vm1531_vm4, %v6578_v51 }
 0x64c   : > { %4236 = vmatpush3.bf16.msra.mxu1 %v4589_v20  ;;  %4239 = vmatprep.mubr.msk.bf16.mxu1 %vm5533_vm5, %v5532_v32 }
 0x64d   : > { %4237 = vmatprep.subr.bf16.mxu1 %v5532_v32 }
 0x650   : > { %4238 = vmatpush3.bf16.msra.mxu1 %v4590_v21 }
 0x651   : > { %4249 = vmatprep.subr.bf16.mxu1 %v5532_v32 }
 0x653   : > { %4240 = vmatmul.mubr.msk.bf16.vlgmr.msra.gmra.mrb[8].mxu1 %vm1531_vm4, %v6578_v51 }
 0x654   : > { %4251 = vmatprep.mubr.msk.bf16.mxu1 %vm5533_vm5, %v5532_v32 }
 0x716   : > { %v1816_v23 = vpop.f32.mrb[0].mxu1 }
 0x717   : > { %v1817_v25 = vadd.f32 %v1816_v23, %v6624_v22  ;;  %v4211_v26 = vpop.f32.mrb[1].mxu1 }
 0x718   : > { %v1819_v27 = vpop.f32.mrb[2].mxu1 }
 0x719   : > { %v1820_v28 = vadd.f32 %v1819_v27, %v6626_v24  ;;  %v4212_v29 = vpop.f32.mrb[3].mxu1  ;;  %v1824_v30 = vsel %vm1823_vm7, %v1817_v25, -inf }
 0x71a   : > { %1825 = vmax.xlane.f32.xlu0 %v1824_v30 }
 0x71b   : > { %v1827_v31 = vsel %vm1823_vm7, %v1820_v28, -inf }
 0x71c   : > { %1828 = vmax.xlane.f32.xlu1 %v1827_v31 }
 0x71e   : > { %v1953_v34 = vpop.f32.mrb[4].mxu1 }
 0x71f   : > { %v1954_v35 = vadd.f32 %v3975_v33, %v1953_v34  ;;  %v4225_v36 = vpop.f32.mrb[5].mxu1 }
 0x720   : > { %v1956_v37 = vpop.f32.mrb[6].mxu1 }
 0x721   : > { %v1957_v38 = vadd.f32 %v3975_v33, %v1956_v37  ;;  %v4226_v39 = vpop.f32.mrb[7].mxu1  ;;  %v6633_v40 = vmul.f32 0.35355338, %v1954_v35 }
 0x723   : > { %v1961_v41 = vmul.f32 0.35355338, %v1957_v38 }
 0x725   : > { %v2094_v42 = vpack.c.bf16 %v1961_v41, %v6633_v40 }
 0x726   : > { %v2087_v44 = vpop.f32.mrb[8].mxu1 }
 0x727   : > { %v4241_v45 = vpop.f32.mrb[9].mxu1  ;;  %v2088_v47 = vadd.f32 %v3993_v43, %v2087_v44 }
 0x728   : > { %v2090_v46 = vpop.f32.mrb[10].mxu1 }
 0x729   : > { %v2091_v48 = vadd.f32 %v3993_v43, %v2090_v46  ;;  %v4242_v49 = vpop.f32.mrb[11].mxu1 }
 0x72b   : > { %v2166_v50 = vpack.c.bf16 %v2091_v48, %v2088_v47  ;;  %v1893_v48 = vld [vmem:[%s6519_s4] sm:$0xf] }
 0x72d   : > { %4250 = vmatpush3.bf16.msra.mxu1 %v2166_v50 }
 0x72e   : > { %4261 = vmatprep.subr.bf16.mxu1 %v5532_v32 }
 0x7a7   : > { %v1826_v52 = vpop.xlane.xlu0 %1825 }
 0x7a8   : > { %v1830_v53 = vsub.f32 %v1817_v25, %v1826_v52 }
 0x7a9   : > { %v1829_v54 = vpop.xlane.xlu1 %1828 }
 0x7aa   : > { %v1832_v55 = vmul.f32 1.442695, %v1830_v53  ;;  %v1831_v56 = vsub.f32 %v1820_v28, %v1829_v54  ;;  %v2266_v53 = vsel %vm2217_vm8, %v1893_v48, 0  ;;  %v4593_v54 = vld [vmem:[%s6495_s5 + $0x20] sm:$0xff]  }
 0x7ac   : > { %4619 = vpow2.f32 %v1832_v55  ;;  %v1834_v57 = vmul.f32 1.442695, %v1831_v56  ;;  %v4594_v55 = vld [vmem:[%s6495_s5 + $0x28] sm:$0xff]  }
 0x7ae   : > { %4621 = vpow2.f32 %v1834_v57 }
 0x7b6   : > { %v4620_v58 = vpop.eup %4619 }
 0x7b7   : > { %v1836_v59 = vsel %vm1823_vm7, %v4620_v58, 0.0 }
 0x7b8   : > { %v4622_v60 = vpop.eup %4621  ;;  %1837 = vadd.xlane.f32.xlu0 %v1836_v59  ;;  %v4595_v59 = vld [vmem:[%s6488_s28 + $0x20] sm:$0xff]  }
 0x7b9   : > { %v1839_v61 = vsel %vm1823_vm7, %v4622_v60, 0.0 }
 0x7ba   : > { %1840 = vadd.xlane.f32.xlu1 %v1839_v61 }
 0x845   : > { %v1838_v62 = vpop.xlane.xlu0 %1837 }
 0x846   : > { %4623 = vrcp.f32 %v1838_v62  ;;  %v4596_v62 = vld [vmem:[%s6488_s28 + $0x28] sm:$0xff]  }
 0x847   : > { %v1841_v63 = vpop.xlane.xlu1 %1840 }
 0x848   : > { %4625 = vrcp.f32 %v1841_v63 }
 0x850   : > { %v4624_v0 = vpop.eup %4623 }
 0x851   : > { %v1844_v2 = vmul.f32 %v4624_v0, %v4620_v58 }
 0x852   : > { %v4626_v1 = vpop.eup %4625 }
 0x853   : > { %v1845_v3 = vmul.f32 %v4626_v1, %v4622_v60 }
 0x855   : > { %v1846_v5 = vpack.c.bf16 %v1845_v3, %v1844_v2  ;;  %v4597_v2 = vld [vmem:[%s6499_s10 + $0x20] sm:$0xff]  }
 0x857   : > { %4216 = vmatmul.mubr.msk.bf16.vlgmr.msra.gmra.mrb[12].mxu0 %vm1823_vm7, %v1846_v5  ;;  %v4016_v5 = vld [vmem:[%s6509_s1 + $0x2] ss:$0 sm:$0xff] }
 0x858   : > { %4228 = vmatpush3.bf16.msra.mxu0 %v4591_v4  ;;  %4231 = vmatprep.mubr.msk.bf16.mxu0 %vm5533_vm5, %v5532_v32  ;;  %v4598_v4 = vld [vmem:[%s6499_s10 + $0x28] sm:$0xff]  }
 0x859   : > { %4229 = vmatprep.subr.bf16.mxu0 %v5532_v32 }
 0x85c   : > { %4230 = vmatpush3.bf16.msra.mxu0 %v4592_v6 }
 0x85d   : > { %4243 = vmatprep.subr.bf16.mxu0 %v5532_v32 }
 0x85f   : > { %4232 = vmatmul.mubr.msk.bf16.vlgmr.msra.gmra.mrb[16].mxu0 %vm1531_vm4, %v6578_v51 }
 0x860   : > { %4245 = vmatprep.mubr.msk.bf16.mxu0 %vm5533_vm5, %v5532_v32 }
 0x92a   : > { %v6651_v7 = vpop.f32.mrb[12].mxu0 }
 0x92b   : > { %v4217_v8 = vpop.f32.mrb[13].mxu0 }
 0x92c   : > { %v1888_v9 = vpop.f32.mrb[14].mxu0 }
 0x92d   : > { %v1892_v10 = vpack.c.bf16 %v1888_v9, %v6651_v7  ;;  %v4218_v11 = vpop.f32.mrb[15].mxu0 }
 0x932   : > { %v2021_v13 = vpop.f32.mrb[16].mxu0 }
 0x933   : > { %v4233_v14 = vpop.f32.mrb[17].mxu0  ;;  %v2022_v16 = vadd.f32 %v3984_v12, %v2021_v13 }
 0x934   : > { %v2024_v15 = vpop.f32.mrb[18].mxu0 }
 0x935   : > { %v2025_v17 = vadd.f32 %v3984_v12, %v2024_v15  ;;  %v4234_v18 = vpop.f32.mrb[19].mxu0 }
 0x937   : > { %v2095_v19 = vpack.c.bf16 %v2025_v17, %v2022_v16 }
 0x939   : > { %v2100_v20 = vsel %vm1775_vm6, %v2095_v19, 0 }
 0x93a   : > { %4244 = vmatpush3.bf16.xpose.msra.mxu0 %v2100_v20  ;;  %v4007_v20 = vld [vmem:[%s6506_s27 + $0x2] ss:$0 sm:$0xff] }
 0x93b   : > { %4255 = vmatprep.subr.bf16.mxu0 %v5532_v32 }
 0x941   : > { %4246 = vmatmul.mubr.msk.bf16.vlgmr.msra.gmra.mrb[20].mxu0 %vm1775_vm6, %v2094_v42  ;;  %v3999_v42 = vld [vmem:[%s6519_s4 + $0x4] sm:$0xf] }
 0x942   : > { %4257 = vmatprep.mubr.msk.bf16.mxu0 %vm5533_vm5, %v5532_v32  ;;  %v2219_v43 = vsel %vm2217_vm8, %v3999_v42, 0 }
 0x943   : > { %4256 = vmatpush3.bf16.msra.mxu0 %v2219_v43 }
 0x944   : > { %4267 = vmatprep.subr.bf16.mxu0 %v5532_v32 }
 0xa14   : > { %v2136_v21 = vpop.f32.mrb[20].mxu0 }
 0xa15   : > { %v2137_v23 = vadd.f32 %v2136_v21, %v6624_v22  ;;  %v4247_v25 = vpop.f32.mrb[21].mxu0 }
 0xa16   : > { %v2139_v26 = vpop.f32.mrb[22].mxu0 }
 0xa17   : > { %v2140_v27 = vadd.f32 %v2139_v26, %v6626_v24  ;;  %v4248_v28 = vpop.f32.mrb[23].mxu0  ;;  %v2143_v29 = vsel %vm1823_vm7, %v2137_v23, -inf }
 0xa18   : > { %2144 = vmax.xlane.f32.xlu0 %v2143_v29 }
 0xa19   : > { %v2146_v30 = vsel %vm1823_vm7, %v2140_v27, -inf }
 0xa1a   : > { %2147 = vmax.xlane.f32.xlu1 %v2146_v30 }
 0xaa5   : > { %v2145_v31 = vpop.xlane.xlu0 %2144 }
 0xaa6   : > { %v2149_v33 = vsub.f32 %v2137_v23, %v2145_v31 }
 0xaa7   : > { %v2148_v34 = vpop.xlane.xlu1 %2147 }
 0xaa8   : > { %v2151_v35 = vmul.f32 1.442695, %v2149_v33  ;;  %v2150_v36 = vsub.f32 %v2140_v27, %v2148_v34  ;;  %v4025_v33 = vld [vmem:[%s6516_s9 + $0x2] ss:$0 sm:$0xff] }
 0xaaa   : > { %4627 = vpow2.f32 %v2151_v35  ;;  %v2153_v37 = vmul.f32 1.442695, %v2150_v36 }
 0xaac   : > { %4629 = vpow2.f32 %v2153_v37 }
 0xab4   : > { %v4628_v38 = vpop.eup %4627 }
 0xab5   : > { %v2155_v39 = vsel %vm1823_vm7, %v4628_v38, 0.0 }
 0xab6   : > { %v4630_v40 = vpop.eup %4629  ;;  %2156 = vadd.xlane.f32.xlu0 %v2155_v39 }
 0xab7   : > { %v2158_v41 = vsel %vm1823_vm7, %v4630_v40, 0.0 }
 0xab8   : > { %2159 = vadd.xlane.f32.xlu1 %v2158_v41 }
 0xb43   : > { %v2157_v44 = vpop.xlane.xlu0 %2156 }
 0xb44   : > { %4631 = vrcp.f32 %v2157_v44 }
 0xb45   : > { %v2160_v45 = vpop.xlane.xlu1 %2159 }
 0xb46   : > { %4633 = vrcp.f32 %v2160_v45 }
 0xb4e   : > { %v4632_v46 = vpop.eup %4631 }
 0xb4f   : > { %v2163_v49 = vmul.f32 %v4632_v46, %v4628_v38 }
 0xb50   : > { %v4634_v47 = vpop.eup %4633 }
 0xb51   : > { %v2164_v50 = vmul.f32 %v4634_v47, %v4630_v40 }
 0xb53   : > { %v2165_v52 = vpack.c.bf16 %v2164_v50, %v2163_v49 }
 0xb55   : > { %4252 = vmatmul.mubr.msk.bf16.vlgmr.msra.gmra.mrb[12].mxu1 %vm1823_vm7, %v2165_v52 }
 0xb56   : > { %4262 = vmatpush3.bf16.msra.mxu1 %v2266_v53  ;;  %4263 = vmatprep.mubr.msk.bf16.mxu1 %vm5533_vm5, %v5532_v32 }
 0xb57   : > { %4275 = vmatprep.subr.bf16.mxu1 %v5532_v32 }
 0xb5d   : > { %4264 = vmatmul.mubr.msk.bf16.vlgmr.msra.gmra.mrb[16].mxu1 %vm1775_vm6, %v1892_v10 }
 0xb5e   : > { %4276 = vmatpush3.bf16.msra.mxu1 %v4593_v54  ;;  %4279 = vmatprep.mubr.msk.bf16.mxu1 %vm5533_vm5, %v5532_v32 }
 0xb5f   : > { %4277 = vmatprep.subr.bf16.mxu1 %v5532_v32 }
 0xb62   : > { %4278 = vmatpush3.bf16.msra.mxu1 %v4594_v55 }
 0xb63   : > { %4291 = vmatprep.subr.bf16.mxu1 %v5532_v32 }
 0xb65   : > { %4280 = vmatmul.mubr.msk.bf16.vlgmr.msra.gmra.mrb[20].mxu1 %vm1531_vm4, %v6578_v51 }
 0xb66   : > { %4293 = vmatprep.mubr.msk.bf16.mxu1 %vm5533_vm5, %v5532_v32 }
 0xc28   : > { %v2204_v56 = vpop.f32.mrb[12].mxu1 }
 0xc29   : > { %v4253_v57 = vpop.f32.mrb[13].mxu1 }
 0xc2a   : > { %v2207_v58 = vpop.f32.mrb[14].mxu1 }
 0xc2b   : > { %v2211_v60 = vpack.c.bf16 %v2207_v58, %v2204_v56  ;;  %v4254_v61 = vpop.f32.mrb[15].mxu1 }
 0xc2d   : > { %4258 = vmatmul.mubr.msk.bf16.vlgmr.msra.gmra.mrb[24].mxu0 %vm1775_vm6, %v2211_v60  ;;  %v4031_v60 = vld [vmem:[%s6519_s4 + $0x8] sm:$0xf] }
 0xc2e   : > { %4268 = vmatpush3.bf16.msra.mxu0 %v4595_v59  ;;  %4271 = vmatprep.mubr.msk.bf16.mxu0 %vm5533_vm5, %v5532_v32  ;;  %v2633_v61 = vsel %vm2217_vm8, %v4031_v60, 0 }
 0xc2f   : > { %4269 = vmatprep.subr.bf16.mxu0 %v5532_v32 }
 0xc30   : > { %v2302_v63 = vpop.f32.mrb[16].mxu1 }
 0xc31   : > { %v4265_v0 = vpop.f32.mrb[17].mxu1 }
 0xc32   : > { %v2305_v1 = vpop.f32.mrb[18].mxu1  ;;  %4270 = vmatpush3.bf16.msra.mxu0 %v4596_v62 }
 0xc33   : > { %v4266_v3 = vpop.f32.mrb[19].mxu1  ;;  %4283 = vmatprep.subr.bf16.mxu0 %v5532_v32 }
 0xc35   : > { %4272 = vmatmul.mubr.msk.bf16.vlgmr.msra.gmra.mrb[28].mxu0 %vm1531_vm4, %v6578_v51 }
 0xc36   : > { %4284 = vmatpush3.bf16.msra.mxu0 %v4597_v2  ;;  %4287 = vmatprep.mubr.msk.bf16.mxu0 %vm5533_vm5, %v5532_v32 }
 0xc37   : > { %4285 = vmatprep.subr.bf16.mxu0 %v5532_v32 }
 0xc38   : > { %v2436_v6 = vpop.f32.mrb[20].mxu1 }
 0xc39   : > { %v4281_v7 = vpop.f32.mrb[21].mxu1  ;;  %v2437_v9 = vadd.f32 %v4016_v5, %v2436_v6  ;;  %v4600_v6 = vld [vmem:[%s6488_s28 + $0x38] sm:$0xff]  }
 0xc3a   : > { %v2439_v8 = vpop.f32.mrb[22].mxu1  ;;  %4286 = vmatpush3.bf16.msra.mxu0 %v4598_v4  ;;  %v4599_v4 = vld [vmem:[%s6488_s28 + $0x30] sm:$0xff]  }
 0xc3b   : > { %v2440_v10 = vadd.f32 %v4016_v5, %v2439_v8  ;;  %v4282_v11 = vpop.f32.mrb[23].mxu1  ;;  %4297 = vmatprep.subr.bf16.mxu0 %v5532_v32  ;;  %v4601_v7 = vld [vmem:[%s6499_s10 + $0x30] sm:$0xff]   ;;  %v4602_v8 = vld [vmem:[%s6499_s10 + $0x38] sm:$0xff]  }
 0xc3d   : > { %v2510_v12 = vpack.c.bf16 %v2440_v10, %v2437_v9  ;;  %4288 = vmatmul.mubr.msk.bf16.vlgmr.msra.gmra.mrb[32].mxu0 %vm1531_vm4, %v6578_v51 }
 0xc3e   : > { %4299 = vmatprep.mubr.msk.bf16.mxu0 %vm5533_vm5, %v5532_v32 }
 0xc3f   : > { %v2515_v13 = vsel %vm1775_vm6, %v2510_v12, 0  ;;  %v4603_v12 = vld [vmem:[%s6495_s5 + $0x30] sm:$0xff]  }
 0xc40   : > { %4292 = vmatpush3.bf16.xpose.msra.mxu1 %v2515_v13 }
 0xc41   : > { %4303 = vmatprep.subr.bf16.mxu1 %v5532_v32 }
 0xd00   : > { %v2255_v14 = vpop.f32.mrb[24].mxu0 }
 0xd01   : > { %v6708_v15 = vadd.f32 %v2302_v63, %v2255_v14  ;;  %v4259_v16 = vpop.f32.mrb[25].mxu0 }
 0xd02   : > { %v2258_v17 = vpop.f32.mrb[26].mxu0  ;;  %v4038_v16 = vld [vmem:[%s6506_s27 + $0x3] ss:$0 sm:$0xff] }
 0xd03   : > { %v6710_v18 = vadd.f32 %v2305_v1, %v2258_v17  ;;  %v4260_v19 = vpop.f32.mrb[27].mxu0  ;;  %v4604_v17 = vld [vmem:[%s6495_s5 + $0x38] sm:$0xff]  }
 0xd08   : > { %v2368_v21 = vpop.f32.mrb[28].mxu0 }
 0xd09   : > { %v2369_v23 = vadd.f32 %v4007_v20, %v2368_v21  ;;  %v4273_v25 = vpop.f32.mrb[29].mxu0 }
 0xd0a   : > { %v2371_v26 = vpop.f32.mrb[30].mxu0 }
 0xd0b   : > { %v2372_v27 = vadd.f32 %v4007_v20, %v2371_v26  ;;  %v4274_v28 = vpop.f32.mrb[31].mxu0  ;;  %v2375_v29 = vmul.f32 0.35355338, %v2369_v23 }
 0xd0d   : > { %v2376_v30 = vmul.f32 0.35355338, %v2372_v27 }
 0xd0f   : > { %v2509_v31 = vpack.c.bf16 %v2376_v30, %v2375_v29  ;;  %v4056_v30 = vld [vmem:[%s6516_s9 + $0x3] ss:$0 sm:$0xff] }
 0xd10   : > { %v2502_v34 = vpop.f32.mrb[32].mxu0 }
 0xd11   : > { %v4289_v35 = vpop.f32.mrb[33].mxu0  ;;  %4294 = vmatmul.mubr.msk.bf16.vlgmr.msra.gmra.mrb[24].mxu1 %vm1775_vm6, %v2509_v31  ;;  %v2503_v37 = vadd.f32 %v4025_v33, %v2502_v34 }
 0xd12   : > { %v2505_v36 = vpop.f32.mrb[34].mxu0  ;;  %4305 = vmatprep.mubr.msk.bf16.mxu1 %vm5533_vm5, %v5532_v32  ;;  %4304 = vmatpush3.bf16.msra.mxu1 %v2633_v61 }
 0xd13   : > { %v2506_v38 = vadd.f32 %v4025_v33, %v2505_v36  ;;  %v4290_v39 = vpop.f32.mrb[35].mxu0  ;;  %4317 = vmatprep.subr.bf16.mxu1 %v5532_v32 }
 0xd15   : > { %v2581_v40 = vpack.c.bf16 %v2506_v38, %v2503_v37 }
 0xd17   : > { %4298 = vmatpush3.bf16.msra.mxu0 %v2581_v40 }
 0xd18   : > { %4309 = vmatprep.subr.bf16.mxu0 %v5532_v32 }
 0xde4   : > { %v2551_v41 = vpop.f32.mrb[24].mxu1 }
 0xde5   : > { %v2552_v42 = vadd.f32 %v2551_v41, %v6624_v22  ;;  %v4295_v43 = vpop.f32.mrb[25].mxu1 }
 0xde6   : > { %v2554_v44 = vpop.f32.mrb[26].mxu1 }
 0xde7   : > { %v2555_v45 = vadd.f32 %v2554_v44, %v6626_v24  ;;  %v4296_v46 = vpop.f32.mrb[27].mxu1  ;;  %v2558_v47 = vsel %vm1823_vm7, %v2552_v42, -inf  ;;  %v4047_v44 = vld [vmem:[%s6509_s1 + $0x3] ss:$0 sm:$0xff] }
 0xde8   : > { %2559 = vmax.xlane.f32.xlu0 %v2558_v47 }
 0xde9   : > { %v2561_v48 = vsel %vm1823_vm7, %v2555_v45, -inf }
 0xdea   : > { %2562 = vmax.xlane.f32.xlu1 %v2561_v48 }
 0xe75   : > { %v2560_v49 = vpop.xlane.xlu0 %2559 }
 0xe76   : > { %v2564_v50 = vsub.f32 %v2552_v42, %v2560_v49 }
 0xe77   : > { %v2563_v52 = vpop.xlane.xlu1 %2562 }
 0xe78   : > { %v2566_v53 = vmul.f32 1.442695, %v2564_v50  ;;  %v2565_v54 = vsub.f32 %v2555_v45, %v2563_v52 }
 0xe7a   : > { %4635 = vpow2.f32 %v2566_v53  ;;  %v2568_v55 = vmul.f32 1.442695, %v2565_v54 }
 0xe7c   : > { %4637 = vpow2.f32 %v2568_v55 }
 0xe84   : > { %v4636_v56 = vpop.eup %4635 }
 0xe85   : > { %v2570_v57 = vsel %vm1823_vm7, %v4636_v56, 0.0 }
 0xe86   : > { %v4638_v58 = vpop.eup %4637  ;;  %2571 = vadd.xlane.f32.xlu0 %v2570_v57 }
 0xe87   : > { %v2573_v59 = vsel %vm1823_vm7, %v4638_v58, 0.0 }
 0xe88   : > { %2574 = vadd.xlane.f32.xlu1 %v2573_v59 }
 0xf13   : > { %v2572_v62 = vpop.xlane.xlu0 %2571 }
 0xf14   : > { %4639 = vrcp.f32 %v2572_v62 }
 0xf15   : > { %v2575_v63 = vpop.xlane.xlu1 %2574 }
 0xf16   : > { %4641 = vrcp.f32 %v2575_v63 }
 0xf1e   : > { %v4640_v0 = vpop.eup %4639 }
 0xf1f   : > { %v2578_v2 = vmul.f32 %v4640_v0, %v4636_v56 }
 0xf20   : > { %v4642_v1 = vpop.eup %4641 }
 0xf21   : > { %v2579_v3 = vmul.f32 %v4642_v1, %v4638_v58 }
 0xf23   : > { %v2580_v5 = vpack.c.bf16 %v2579_v3, %v2578_v2 }
 0xf25   : > { %4300 = vmatmul.mubr.msk.bf16.vlgmr.msra.gmra.mrb[36].mxu0 %vm1823_vm7, %v2580_v5 }
 0xf26   : > { %4310 = vmatpush3.bf16.msra.mxu0 %v4599_v4  ;;  %4313 = vmatprep.mubr.msk.bf16.mxu0 %vm5533_vm5, %v5532_v32  ;;  %v4062_v4 = vld [vmem:[%s6519_s4 + $0xc] sm:$0xf]  ;;  %s7064_s4 = scalar_lea.vmem [#allocation26], %s6474_s29 }
 0xf27   : > { %4311 = vmatprep.subr.bf16.mxu0 %v5532_v32  ;;  %v3002_v5 = vsel %vm2217_vm8, %v4062_v4, 0  ;;  %v4612_v4 = vld [vmem:[%s6543_s8 + $0x28] sm:$0xff]  }
 0xf2a   : > { %4312 = vmatpush3.bf16.msra.mxu0 %v4600_v6 }
 0xf2b   : > { %4325 = vmatprep.subr.bf16.mxu0 %v5532_v32 }
 0xf2d   : > { %4314 = vmatmul.mubr.msk.bf16.vlgmr.msra.gmra.mrb[40].mxu0 %vm1531_vm4, %v6578_v51 }
 0xf2e   : > { %4326 = vmatpush3.bf16.msra.mxu0 %v4601_v7  ;;  %4329 = vmatprep.mubr.msk.bf16.mxu0 %vm5533_vm5, %v5532_v32 }
 0xf2f   : > { %4327 = vmatprep.subr.bf16.mxu0 %v5532_v32 }
 0xf32   : > { %4328 = vmatpush3.bf16.msra.mxu0 %v4602_v8 }
 0xf33   : > { %4339 = vmatprep.subr.bf16.mxu0 %v5532_v32 }
 0xf35   : > { %4330 = vmatmul.mubr.msk.bf16.vlgmr.msra.gmra.mrb[44].mxu0 %vm1531_vm4, %v6578_v51 }
 0xf36   : > { %4341 = vmatprep.mubr.msk.bf16.mxu0 %vm5533_vm5, %v5532_v32 }
 0xff8   : > { %v2619_v9 = vpop.f32.mrb[36].mxu0 }
 0xff9   : > { %v4301_v10 = vpop.f32.mrb[37].mxu0 }
 0xffa   : > { %v2622_v11 = vpop.f32.mrb[38].mxu0 }
 0xffb   : > { %v2626_v13 = vpack.c.bf16 %v2622_v11, %v2619_v9  ;;  %v4302_v14 = vpop.f32.mrb[39].mxu0 }
 0xffd   : > { %4306 = vmatmul.mubr.msk.bf16.vlgmr.msra.gmra.mrb[28].mxu1 %vm1775_vm6, %v2626_v13 }
 0xffe   : > { %4318 = vmatpush3.bf16.msra.mxu1 %v4603_v12  ;;  %4321 = vmatprep.mubr.msk.bf16.mxu1 %vm5533_vm5, %v5532_v32 }
 0xfff   : > { %4319 = vmatprep.subr.bf16.mxu1 %v5532_v32 }
0x1000   : > { %v2737_v19 = vpop.f32.mrb[40].mxu0 }
0x1001   : > { %v2738_v20 = vadd.f32 %v4038_v16, %v2737_v19  ;;  %v4315_v21 = vpop.f32.mrb[41].mxu0 }
0x1002   : > { %v2740_v23 = vpop.f32.mrb[42].mxu0  ;;  %4320 = vmatpush3.bf16.msra.mxu1 %v4604_v17 }
0x1003   : > { %v2741_v25 = vadd.f32 %v4038_v16, %v2740_v23  ;;  %v4316_v26 = vpop.f32.mrb[43].mxu0  ;;  %4333 = vmatprep.subr.bf16.mxu1 %v5532_v32  ;;  %v2744_v27 = vmul.f32 0.35355338, %v2738_v20 }
0x1005   : > { %v2745_v28 = vmul.f32 0.35355338, %v2741_v25  ;;  %4322 = vmatmul.mubr.msk.bf16.vlgmr.msra.gmra.mrb[32].mxu1 %vm1531_vm4, %v6578_v51  ;;  %v4064_v25 = vld [vmem:[%s7064_s4] ss:$0 sm:$0xff] }
0x1006   : > { %4335 = vmatprep.mubr.msk.bf16.mxu1 %vm5533_vm5, %v5532_v32 }
0x1007   : > { %v2878_v29 = vpack.c.bf16 %v2745_v28, %v2744_v27  ;;  %v4659_v27 = vld [vmem:[#allocation2] sm:$0xff] }
0x1008   : > { %v2871_v31 = vpop.f32.mrb[44].mxu0 }
0x1009   : > { %v4331_v33 = vpop.f32.mrb[45].mxu0  ;;  %v2872_v35 = vadd.f32 %v4056_v30, %v2871_v31 }
0x100a   : > { %v2874_v34 = vpop.f32.mrb[46].mxu0  ;;  %v4660_v33 = vld [vmem:[#allocation2 + $0x8] sm:$0xff] }
0x100b   : > { %v2875_v36 = vadd.f32 %v4056_v30, %v2874_v34  ;;  %v4332_v37 = vpop.f32.mrb[47].mxu0 }
0x100d   : > { %v2950_v38 = vpack.c.bf16 %v2875_v36, %v2872_v35 }
0x100f   : > { %4340 = vmatpush3.bf16.msra.mxu0 %v2950_v38 }
0x1010   : > { %4351 = vmatprep.subr.bf16.mxu0 %v5532_v32 }
0x10d0   : > { %v2669_v39 = vpop.f32.mrb[28].mxu1 }
0x10d1   : > { %v6761_v40 = vadd.f32 %v2669_v39, %v6708_v15  ;;  %v4307_v51 = vpop.f32.mrb[29].mxu1 }
0x10d2   : > { %v2672_v41 = vpop.f32.mrb[30].mxu1 }
0x10d3   : > { %v6764_v42 = vadd.f32 %v2672_v41, %v6710_v18  ;;  %v4308_v43 = vpop.f32.mrb[31].mxu1 }
0x10d8   : > { %v2805_v45 = vpop.f32.mrb[32].mxu1 }
0x10d9   : > { %v4323_v46 = vpop.f32.mrb[33].mxu1  ;;  %v2806_v48 = vadd.f32 %v4047_v44, %v2805_v45 }
0x10da   : > { %v2808_v47 = vpop.f32.mrb[34].mxu1 }
0x10db   : > { %v2809_v49 = vadd.f32 %v4047_v44, %v2808_v47  ;;  %v4324_v50 = vpop.f32.mrb[35].mxu1  ;;  %v4605_v47 = vld [vmem:[%s6534_s15] sm:$0xff]  }
0x10dd   : > { %v2879_v52 = vpack.c.bf16 %v2809_v49, %v2806_v48  ;;  %v4606_v48 = vld [vmem:[%s6534_s15 + $0x8] sm:$0xff]   ;;  %s7066_s15 = sld [smem:[#allocation58_spill]] }
0x10df   : > { %v2884_v53 = vsel %vm1775_vm6, %v2879_v52, 0 }
0x10e0   : > { %4334 = vmatpush3.bf16.xpose.msra.mxu1 %v2884_v53 }
0x10e1   : > { %4345 = vmatprep.subr.bf16.mxu1 %v5532_v32 }
0x10e3   : > { %p4080_p3 = scmp.ne.s32.totalorder %s7066_s15, 1 }
0x10e4   : > { %vm5535_vm9 = vmmov (!%p4080_p3), 0  }
0x10e7   : > { %4336 = vmatmul.mubr.msk.bf16.vlgmr.msra.gmra.mrb[36].mxu1 %vm1775_vm6, %v2878_v29 }
0x10e8   : > { %4347 = vmatprep.mubr.msk.bf16.mxu1 %vm5533_vm5, %v5532_v32  ;;  %4346 = vmatpush3.bf16.msra.mxu1 %v3002_v5  ;;  %v4613_v5 = vld [vmem:[%s6543_s8 + $0x30] sm:$0xff]  }
0x10e9   : > { %4359 = vmatprep.subr.bf16.mxu1 %v5532_v32 }
0x11ba   : > { %v2920_v15 = vpop.f32.mrb[36].mxu1 }
0x11bb   : > { %v2921_v18 = vadd.f32 %v2920_v15, %v6624_v22  ;;  %v4337_v54 = vpop.f32.mrb[37].mxu1 }
0x11bc   : > { %v2923_v55 = vpop.f32.mrb[38].mxu1 }
0x11bd   : > { %v2924_v56 = vadd.f32 %v2923_v55, %v6626_v24  ;;  %v4338_v57 = vpop.f32.mrb[39].mxu1  ;;  %v2927_v58 = vsel %vm1823_vm7, %v2921_v18, -inf  ;;  %v4065_v55 = vld [vmem:[%s7065_s0] ss:$0 sm:$0xff] }
0x11be   : > { %2928 = vmax.xlane.f32.xlu0 %v2927_v58 }
0x11bf   : > { %v2930_v59 = vsel %vm1823_vm7, %v2924_v56, -inf }
0x11c0   : > { %2931 = vmax.xlane.f32.xlu1 %v2930_v59 }
0x124b   : > { %v2929_v60 = vpop.xlane.xlu0 %2928 }
0x124c   : > { %v2933_v61 = vsub.f32 %v2921_v18, %v2929_v60  ;;  %v4066_v60 = vld [vmem:[%s1271_s12] ss:$0 sm:$0xff] }
0x124d   : > { %v2932_v62 = vpop.xlane.xlu1 %2931 }
0x124e   : > { %v2935_v63 = vmul.f32 1.442695, %v2933_v61  ;;  %v2934_v0 = vsub.f32 %v2924_v56, %v2932_v62 }
0x1250   : > { %4643 = vpow2.f32 %v2935_v63  ;;  %v2937_v1 = vmul.f32 1.442695, %v2934_v0 }
0x1252   : > { %4645 = vpow2.f32 %v2937_v1  ;;  %v4607_v1 = vld [vmem:[%s6543_s8] sm:$0xff]  }
0x125a   : > { %v4644_v22 = vpop.eup %4643 }
0x125b   : > { %v2939_v2 = vsel %vm1823_vm7, %v4644_v22, 0.0 }
0x125c   : > { %v4646_v24 = vpop.eup %4645  ;;  %2940 = vadd.xlane.f32.xlu0 %v2939_v2  ;;  %v4609_v2 = vld [vmem:[%s6543_s8 + $0x10] sm:$0xff]  }
0x125d   : > { %v2942_v3 = vsel %vm1823_vm7, %v4646_v24, 0.0 }
0x125e   : > { %2943 = vadd.xlane.f32.xlu1 %v2942_v3  ;;  %v4611_v3 = vld [vmem:[%s6543_s8 + $0x20] sm:$0xff]  }
0x12e9   : > { %v2941_v6 = vpop.xlane.xlu0 %2940 }
0x12ea   : > { %4647 = vrcp.f32 %v2941_v6  ;;  %v4614_v6 = vld [vmem:[%s6543_s8 + $0x38] sm:$0xff]  }
0x12eb   : > { %v2944_v7 = vpop.xlane.xlu1 %2943 }
0x12ec   : > { %4649 = vrcp.f32 %v2944_v7  ;;  %v4067_v7 = vld [vmem:[%s1288_s16] ss:$0 sm:$0xff] }
0x12f4   : > { %v4648_v8 = vpop.eup %4647 }
0x12f5   : > { %v2947_v10 = vmul.f32 %v4648_v8, %v4644_v22  ;;  %v4608_v22 = vld [vmem:[%s6543_s8 + $0x8] sm:$0xff]  }
0x12f6   : > { %v4650_v9 = vpop.eup %4649 }
0x12f7   : > { %v2948_v11 = vmul.f32 %v4650_v9, %v4646_v24  ;;  %v4610_v24 = vld [vmem:[%s6543_s8 + $0x18] sm:$0xff]  }
0x12f9   : > { %v2949_v12 = vpack.c.bf16 %v2948_v11, %v2947_v10 }
0x12fb   : > { %4342 = vmatmul.mubr.msk.bf16.vlgmr.msra.gmra.mrb[48].mxu0 %vm1823_vm7, %v2949_v12 }
0x12fc   : > { %4355 = vmatprep.mubr.msk.bf16.mxu0 %vm5533_vm5, %v5532_v32  ;;  %4352 = vmatpush3.bf16.msra.mxu0 %v4605_v47 }
0x12fd   : > { %4353 = vmatprep.subr.bf16.mxu0 %v5532_v32 }
0x1300   : > { %4354 = vmatpush3.bf16.msra.mxu0 %v4606_v48 }
0x13ce   : > { %v2988_v13 = vpop.f32.mrb[48].mxu0 }
0x13cf   : > { %v4343_v14 = vpop.f32.mrb[49].mxu0 }
0x13d0   : > { %v2991_v16 = vpop.f32.mrb[50].mxu0 }
0x13d1   : > { %v2995_v17 = vpack.c.bf16 %v2991_v16, %v2988_v13  ;;  %v4344_v19 = vpop.f32.mrb[51].mxu0 }
0x13d3   : > { %4348 = vmatmul.mubr.msk.bf16.vlgmr.msra.gmra.mrb[40].mxu1 %vm1775_vm6, %v2995_v17 }
0x13d4   : > { %4375 = vmatprep.mubr.msk.bf16.mxu1 %vm5533_vm5, %v5532_v32  ;;  %4360 = vmatpush3.bf16.msra.mxu1 %v4607_v1 }
0x13d5   : > { %4361 = vmatprep.subr.bf16.mxu1 %v5532_v32 }
0x13d8   : > { %4362 = vmatpush3.bf16.msra.mxu1 %v4608_v22 }
0x13d9   : > { %4363 = vmatprep.subr.bf16.mxu1 %v5532_v32 }
0x13dc   : > { %4364 = vmatpush3.bf16.msra.mxu1 %v4609_v2  ;;  %v4081_v2 = vld [vmem:[#allocation36] ss:$0 sm:$0xff] (!%p4080_p3) }
0x13dd   : > { %4365 = vmatprep.subr.bf16.mxu1 %v5532_v32 }
0x13e0   : > { %4366 = vmatpush3.bf16.msra.mxu1 %v4610_v24 }
0x13e1   : > { %4367 = vmatprep.subr.bf16.mxu1 %v5532_v32 }
0x13e4   : > { %4368 = vmatpush3.bf16.msra.mxu1 %v4611_v3 }
0x13e5   : > { %4369 = vmatprep.subr.bf16.mxu1 %v5532_v32 }
0x13e8   : > { %4370 = vmatpush3.bf16.msra.mxu1 %v4612_v4 }
0x13e9   : > { %4371 = vmatprep.subr.bf16.mxu1 %v5532_v32 }
0x13ec   : > { %4372 = vmatpush3.bf16.msra.mxu1 %v4613_v5  ;;  %v4082_v5 = vld [vmem:[#allocation38] ss:$0 sm:$0xff] (!%p4080_p3) }
0x13ed   : > { %4373 = vmatprep.subr.bf16.mxu1 %v5532_v32 }
0x13f0   : > { %4374 = vmatpush3.bf16.msra.mxu1 %v4614_v6 }
0x14a6   : > { %v3038_v20 = vpop.f32.mrb[40].mxu1 }
0x14a7   : > { %v3045_v21 = vadd.f32 %v3038_v20, %v6761_v40  ;;  %v4349_v23 = vpop.f32.mrb[41].mxu1 }
0x14a8   : > { %v3041_v26 = vpop.f32.mrb[42].mxu1 }
0x14a9   : > { %v3047_v28 = vadd.f32 %v4659_v27, %v3045_v21  ;;  %v3046_v29 = vadd.f32 %v3041_v26, %v6764_v42  ;;  %v4350_v30 = vpop.f32.mrb[43].mxu1 }
0x14ab   : > { %v6791_v31 = vadd.f32 %v4064_v25, %v3047_v28  ;;  %v3048_v34 = vadd.f32 %v4660_v33, %v3046_v29 }
0x14ad   : > { %v6793_v35 = vadd.f32 %v4064_v25, %v3048_v34  ;;  %v3060_v36 = vsel %vm1531_vm4, %v6791_v31, 0.0 }
0x14ae   : > { %3061 = vadd.xlane.f32.xlu0 %v3060_v36 }
0x14af   : > { %v3063_v37 = vsel %vm1531_vm4, %v6793_v35, 0.0 }
0x14b0   : > { %3064 = vadd.xlane.f32.xlu1 %v3063_v37 }
0x153b   : > { %v3062_v38 = vpop.xlane.xlu0 %3061 }
0x153c   : > { %v3066_v39 = vmul.f32 0.03125, %v3062_v38 }
0x153d   : > { %v3065_v40 = vpop.xlane.xlu1 %3064 }
0x153e   : > { %v3068_v51 = vsub.f32 %v6791_v31, %v3066_v39  ;;  %v3067_v41 = vmul.f32 0.03125, %v3065_v40  ;;  %v4071_v39 = vld [vmem:[%s1305_s22] ss:$0 sm:$0xff] }
0x1540   : > { %v3069_v42 = vsub.f32 %v6793_v35, %v3067_v41  ;;  %v3070_v43 = vmul.f32 %v3068_v51, %v3068_v51 }
0x1542   : > { %v3072_v44 = vsel %vm1531_vm4, %v3070_v43, 0.0  ;;  %v3071_v45 = vmul.f32 %v3069_v42, %v3069_v42 }
0x1543   : > { %3073 = vadd.xlane.f32.xlu0 %v3072_v44 }
0x1544   : > { %v3075_v46 = vsel %vm1531_vm4, %v3071_v45, 0.0 }
0x1545   : > { %3076 = vadd.xlane.f32.xlu1 %v3075_v46 }
0x15d0   : > { %v3074_v49 = vpop.xlane.xlu0 %3073 }
0x15d1   : > { %v3078_v50 = vmul.f32 0.03125, %v3074_v49 }
0x15d2   : > { %v3077_v52 = vpop.xlane.xlu1 %3076 }
0x15d3   : > { %v3080_v53 = vadd.f32 1e-05, %v3078_v50  ;;  %v3079_v15 = vmul.f32 0.03125, %v3077_v52 }
0x15d5   : > { %4651 = vrsqrt.f32 %v3080_v53  ;;  %v3081_v18 = vadd.f32 1e-05, %v3079_v15 }
0x15d7   : > { %4653 = vrsqrt.f32 %v3081_v18 }
0x15df   : > { %v4652_v54 = vpop.eup %4651 }
0x15e0   : > { %v3084_v56 = vmul.f32 %v4652_v54, %v3068_v51 }
0x15e1   : > { %v4654_v57 = vpop.eup %4653 }
0x15e2   : > { %v3092_v58 = vmul.f32 %v4065_v55, %v3084_v56  ;;  %v3085_v59 = vmul.f32 %v4654_v57, %v3069_v42  ;;  %v4661_v56 = vld [vmem:[#allocation39] sm:$0xff] (!%p4080_p3)   ;;  %v5534_v57 = vmov (!%p4080_p3), 0.0  }
0x15e3   : > { %4379 = vmatprep.subr.bf16.mxu0 (!%p4080_p3), %v5534_v57 }
0x15e4   : > { %v3093_v61 = vmul.f32 %v4065_v55, %v3085_v59  ;;  %v3100_v62 = vadd.f32 %v4066_v60, %v3092_v58  ;;  %v4662_v58 = vld [vmem:[#allocation39 + $0x8] sm:$0xff] (!%p4080_p3)  }
0x15e6   : > { %v3101_v63 = vadd.f32 %v4066_v60, %v3093_v61 }
0x15e8   : > { %v3102_v0 = vpack.c.bf16 %v3101_v63, %v3100_v62 }
0x15ea   : > { %4356 = vmatmul.mubr.msk.bf16.vlgmr.msra.gmra.mrb[52].mxu0 %vm1531_vm4, %v3102_v0 }
0x15eb   : > { %4383 = vmatprep.mubr.msk.bf16.mxu0 (!%p4080_p3), %vm5535_vm9, %v5534_v57  ;;  %4380 = vmatpush3.bf16.msra.mxu0 (!%p4080_p3), %v4661_v56 }
0x15ec   : > { %4381 = vmatprep.subr.bf16.mxu0 (!%p4080_p3), %v5534_v57 }
0x15ef   : > { %4382 = vmatpush3.bf16.msra.mxu0 (!%p4080_p3), %v4662_v58 }
0x16bd   : > { %v3163_v8 = vpop.f32.mrb[52].mxu0 }
0x16be   : > { %v3164_v9 = vadd.f32 %v4067_v7, %v3163_v8  ;;  %v4357_v10 = vpop.f32.mrb[53].mxu0 }
0x16bf   : > { %v3166_v11 = vpop.f32.mrb[54].mxu0  ;;  %v4083_v10 = vld [vmem:[#allocation41] ss:$0 sm:$0xff] (!%p4080_p3) }
0x16c0   : > { %v3172_v12 = vmul.f32 0.044715, %v3164_v9  ;;  %v3167_v13 = vadd.f32 %v4067_v7, %v3166_v11  ;;  %v4358_v14 = vpop.f32.mrb[55].mxu0  ;;  %v3170_v30 = vmul.f32 0.5, %v3164_v9 }
0x16c2   : > { %v3174_v16 = vmul.f32 %v3172_v12, %v3164_v9  ;;  %v3173_v17 = vmul.f32 0.044715, %v3167_v13  ;;  %v3171_v33 = vmul.f32 0.5, %v3167_v13 }
0x16c4   : > { %v3176_v19 = vmul.f32 %v3174_v16, %v3164_v9  ;;  %v3175_v20 = vmul.f32 %v3173_v17, %v3167_v13 }
0x16c6   : > { %v3178_v21 = vadd.f32 %v3176_v19, %v3164_v9  ;;  %v3177_v23 = vmul.f32 %v3175_v20, %v3167_v13 }
0x16c8   : > { %v3180_v25 = vmul.f32 0.7978846, %v3178_v21  ;;  %v3179_v26 = vadd.f32 %v3177_v23, %v3167_v13 }
0x16ca   : > { %4655 = vtanh.f32 %v3180_v25  ;;  %v3181_v32 = vmul.f32 0.7978846, %v3179_v26 }
0x16cc   : > { %4657 = vtanh.f32 %v3181_v32 }
0x16d4   : > { %v4656_v27 = vpop.eup %4655 }
0x16d5   : > { %v3184_v28 = vadd.f32 1.0, %v4656_v27 }
0x16d6   : > { %v4658_v29 = vpop.eup %4657 }
0x16d7   : > { %v3185_v34 = vadd.f32 1.0, %v4658_v29  ;;  %v3186_v36 = vmul.f32 %v3184_v28, %v3170_v30 }
0x16d9   : > { %v3187_v37 = vmul.f32 %v3185_v34, %v3171_v33 }
0x16db   : > { %v3188_v38 = vpack.c.bf16 %v3187_v37, %v3186_v36 }
0x16dd   : > { %4376 = vmatmul.mubr.bf16.vlgmr.msra.gmra.mrb[44].mxu1 %v3188_v38 }
0x17b0   : > { %v3294_v40 = vpop.f32.mrb[44].mxu1 }
0x17b1   : > { %v3295_v51 = vadd.f32 %v4071_v39, %v3294_v40  ;;  %v4377_v41 = vpop.f32.mrb[45].mxu1  ;;  %3308 = sbr.rel (%p4080_p3) target bundleno = 6605 (0x19cd), region = 228 }
0x17b2   : > { %v3297_v42 = vpop.f32.mrb[46].mxu1 }
0x17b3   : > { %v3301_v43 = vadd.f32 %v3295_v51, %v6791_v31  ;;  %v3298_v44 = vadd.f32 %v4071_v39, %v3297_v42  ;;  %v4378_v45 = vpop.f32.mrb[47].mxu1 }
0x17b5   : > { %3303 = vst.msk [vmem:[#allocation2] sm:$0xff] %vm1531_vm4, %v3301_v43  ;;  %v3302_v46 = vadd.f32 %v3298_v44, %v6793_v35  ;;  %v3311_v47 = vsel (!%p4080_p3), %vm1531_vm4, %v3301_v43, 0.0 }
0x17b6   : > { %3312 = vadd.xlane.f32.xlu0 (!%p4080_p3), %v3311_v47 }
0x17b7   : > { %3304 = vst.msk [vmem:[#allocation2 + $0x8] sm:$0xff] %vm1531_vm4, %v3302_v46  ;;  %v3314_v48 = vsel (!%p4080_p3), %vm1531_vm4, %v3302_v46, 0.0 }
0x17ba   : > { %3315 = vadd.xlane.f32.xlu0 %v3314_v48 }
0x1843   : > { %v3313_v49 = vpop.xlane.xlu0 %3312 }
0x1844   : > { %v3317_v50 = vmul.f32 0.03125, %v3313_v49 }
0x1846   : > { %v3319_v31 = vsub.f32 %v3301_v43, %v3317_v50 }
0x1847   : > { %v3316_v52 = vpop.xlane.xlu0 %3315 }
0x1848   : > { %v3318_v53 = vmul.f32 0.03125, %v3316_v52  ;;  %v3321_v15 = vmul.f32 %v3319_v31, %v3319_v31 }
0x184a   : > { %v3320_v18 = vsub.f32 %v3302_v46, %v3318_v53  ;;  %v3323_v35 = vsel %vm1531_vm4, %v3321_v15, 0.0 }
0x184b   : > { %3324 = vadd.xlane.f32.xlu1 %v3323_v35 }
0x184c   : > { %v3322_v54 = vmul.f32 %v3320_v18, %v3320_v18 }
0x184e   : > { %v3326_v55 = vsel %vm1531_vm4, %v3322_v54, 0.0 }
0x184f   : > { %3327 = vadd.xlane.f32.xlu1 %v3326_v55 }
0x18d8   : > { %v3325_v59 = vpop.xlane.xlu1 %3324 }
0x18d9   : > { %v3329_v60 = vmul.f32 0.03125, %v3325_v59 }
0x18db   : > { %v3331_v61 = vadd.f32 1e-05, %v3329_v60 }
0x18dc   : > { %v3328_v62 = vpop.xlane.xlu1 %3327 }
0x18dd   : > { %4663 = vrsqrt.f32 %v3331_v61  ;;  %v3330_v63 = vmul.f32 0.03125, %v3328_v62 }
0x18df   : > { %v3332_v0 = vadd.f32 1e-05, %v3330_v63 }
0x18e1   : > { %4665 = vrsqrt.f32 %v3332_v0 }
0x18e7   : > { %v4664_v1 = vpop.eup %4663 }
0x18e8   : > { %v3335_v22 = vmul.f32 %v4664_v1, %v3319_v31 }
0x18ea   : > { %v3343_v4 = vmul.f32 %v4081_v2, %v3335_v22 }
0x18eb   : > { %v4666_v24 = vpop.eup %4665 }
0x18ec   : > { %v3336_v3 = vmul.f32 %v4666_v24, %v3320_v18  ;;  %v3351_v7 = vadd.f32 %v4082_v5, %v3343_v4 }
0x18ee   : > { %v3344_v6 = vmul.f32 %v4081_v2, %v3336_v3 }
0x18f0   : > { %v3352_v8 = vadd.f32 %v4082_v5, %v3344_v6 }
0x18f2   : > { %v3353_v9 = vpack.c.bf16 %v3352_v8, %v3351_v7 }
0x18f4   : > { %4384 = vmatmul.mubr.msk.bf16.vlgmr.msra.gmra.mrb[0].mxu0 %vm1531_vm4, %v3353_v9 }
0x19c7   : > { %v3414_v11 = vpop.f32.mrb[0].mxu0 }
0x19c8   : > { %v3415_v12 = vadd.f32 %v4083_v10, %v3414_v11  ;;  %v4385_v13 = vpop.f32.mrb[1].mxu0 }
0x19c9   : > { %v3417_v14 = vpop.f32.mrb[2].mxu0 }
0x19ca   : > { %3421 = vst [vmem:[#allocation42] sm:$0xff] %v3415_v12  ;;  %v3418_v16 = vadd.f32 %v4083_v10, %v3417_v14  ;;  %v4386_v17 = vpop.f32.mrb[3].mxu0 }
0x19cc   : > { %3422 = vst [vmem:[#allocation42 + $0x8] sm:$0xff] %v3418_v16 }
0x19cd PF: > { %s7067_s8 = sld [smem:[#allocation59_spill]]  ;;  %s5536_s14 = smov [#allocation42]  }
0x19ce   : > { %s3432_s29 = sshll.u32 %s5536_s14, 4  ;;  %s3433_s29 = int_to_ptr.vmem [resolvable:$true] %s3432_s29 }
0x19cf   : > { %s5367_s9 = scalar_lea.vmem %s3433_s29, 256  ;;  %p5374_p11 = scmp.lt.s32.totalorder %s3433_s29, %s3433_s29 }
0x19d0   : > { %p5368_p6 = scmp.ne.s32.totalorder %s3433_s29, %s5367_s9  ;;  %p5375_p12 = scmp.lt.s32.totalorder %s5367_s9, %s5367_s9 }
0x19d2   : > { %p5376_p0 = por %p5375_p12, %p5374_p11 }
0x19d3   : > { %p4505_p4 = scmp.eq.s32.totalorder %s7067_s8, 1 }
0x19d5   : > { %p5369_p9 = pnand %p5368_p6, %p4505_p4 }
0x19d7   : > { %p5370_p5 = pneg %p5369_p9 }
0x19d9   : > { %p5377_p1 = pnand %p5376_p0, %p5370_p5 }
0x19db   : > { %5380 = shalt.err (!%p5377_p1)
}
0x19dc   : > { %s7068_s5 = sld [smem:[#allocation86_spill]] }
0x19e2   : > { %s5381_s10 = scalar_lea.hbm %s7068_s5, 256 }
0x19e3   : > { %p5382_p10 = scmp.ne.s32.totalorder %s7068_s5, %s5381_s10  ;;  %p5387_p13 = scmp.lt.u32.totalorder %s5381_s10, %s7068_s5 }
0x19e5   : > { %p5383_p8 = pnand %p5382_p10, %p4505_p4 }
0x19e7   : > { %p5384_p2 = pneg %p5383_p8 }
0x19e9   : > { %p5389_p7 = pnand %p5387_p13, %p5384_p2 }
0x19eb   : > { %5392 = shalt.err (!%p5389_p7)
}
0x19ec   : > { %s5537_s16 = smov 128   ;;  %s5538_s22 = smov 8  }
0x19ed   : > { %4456 = dma.vmem_to_hbm [thread:$0]  (%p4505_p4), %s3433_s29, 256, %s7068_s5, [#allocation5], %s5537_s16, %s5537_s16, %s5538_s22  }
0x19ee   : > { %5470 = dma.done.wait (%p4505_p4), [#allocation5], 256  }
0x19ef   : > { %5472 = vsyncadd (%p4505_p4), [#allocation5], 4294967040 }
0x19f0 PF: > { %s65_s3 = sadd.s32 1, %s5495_s3   ;;  %s7069_s29 = sld [smem:[#allocation57_spill]] }
0x19f1   : > { %p62_p3 = scmp.ge.s32.totalorder %s65_s3, 4   ;;  %s7070_s30 = sld [smem:[#allocation62_spill]] }
0x19f2   : > { %s7071_s4 = sld [smem:[#allocation60_spill]]  ;;  %s7072_s2 = smov %s5483_s6 }
0x19f3   :  { %64 = sbr.rel (!%p62_p3) target bundleno = 48 (0x30), region = 404 }
0x19f7   : > { %s7073_s6 = smov %s7070_s30  ;;  %s7074_s30 = smov %s5491_s7 }
0x19f8   : > { %s7075_s7 = smov %s7071_s4 }
0x19fa   :  { %3448 = vsyncpa [#allocation4], 1 }
0x19fb   :  { %3450 = vsyncpa [#allocation4 + $0x1], 1 }
0x19fc   :  { %3451 = vsyncpa [#allocation7], 1 }
0x19fd   :  { %3452 = vsyncpa [#allocation10], 1 }
0x19fe   :  { %3453 = vsyncpa [#allocation13], 1 }
0x19ff   :  { %3455 = vsyncpa [#allocation13 + $0x1], 1 }
0x1a00   :  { %3456 = vsyncpa [#allocation16], 1 }
0x1a01   :  { %3458 = vsyncpa [#allocation16 + $0x1], 1 }
0x1a02   :  { %3459 = vsyncpa [#allocation19], 1 }
0x1a03   :  { %3461 = vsyncpa [#allocation19 + $0x1], 1 }
0x1a04   :  { %3462 = vsyncpa [#allocation22], 1 }
0x1a05   :  { %3464 = vsyncpa [#allocation22 + $0x1], 1 }
0x1a06   :  { %3465 = vsyncpa [#allocation25], 1 }
0x1a07   :  { %3467 = vsyncpa [#allocation25 + $0x1], 1 }
0x1a08   :  { %3468 = vsyncpa [#allocation28], 1 }
0x1a09   :  { %3470 = vsyncpa [#allocation28 + $0x1], 1 }
0x1a0a   :  { %3471 = vsyncpa [#allocation31], 1 }
0x1a0b   :  { %3473 = vsyncpa [#allocation31 + $0x1], 1 }
0x1a0c   :  { %3474 = vsyncpa [#allocation34], 1 }
0x1a0d   :  { %3476 = vsyncpa [#allocation34 + $0x1], 1 }
0x1a0e   :  { %3477 = vsyncpa [#allocation37], 1 }
0x1a0f   :  { %3478 = vsyncpa [#allocation40], 1 }
0x1a10   :  { %3479 = vsyncpa [#allocation5], 1 }
0x1a11   :  { %3481 = vsyncpa [#allocation5 + $0x1], 1 }

</bundles_post_ra>
